<compile_context>
chip_gen: v7x
topology: tpu7x:2x2x1
jax: 0.10.0
libtpu: 0.0.40
codegen_flags: <defaults>
</compile_context>

<pallas_src>
import numpy as np
import jax
import jax.numpy as jnp
from jax.experimental import pallas as pl
from jax.experimental.pallas import tpu as pltpu


# ----------------------------------------------------------------------------
# Host-side constant spatial operators
# ----------------------------------------------------------------------------
def _adaptive_pool_matrix(in_size, out_size):
    """1-D nn.AdaptiveAvgPool as a (out_size, in_size) averaging matrix."""
    M = np.zeros((out_size, in_size), np.float32)
    for i in range(out_size):
        start = (i * in_size) // out_size
        end = ((i + 1) * in_size + out_size - 1) // out_size
        M[i, start:end] = 1.0 / (end - start)
    return M


def _bilinear_up_matrix(in_size, out_size):
    """1-D bilinear interpolation matrix, align_corners=True (F.interpolate)."""
    M = np.zeros((out_size, in_size), np.float32)
    if in_size == 1:
        M[:, 0] = 1.0
        return M
    scale = (in_size - 1) / (out_size - 1)
    for i in range(out_size):
        src = i * scale
        i0 = min(int(np.floor(src)), in_size - 2)
        frac = src - i0
        M[i, i0] = 1.0 - frac
        M[i, i0 + 1] = frac
    return M


# ----------------------------------------------------------------------------
# Fused PSP kernel: pyramid stages (3 matmuls) + concat + 3x3 bottleneck (im2col)
# ----------------------------------------------------------------------------
def _make_psp_kernel(H, W, Cin, Ctot):
    HW = H * W

    def kernel(x_ref, mp_ref, w1_ref, b1_ref, mask_ref, mu_ref, wb_ref, bb_ref,
               out_ref):
        # ---- pyramid stages: pool -> 1x1 conv (+BN bias) -> ReLU -> bilinear up
        x = x_ref[0].reshape(HW, Cin)                                     # bf16
        pooled = jnp.dot(mp_ref[...], x,
                         preferred_element_type=jnp.float32)              # (S, Cin)
        z = jnp.dot(pooled.astype(jnp.bfloat16), w1_ref[...],
                    preferred_element_type=jnp.float32)                   # (S, n*Cout)
        # block-diagonal stage select (mask in {0,1}), bias+ReLU kept in f32
        y = mask_ref[...].astype(jnp.float32) * jnp.maximum(z + b1_ref[...], 0.0)
        up = jnp.dot(mu_ref[...], y.astype(jnp.bfloat16),
                     preferred_element_type=jnp.float32)                  # (HW, n*Cout)

        # ---- channel concat [features | upsampled pyramids] (lane-aligned 128+128)
        cat = jnp.concatenate([x, up.astype(jnp.bfloat16)], axis=-1)      # (HW, Ctot) bf16
        cat3 = cat.reshape(H, W, Ctot)

        # ---- bottleneck 3x3 conv: in-kernel zero halo + im2col + one K=9*Ctot matmul
        zr = jnp.zeros((1, W, Ctot), jnp.bfloat16)
        zc = jnp.zeros((H + 2, 1, Ctot), jnp.bfloat16)
        padded = jnp.concatenate([zr, cat3, zr], axis=0)                  # (H+2, W,   Ctot)
        padded = jnp.concatenate([zc, padded, zc], axis=1)                # (H+2, W+2, Ctot)
        cols = [padded[dy:dy + H, dx:dx + W, :].reshape(HW, Ctot)
                for dy in range(3) for dx in range(3)]
        col = jnp.concatenate(cols, axis=-1)                              # (HW, 9*Ctot) bf16
        out = jnp.dot(col, wb_ref[...],
                      preferred_element_type=jnp.float32)                 # (HW, Cin)
        out = jnp.maximum(out + bb_ref[...], 0.0)
        # TODO(synk): Dropout2d(0.1) is identity at inference; training-mode dropout not implemented.
        out_ref[...] = out.reshape(1, H, W, Cin)                          # 128 lanes -> unmasked stores

    return kernel


def psp_forward(params, features_nchw):
    """PSPModule.forward.  features_nchw: (N, Cin, H, W) float32 -> (N, Cin, H, W) float32."""
    N, Cin, H, W = features_nchw.shape
    x = jnp.transpose(features_nchw, (0, 2, 3, 1)).astype(jnp.bfloat16)   # NHWC, bf16 for MXU
    S = params["mp"].shape[0]
    NCb = params["w1"].shape[1]
    Ctot = Cin + NCb
    HW = H * W

    flops = 2 * N * (S * HW * Cin + S * NCb * Cin + HW * NCb * S + HW * Cin * 9 * Ctot)
    bytes_accessed = (
        N * HW * Cin * 2 + N * HW * Cin * 4          # activations in (bf16) / out (f32)
        + params["mp"].size * 2 + params["mu"].size * 2
        + params["w1"].size * 2 + params["mask"].size * 2
        + params["wb"].size * 2
        + params["b1"].size * 4 + params["bb"].size * 4)

    out_nhwc = pl.pallas_call(
        _make_psp_kernel(H, W, Cin, Ctot),
        out_shape=jax.ShapeDtypeStruct((N, H, W, Cin), jnp.float32),
        grid=(N,),
        in_specs=[
            pl.BlockSpec((1, H, W, Cin), lambda n: (n, 0, 0, 0)),   # activations
            pl.BlockSpec((S, HW), lambda n: (0, 0)),                # adaptive-pool matrix
            pl.BlockSpec((Cin, NCb), lambda n: (0, 0)),             # stage 1x1 weights (BN folded)
            pl.BlockSpec((1, NCb), lambda n: (0, 0)),               # stage BN biases
            pl.BlockSpec((S, NCb), lambda n: (0, 0)),               # block-diagonal stage mask
            pl.BlockSpec((HW, S), lambda n: (0, 0)),                # bilinear upsample matrix
            pl.BlockSpec((9 * Ctot, Cin), lambda n: (0, 0)),        # bottleneck 3x3 (im2col, BN folded)
            pl.BlockSpec((1, Cin), lambda n: (0, 0)),               # bottleneck BN bias
        ],
        out_specs=pl.BlockSpec((1, H, W, Cin), lambda n: (n, 0, 0, 0)),
        compiler_params=pltpu.CompilerParams(
            dimension_semantics=("parallel",)),                     # megacore: one batch item per TC
        cost_estimate=pl.CostEstimate(flops=flops, transcendentals=0,
                                      bytes_accessed=bytes_accessed),
    )(x, params["mp"], params["w1"], params["b1"], params["mask"],
      params["mu"], params["wb"], params["bb"])

    return jnp.transpose(out_nhwc, (0, 3, 1, 2))                    # back to NCHW


# ----------------------------------------------------------------------------
# Pure-JAX reference (same folded parameters, f32 math) for validation
# ----------------------------------------------------------------------------
def psp_reference(params, features_nchw):
    N, Cin, H, W = features_nchw.shape
    HW = H * W
    # mirror the kernel's bf16 cast of the activations
    x = jnp.transpose(features_nchw, (0, 2, 3, 1)).astype(jnp.bfloat16).astype(jnp.float32)
    x = x.reshape(N, HW, Cin)
    mp = params["mp"].astype(jnp.float32)
    mu = params["mu"].astype(jnp.float32)
    w1 = params["w1"].astype(jnp.float32)
    wb = params["wb"].astype(jnp.float32)
    mask = params["mask"].astype(jnp.float32)
    b1, bb = params["b1"], params["bb"]

    pooled = jnp.einsum("sp,npc->nsc", mp, x)
    z = jnp.einsum("nsc,ck->nsk", pooled, w1)
    y = mask[None] * jnp.maximum(z + b1[None], 0.0)
    up = jnp.einsum("ps,nsk->npk", mu, y)
    cat = jnp.concatenate([x, up], axis=-1)
    Ctot = cat.shape[-1]
    cat = cat.reshape(N, H, W, Ctot)
    padded = jnp.pad(cat, ((0, 0), (1, 1), (1, 1), (0, 0)))
    cols = [padded[:, dy:dy + H, dx:dx + W, :].reshape(N, HW, Ctot)
            for dy in range(3) for dx in range(3)]
    col = jnp.concatenate(cols, axis=-1)
    out = jnp.maximum(jnp.einsum("npk,kc->npc", col, wb) + bb[None], 0.0)
    out = out.reshape(N, H, W, Cin)
    return jnp.transpose(out, (0, 3, 1, 2))


# ----------------------------------------------------------------------------
# Parameter construction (random weights; eval-mode BN folded into convs)
# ----------------------------------------------------------------------------
def init_psp_params(key, in_channels, bin_sizes, H, W, eps=1e-5):
    n = len(bin_sizes)
    assert in_channels % n == 0
    out_ch = in_channels // n

    # Constant spatial operators (shape-only): pool and upsample matrices.
    mp_blocks, mu_blocks, sizes = [], [], []
    for b in bin_sizes:
        Ph, Pw = _adaptive_pool_matrix(H, b), _adaptive_pool_matrix(W, b)
        Uh, Uw = _bilinear_up_matrix(b, H), _bilinear_up_matrix(b, W)
        mp_blocks.append(np.kron(Ph, Pw))     # (b*b, H*W)
        mu_blocks.append(np.kron(Uh, Uw))     # (H*W, b*b)
        sizes.append(b * b)
    S = sum(sizes)
    mp = np.concatenate(mp_blocks, axis=0)    # (S, H*W)
    mu = np.concatenate(mu_blocks, axis=1)    # (H*W, S)

    # Block-diagonal mask: pooled rows of stage s only feed stage s's channels.
    mask = np.zeros((S, n * out_ch), np.float32)
    r = 0
    for s, sz in enumerate(sizes):
        mask[r:r + sz, s * out_ch:(s + 1) * out_ch] = 1.0
        r += sz

    # Stage 1x1 convs + eval-mode BN (scale folded into weights, bias kept).
    w1_blocks, b1_blocks = [], []
    for _ in range(n):
        key, k1, k2, k3, k4, k5 = jax.random.split(key, 6)
        w = 0.1 * jax.random.normal(k1, (in_channels, out_ch), jnp.float32)
        gamma = 1.0 + 0.1 * jax.random.normal(k2, (out_ch,), jnp.float32)
        beta = 0.05 * jax.random.normal(k3, (out_ch,), jnp.float32)
        mean = 0.1 * jax.random.normal(k4, (out_ch,), jnp.float32)
        var = jax.random.uniform(k5, (out_ch,), jnp.float32, minval=0.5, maxval=1.5)
        sc = gamma * jax.lax.rsqrt(var + eps)
        w1_blocks.append(w * sc[None, :])
        b1_blocks.append(beta - mean * sc)
    w1 = jnp.concatenate(w1_blocks, axis=1)          # (Cin, n*out_ch)
    b1 = jnp.concatenate(b1_blocks)[None, :]         # (1,  n*out_ch)

    # Bottleneck 3x3 conv + eval-mode BN, stored in im2col order (ky,kx,cin,cout).
    c_tot = in_channels + n * out_ch
    key, k1, k2, k3, k4, k5 = jax.random.split(key, 6)
    wb = 0.05 * jax.random.normal(k1, (3, 3, c_tot, in_channels), jnp.float32)
    gamma = 1.0 + 0.1 * jax.random.normal(k2, (in_channels,), jnp.float32)
    beta = 0.05 * jax.random.normal(k3, (in_channels,), jnp.float32)
    mean = 0.1 * jax.random.normal(k4, (in_channels,), jnp.float32)
    var = jax.random.uniform(k5, (in_channels,), jnp.float32, minval=0.5, maxval=1.5)
    sc = gamma * jax.lax.rsqrt(var + eps)
    wb = (wb * sc[None, None, None, :]).reshape(9 * c_tot, in_channels)
    bb = (beta - mean * sc)[None, :]

    return {
        "mp": jnp.asarray(mp, jnp.bfloat16),
        "mu": jnp.asarray(mu, jnp.bfloat16),
        "mask": jnp.asarray(mask, jnp.bfloat16),   # exact 0/1 values, half the bytes
        "w1": w1.astype(jnp.bfloat16),
        "b1": b1.astype(jnp.float32),
        "wb": wb.astype(jnp.bfloat16),
        "bb": bb.astype(jnp.float32),
    }


if __name__ == "__main__":
    key = jax.random.PRNGKey(0)
    N, Cin, H, W = 2, 128, 16, 16          # in_channels divisible by len(bin_sizes)
    bin_sizes = (1, 2, 4, 6)

    kx, kp = jax.random.split(key)
    features = jax.random.normal(kx, (N, Cin, H, W), jnp.float32)   # NCHW, PyTorch layout
    params = init_psp_params(kp, Cin, bin_sizes, H, W)

    fwd = jax.jit(psp_forward)
    out = jax.block_until_ready(fwd(params, features))

    assert out.shape == (N, Cin, H, W)
    assert bool(jnp.all(jnp.isfinite(out)))

    # correctness check against a pure-JAX f32 reference (loose tol for bf16 matmuls)
    ref = psp_reference(params, features)
    max_err = float(jnp.max(jnp.abs(out - ref)))
    assert max_err < 0.1, f"max abs error vs reference: {max_err}"

    print("KERNEL_OK")
</pallas_src>

<mosaic_0001>
module attributes {stable_mosaic.version = 11 : i64} {
  func.func @kernel(%arg0: i32, %arg1: memref<1x16x16x128xbf16, #tpu.memory_space<vmem>>, %arg2: memref<57x256xbf16, #tpu.memory_space<vmem>>, %arg3: memref<128x128xbf16, #tpu.memory_space<vmem>>, %arg4: memref<1x128xf32, #tpu.memory_space<vmem>>, %arg5: memref<57x128xbf16, #tpu.memory_space<vmem>>, %arg6: memref<256x57xbf16, #tpu.memory_space<vmem>>, %arg7: memref<2304x128xbf16, #tpu.memory_space<vmem>>, %arg8: memref<1x128xf32, #tpu.memory_space<vmem>>, %arg9: memref<1x16x16x128xf32, #tpu.memory_space<vmem>>) attributes {dimension_semantics = [#tpu.dimension_semantics<parallel>], iteration_bounds = array<i64: 2>, scalar_prefetch = 0 : i64, scratch_operands = 0 : i64, tpu.core_type = #tpu.core_type<tc>, window_params = [{transform_indices = @transform_0, window_bounds = array<i64: 1, 16, 16, 128>}, {pipeline_mode = #tpu.pipeline_mode<synchronous>, transform_indices = @transform_1, window_bounds = array<i64: 57, 256>}, {pipeline_mode = #tpu.pipeline_mode<synchronous>, transform_indices = @transform_2, window_bounds = array<i64: 128, 128>}, {pipeline_mode = #tpu.pipeline_mode<synchronous>, transform_indices = @transform_3, window_bounds = array<i64: 1, 128>}, {pipeline_mode = #tpu.pipeline_mode<synchronous>, transform_indices = @transform_4, window_bounds = array<i64: 57, 128>}, {pipeline_mode = #tpu.pipeline_mode<synchronous>, transform_indices = @transform_5, window_bounds = array<i64: 256, 57>}, {pipeline_mode = #tpu.pipeline_mode<synchronous>, transform_indices = @transform_6, window_bounds = array<i64: 2304, 128>}, {pipeline_mode = #tpu.pipeline_mode<synchronous>, transform_indices = @transform_7, window_bounds = array<i64: 1, 128>}, {transform_indices = @transform_8, window_bounds = array<i64: 1, 16, 16, 128>}]} {
    %c0 = arith.constant 0 : index
    %c0_0 = arith.constant 0 : index
    %c0_1 = arith.constant 0 : index
    %c0_2 = arith.constant 0 : index
    %0 = vector.load %arg1[%c0, %c0_0, %c0_1, %c0_2] : memref<1x16x16x128xbf16, #tpu.memory_space<vmem>>, vector<1x16x16x128xbf16>
    %1 = vector.shape_cast %0 : vector<1x16x16x128xbf16> to vector<16x16x128xbf16>
    %2 = vector.shape_cast %1 : vector<16x16x128xbf16> to vector<256x128xbf16>
    %c0_3 = arith.constant 0 : index
    %c0_4 = arith.constant 0 : index
    %3 = vector.load %arg2[%c0_3, %c0_4] : memref<57x256xbf16, #tpu.memory_space<vmem>>, vector<57x256xbf16>
    %cst = arith.constant dense<0.000000e+00> : vector<57x128xf32>
    %4 = tpu.matmul %3, %2, %cst {dimension_numbers = #tpu.dot_dimension_numbers<[1], [0], [0], [1], [0, 0, 1, 1], [], []>} : vector<57x256xbf16>, vector<256x128xbf16>, vector<57x128xf32> -> vector<57x128xf32>
    %5 = arith.truncf %4 : vector<57x128xf32> to vector<57x128xbf16>
    %c0_5 = arith.constant 0 : index
    %c0_6 = arith.constant 0 : index
    %6 = vector.load %arg3[%c0_5, %c0_6] : memref<128x128xbf16, #tpu.memory_space<vmem>>, vector<128x128xbf16>
    %cst_7 = arith.constant dense<0.000000e+00> : vector<57x128xf32>
    %7 = tpu.matmul %5, %6, %cst_7 {dimension_numbers = #tpu.dot_dimension_numbers<[1], [0], [0], [1], [0, 0, 1, 1], [], []>} : vector<57x128xbf16>, vector<128x128xbf16>, vector<57x128xf32> -> vector<57x128xf32>
    %c0_8 = arith.constant 0 : index
    %c0_9 = arith.constant 0 : index
    %8 = vector.load %arg5[%c0_8, %c0_9] : memref<57x128xbf16, #tpu.memory_space<vmem>>, vector<57x128xbf16>
    %9 = arith.extf %8 : vector<57x128xbf16> to vector<57x128xf32>
    %c0_10 = arith.constant 0 : index
    %c0_11 = arith.constant 0 : index
    %10 = vector.load %arg4[%c0_10, %c0_11] : memref<1x128xf32, #tpu.memory_space<vmem>>, vector<1x128xf32>
    %11 = vector.broadcast %10 : vector<1x128xf32> to vector<57x128xf32>
    %12 = arith.addf %7, %11 : vector<57x128xf32>
    %cst_12 = arith.constant 0.000000e+00 : f32
    %13 = vector.broadcast %cst_12 : f32 to vector<57x128xf32>
    %14 = arith.maximumf %12, %13 : vector<57x128xf32>
    %15 = arith.mulf %9, %14 : vector<57x128xf32>
    %c0_13 = arith.constant 0 : index
    %c0_14 = arith.constant 0 : index
    %16 = vector.load %arg6[%c0_13, %c0_14] : memref<256x57xbf16, #tpu.memory_space<vmem>>, vector<256x57xbf16>
    %17 = arith.truncf %15 : vector<57x128xf32> to vector<57x128xbf16>
    %cst_15 = arith.constant dense<0.000000e+00> : vector<256x128xf32>
    %18 = tpu.matmul %16, %17, %cst_15 {dimension_numbers = #tpu.dot_dimension_numbers<[1], [0], [0], [1], [0, 0, 1, 1], [], []>} : vector<256x57xbf16>, vector<57x128xbf16>, vector<256x128xf32> -> vector<256x128xf32>
    %19 = arith.truncf %18 : vector<256x128xf32> to vector<256x128xbf16>
    %20 = tpu.concatenate %2, %19 in 1 : vector<256x128xbf16>, vector<256x128xbf16> -> vector<256x256xbf16>
    %21 = vector.shape_cast %20 : vector<256x256xbf16> to vector<16x16x256xbf16>
    %cst_16 = arith.constant 0.000000e+00 : bf16
    %22 = vector.broadcast %cst_16 : bf16 to vector<1x16x256xbf16>
    %cst_17 = arith.constant 0.000000e+00 : bf16
    %23 = vector.broadcast %cst_17 : bf16 to vector<18x1x256xbf16>
    %24 = tpu.concatenate %22, %21, %22 in 0 : vector<1x16x256xbf16>, vector<16x16x256xbf16>, vector<1x16x256xbf16> -> vector<18x16x256xbf16>
    %25 = tpu.concatenate %23, %24, %23 in 1 : vector<18x1x256xbf16>, vector<18x16x256xbf16>, vector<18x1x256xbf16> -> vector<18x18x256xbf16>
    %26 = vector.extract_strided_slice %25 {offsets = [0, 0, 0], sizes = [16, 16, 256], strides = [1, 1, 1]} : vector<18x18x256xbf16> to vector<16x16x256xbf16>
    %27 = vector.shape_cast %26 : vector<16x16x256xbf16> to vector<256x256xbf16>
    %28 = vector.extract_strided_slice %25 {offsets = [0, 1, 0], sizes = [16, 16, 256], strides = [1, 1, 1]} : vector<18x18x256xbf16> to vector<16x16x256xbf16>
    %29 = vector.shape_cast %28 : vector<16x16x256xbf16> to vector<256x256xbf16>
    %30 = vector.extract_strided_slice %25 {offsets = [0, 2, 0], sizes = [16, 16, 256], strides = [1, 1, 1]} : vector<18x18x256xbf16> to vector<16x16x256xbf16>
    %31 = vector.shape_cast %30 : vector<16x16x256xbf16> to vector<256x256xbf16>
    %32 = vector.extract_strided_slice %25 {offsets = [1, 0, 0], sizes = [16, 16, 256], strides = [1, 1, 1]} : vector<18x18x256xbf16> to vector<16x16x256xbf16>
    %33 = vector.shape_cast %32 : vector<16x16x256xbf16> to vector<256x256xbf16>
    %34 = vector.extract_strided_slice %25 {offsets = [1, 1, 0], sizes = [16, 16, 256], strides = [1, 1, 1]} : vector<18x18x256xbf16> to vector<16x16x256xbf16>
    %35 = vector.shape_cast %34 : vector<16x16x256xbf16> to vector<256x256xbf16>
    %36 = vector.extract_strided_slice %25 {offsets = [1, 2, 0], sizes = [16, 16, 256], strides = [1, 1, 1]} : vector<18x18x256xbf16> to vector<16x16x256xbf16>
    %37 = vector.shape_cast %36 : vector<16x16x256xbf16> to vector<256x256xbf16>
    %38 = vector.extract_strided_slice %25 {offsets = [2, 0, 0], sizes = [16, 16, 256], strides = [1, 1, 1]} : vector<18x18x256xbf16> to vector<16x16x256xbf16>
    %39 = vector.shape_cast %38 : vector<16x16x256xbf16> to vector<256x256xbf16>
    %40 = vector.extract_strided_slice %25 {offsets = [2, 1, 0], sizes = [16, 16, 256], strides = [1, 1, 1]} : vector<18x18x256xbf16> to vector<16x16x256xbf16>
    %41 = vector.shape_cast %40 : vector<16x16x256xbf16> to vector<256x256xbf16>
    %42 = vector.extract_strided_slice %25 {offsets = [2, 2, 0], sizes = [16, 16, 256], strides = [1, 1, 1]} : vector<18x18x256xbf16> to vector<16x16x256xbf16>
    %43 = vector.shape_cast %42 : vector<16x16x256xbf16> to vector<256x256xbf16>
    %44 = tpu.concatenate %27, %29, %31, %33, %35, %37, %39, %41, %43 in 1 : vector<256x256xbf16>, vector<256x256xbf16>, vector<256x256xbf16>, vector<256x256xbf16>, vector<256x256xbf16>, vector<256x256xbf16>, vector<256x256xbf16>, vector<256x256xbf16>, vector<256x256xbf16> -> vector<256x2304xbf16>
    %c0_18 = arith.constant 0 : index
    %c0_19 = arith.constant 0 : index
    %45 = vector.load %arg7[%c0_18, %c0_19] : memref<2304x128xbf16, #tpu.memory_space<vmem>>, vector<2304x128xbf16>
    %cst_20 = arith.constant dense<0.000000e+00> : vector<256x128xf32>
    %46 = tpu.matmul %44, %45, %cst_20 {dimension_numbers = #tpu.dot_dimension_numbers<[1], [0], [0], [1], [0, 0, 1, 1], [], []>} : vector<256x2304xbf16>, vector<2304x128xbf16>, vector<256x128xf32> -> vector<256x128xf32>
    %c0_21 = arith.constant 0 : index
    %c0_22 = arith.constant 0 : index
    %47 = vector.load %arg8[%c0_21, %c0_22] : memref<1x128xf32, #tpu.memory_space<vmem>>, vector<1x128xf32>
    %48 = vector.broadcast %47 : vector<1x128xf32> to vector<256x128xf32>
    %49 = arith.addf %46, %48 : vector<256x128xf32>
    %cst_23 = arith.constant 0.000000e+00 : f32
    %50 = vector.broadcast %cst_23 : f32 to vector<256x128xf32>
    %51 = arith.maximumf %49, %50 : vector<256x128xf32>
    %52 = vector.shape_cast %51 : vector<256x128xf32> to vector<1x16x16x128xf32>
    %c0_24 = arith.constant 0 : index
    %c0_25 = arith.constant 0 : index
    %c0_26 = arith.constant 0 : index
    %c0_27 = arith.constant 0 : index
    %53 = vector.load %arg9[%c0_24, %c0_25, %c0_26, %c0_27] : memref<1x16x16x128xf32, #tpu.memory_space<vmem>>, vector<1x16x16x128xf32>
    tpu.vector_store %arg9[%c0_24, %c0_25, %c0_26, %c0_27], %52 {strides = array<i32>} : memref<1x16x16x128xf32, #tpu.memory_space<vmem>>, vector<1x16x16x128xf32>,
    return
  }
  func.func @transform_0(%arg0: i32) -> (i32, i32, i32, i32) {
    %c0_i32 = arith.constant 0 : i32
    %c0_i32_0 = arith.constant 0 : i32
    %c0_i32_1 = arith.constant 0 : i32
    %c0_i32_2 = arith.constant 0 : i32
    return %arg0, %c0_i32, %c0_i32_0, %c0_i32_1 : i32, i32, i32, i32
  }
  func.func @transform_1(%arg0: i32) -> (i32, i32) {
    %c0_i32 = arith.constant 0 : i32
    %c0_i32_0 = arith.constant 0 : i32
    %c0_i32_1 = arith.constant 0 : i32
    return %c0_i32, %c0_i32_0 : i32, i32
  }
  func.func @transform_2(%arg0: i32) -> (i32, i32) {
    %c0_i32 = arith.constant 0 : i32
    %c0_i32_0 = arith.constant 0 : i32
    %c0_i32_1 = arith.constant 0 : i32
    return %c0_i32, %c0_i32_0 : i32, i32
  }
  func.func @transform_3(%arg0: i32) -> (i32, i32) {
    %c0_i32 = arith.constant 0 : i32
    %c0_i32_0 = arith.constant 0 : i32
    %c0_i32_1 = arith.constant 0 : i32
    return %c0_i32, %c0_i32_0 : i32, i32
  }
  func.func @transform_4(%arg0: i32) -> (i32, i32) {
    %c0_i32 = arith.constant 0 : i32
    %c0_i32_0 = arith.constant 0 : i32
    %c0_i32_1 = arith.constant 0 : i32
    return %c0_i32, %c0_i32_0 : i32, i32
  }
  func.func @transform_5(%arg0: i32) -> (i32, i32) {
    %c0_i32 = arith.constant 0 : i32
    %c0_i32_0 = arith.constant 0 : i32
    %c0_i32_1 = arith.constant 0 : i32
    return %c0_i32, %c0_i32_0 : i32, i32
  }
  func.func @transform_6(%arg0: i32) -> (i32, i32) {
    %c0_i32 = arith.constant 0 : i32
    %c0_i32_0 = arith.constant 0 : i32
    %c0_i32_1 = arith.constant 0 : i32
    return %c0_i32, %c0_i32_0 : i32, i32
  }
  func.func @transform_7(%arg0: i32) -> (i32, i32) {
    %c0_i32 = arith.constant 0 : i32
    %c0_i32_0 = arith.constant 0 : i32
    %c0_i32_1 = arith.constant 0 : i32
    return %c0_i32, %c0_i32_0 : i32, i32
  }
  func.func @transform_8(%arg0: i32) -> (i32, i32, i32, i32) {
    %c0_i32 = arith.constant 0 : i32
    %c0_i32_0 = arith.constant 0 : i32
    %c0_i32_1 = arith.constant 0 : i32
    %c0_i32_2 = arith.constant 0 : i32
    return %arg0, %c0_i32, %c0_i32_0, %c0_i32_1 : i32, i32, i32, i32
  }
}

</mosaic_0001>

<bundles_post_ra>
// kernel: psp_forward.1
= control target key start
LH: loop header
LB: loop body
LE: loop exit
PB: predicated region body
PF: predicated region fallthrough
CT: control target
= control target key end

     0   :  { %13 = vsyncpa [#allocation3], 0  ;;  %s8427_s0 = inlined_call_operand.vmem [shape: bf16[2,16,16,128], index: 0, kind: input, shape index: {}]   ;;  %s8428_s1 = inlined_call_operand.vmem [shape: bf16[57,256], index: 1, kind: input, shape index: {}]   ;;  %s8429_s2 = inlined_call_operand.vmem [shape: bf16[128,128], index: 2, kind: input, shape index: {}]   ;;  %s8430_s3 = inlined_call_operand.vmem [shape: f32[1,128], index: 3, kind: input, shape index: {}]   ;;  %s8431_s4 = inlined_call_operand.vmem [shape: bf16[57,128], index: 4, kind: input, shape index: {}]   ;;  %s8432_s5 = inlined_call_operand.vmem [shape: bf16[256,57], index: 5, kind: input, shape index: {}]   ;;  %s8433_s6 = inlined_call_operand.hbm [shape: bf16[2304,128], index: 6, kind: input, shape index: {}]   ;;  %s8434_s7 = inlined_call_operand.vmem [shape: f32[1,128], index: 7, kind: input, shape index: {}]   ;;  %s8435_s8 = inlined_call_operand.hbm [shape: f32[2,16,16,128], index: 8, kind: output, shape index: {}]  }
   0x1   :  { %14 = vsyncpa [#allocation4], 0 }
   0x2   :  { %16 = vsyncpa [#allocation4 + $0x1], 0  ;;  %s6654_s27 = smov 0   ;;  %s6656_s28 = smov 0  }
   0x3   :  { %s6658_s29 = smov 0   ;;  %s6660_s30 = smov 0  }
   0x4 LB: > { %s6675_s9 = sadd.s32 4294967295, %s6599_s30   ;;  %s4837_s10 = sadd.s32 4294967294, %s6599_s30   ;;  %s6599_s30 = sphi %s6660_s30, %s8864_s30   ;;  %s6595_s29 = sphi %s6658_s29, %s8863_s29   ;;  %s6591_s28 = sphi %s6656_s28, %s8862_s28   ;;  %s6587_s27 = sphi %s6654_s27, %s8861_s27  }
   0x5   : > { %s6679_s11 = sadd.s32 1, %s6599_s30   ;;  %s202_s12 = sadd.s32 1, %s6595_s29 }
   0x6   : > { %s199_s13 = ssub.s32 %s6599_s30, %s6679_s11  ;;  %p212_p0 = scmp.ne.s32.totalorder %s6595_s29, %s6591_s28 }
   0x7   : > { %p200_p1 = scmp.eq.s32.totalorder %s199_s13, 0  ;;  %p213_p2 = scmp.eq.s32.totalorder %s6675_s9, 1 }
   0x8   : > { %p218_p3 = scmp.ne.s32.totalorder %s6591_s28, %s6587_s27  ;;  %p219_p4 = scmp.eq.s32.totalorder %s4837_s10, 1 }
   0x9   : > { %s6690_s14 = scalar_select %p200_p1, %s6595_s29, %s202_s12  }
   0xa   : > { %p6692_p5 = por %p213_p2, %p212_p0  ;;  %p6696_p6 = por %p219_p4, %p218_p3 }
   0xb   : > { %p4838_p7 = scmp.ge.s32.totalorder %s6599_s30, 1  ;;  %p226_p8 = scmp.lt.s32.totalorder %s6599_s30, 3 }
   0xc   : > { %s8588_s15 = scalar_select %p6692_p5, 1, 0 }
   0xd   : > { %s8589_s16 = scalar_select %p6696_p6, 1, 0 }
   0xe   : > { %p8436_p9 = scmp.eq.s32.totalorder %s6675_s9, 0  ;;  %p6703_p10 = pnand %p4838_p7, %p226_p8 }
   0xf   : > { %s6601_s18 = smov [#allocation2]   ;;  %s6505_s23 = scalar_lea.hbm %s8433_s6, 18432 }
  0x10   : > { %s8590_s17 = scalar_select %p6703_p10, 1, 0 }
  0x11   : > { %s253_s19 = sshll.u32 %s6601_s18, 4  ;;  %p6243_p11 = pneg %p6703_p10  ;;  %s254_s19 = int_to_ptr.vmem [resolvable:$true] %s253_s19 }
  0x12   : > { %p6506_p13 = scmp.ne.s32.totalorder %s8433_s6, %s6505_s23  ;;  %p6512_p3 = scmp.lt.u32.totalorder %s6505_s23, %s8433_s6 }
  0x13   : > { %p6711_p12 = pnand %p8436_p9, %p6243_p11 }
  0x15   : > { %p6507_p0 = pneg %p6711_p12 }
  0x17   : > { %p6508_p1 = pnand %p6507_p0, %p6506_p13 }
  0x19   : > { %p6509_p2 = pneg %p6508_p1 }
  0x1b   : > { %p6514_p4 = pnand %p6512_p3, %p6509_p2 }
  0x1d   : > { %6517 = shalt.err (!%p6514_p4)
}
  0x1e   : > { %s6518_s12 = scalar_lea.vmem %s254_s19, 18432  ;;  %p6526_p9 = scmp.lt.s32.totalorder %s254_s19, %s254_s19 }
  0x1f   : > { %p6519_p7 = scmp.ne.s32.totalorder %s254_s19, %s6518_s12  ;;  %p6527_p6 = scmp.lt.s32.totalorder %s6518_s12, %s6518_s12 }
  0x21   : > { %p6521_p8 = pnand %p6519_p7, %p6507_p0  ;;  %p6528_p5 = por %p6527_p6, %p6526_p9 }
  0x23   : > { %p6522_p11 = pneg %p6521_p8 }
  0x25   : > { %p6529_p10 = pnand %p6528_p5, %p6522_p11 }
  0x27   : > { %6532 = shalt.err (!%p6529_p10)
}
  0x28   : > { %s6602_s13 = smov 64   ;;  %s6603_s18 = smov 4  }
  0x29   : > { %6246 = dma.hbm_to_vmem [thread:$0]  (!%p6711_p12), %s8433_s6, 18432, %s254_s19, [#allocation3], %s6602_s13, %s6602_s13, %s6603_s18  }
  0x2a   : > { %p8592_p13 = scmp.ne.s32.totalorder %s8590_s17, 0 }
  0x2c   : > { %280 = sbr.rel (%p8592_p13) target bundleno = 1614 (0x64e), region = 52 }
  0x33   : > { %p8593_p1 = scmp.eq.s32.totalorder %s6675_s9, 0 }
  0x35   : > { %6578 = dma.done.wait (%p8593_p1), [#allocation3], 18432   ;;  %p8594_p0 = pmov %p8593_p1 }
  0x36   : > { %p314_p5 = scmp.lt.s32.totalorder %s6675_s9, 1  ;;  %v6311_v13 = vld [vmem:[%s8428_s1 + $0x4] ss:$8 sps:$4 sm:$0xff]   ;;  %v6309_v18 = vld [vmem:[%s8428_s1] ss:$8 sps:$4 sm:$0xff]   ;;  %v6323_v21 = vld [vmem:[%s8429_s2 + $0x10] sm:$0xff]  }
  0x37   : > { %6580 = vsyncadd (%p8594_p0), [#allocation3], 4294948864  ;;  %528 = vmatprep.mubr.bf16.mxu0 %v6311_v13  ;;  %v6321_v17 = vld [vmem:[%s8429_s2] sm:$0xff]   ;;  %v6322_v19 = vld [vmem:[%s8429_s2 + $0x8] sm:$0xff]   ;;  %vm849_vm0 = vcmask 465920   ;;  %vm898_vm1 = vcmask 1043456  }
  0x38   : > { %s315_s23 = scalar_select %p314_p5, %s6675_s9, 1  ;;  %v6312_v20 = vld [vmem:[%s8428_s1 + $0x14] ss:$8 sps:$4 sm:$0xff]   ;;  %6157 = vmatprep.subr.bf16.mxu1 %v6321_v17  ;;  %v6314_v23 = vld [vmem:[%s8428_s1 + $0x10] ss:$8 sps:$4 sm:$0xff]   ;;  %v6325_v28 = vld [vmem:[%s8429_s2 + $0x20] sm:$0xff]  }
  0x39   : > { %6158 = vmatpush3.bf16.msra.mxu1 %v6321_v17  ;;  %v6324_v22 = vld [vmem:[%s8429_s2 + $0x18] sm:$0xff]   ;;  %v6315_v24 = vld [vmem:[%s8428_s1 + $0x24] ss:$8 sps:$4 sm:$0xff]   ;;  %v6317_v25 = vld [vmem:[%s8428_s1 + $0x20] ss:$8 sps:$4 sm:$0xff]   ;;  %vm899_vm2 = vcmask 1044480  }
  0x3a   : > { %s5061_s24 = sshll.u32 %s315_s23, 7  ;;  %6159 = vmatprep.subr.bf16.mxu1 %v6322_v19  ;;  %v6318_v26 = vld [vmem:[%s8428_s1 + $0x34] ss:$8 sps:$4 sm:$0x1f]   ;;  %v6326_v29 = vld [vmem:[%s8429_s2 + $0x28] sm:$0xff]   ;;  %v6329_v60 = vld [vmem:[%s8432_s5] sm:$0xff]  }
  0x3b   : > { %s6742_s26 = scalar_lea.vmem %s8427_s0, %s5061_s24  ;;  %v6320_v27 = vld [vmem:[%s8428_s1 + $0x30] ss:$8 sps:$4 sm:$0x1f]   ;;  %v6812_v61 = vld [vmem:[#allocation2 + $0x40] sm:$0xff]   ;;  %v6816_v63 = vld [vmem:[#allocation2 + $0x48] sm:$0xff]   ;;  %vm1379_vm3 = vcmask 1040384  }
  0x3c   : > { %v6293_v0 = vld [vmem:[%s6742_s26 + $0x40] sm:$0xff]   ;;  %v6295_v2 = vld [vmem:[%s6742_s26 + $0x48] sm:$0xff]   ;;  %v6297_v4 = vld [vmem:[%s6742_s26 + $0x50] sm:$0xff]   ;;  %vm1380_vm4 = vsmask.f32 256  ;;  %vm1914_vm7 = vcmask 1046528  }
  0x3d   : > { %v6294_v1 = vld [vmem:[%s6742_s26] sm:$0xff]   ;;  %5077 = vmatprep.subr.bf16.mxu0 %v6293_v0  ;;  %v6296_v3 = vld [vmem:[%s6742_s26 + $0x8] sm:$0xff]   ;;  %v6298_v5 = vld [vmem:[%s6742_s26 + $0x10] sm:$0xff]   ;;  %6160 = vmatpush3.bf16.msra.mxu1 %v6322_v19  ;;  %vm1448_vm6 = vsmask.f32 7424  ;;  %s5062_s23 = sshll.u32 %s6675_s9, 12 }
  0x3e   : > { %5078 = vmatpush3.bf16.msra.mxu0 %v6294_v1  ;;  %v6299_v6 = vld [vmem:[%s6742_s26 + $0x58] sm:$0xff]   ;;  %v6301_v8 = vld [vmem:[%s6742_s26 + $0x60] sm:$0xff]   ;;  %v6303_v10 = vld [vmem:[%s6742_s26 + $0x68] sm:$0xff]   ;;  %6161 = vmatprep.subr.bf16.mxu1 %v6323_v21  ;;  %s8378_s17 = scalar_lea.hbm %s8435_s8, %s5062_s23  ;;  %p8859_p9 = scmp.ne.s32.totalorder %s8588_s15, 0 }
  0x3f   : > { %5079 = vmatprep.subr.bf16.mxu0 %v6295_v2  ;;  %v6300_v7 = vld [vmem:[%s6742_s26 + $0x18] sm:$0xff]   ;;  %v6302_v9 = vld [vmem:[%s6742_s26 + $0x20] sm:$0xff]   ;;  %v6304_v11 = vld [vmem:[%s6742_s26 + $0x28] sm:$0xff]   ;;  %s6606_s10 = smov [#allocation5]  }
  0x40   : > { %v6305_v12 = vld [vmem:[%s6742_s26 + $0x70] sm:$0xff]   ;;  %v6307_v15 = vld [vmem:[%s6742_s26 + $0x78] sm:$0xff]   ;;  %v6814_v62 = vld [vmem:[#allocation2] sm:$0xff]   ;;  %s6537_s12 = sshll.u32 %s6606_s10, 4  ;;  %s6538_s12 = int_to_ptr.vmem [resolvable:$false] %s6537_s12 }
  0x41   : > { %v6306_v14 = vld [vmem:[%s6742_s26 + $0x30] sm:$0xff]   ;;  %v6308_v16 = vld [vmem:[%s6742_s26 + $0x38] sm:$0xff]   ;;  %6162 = vmatpush3.bf16.msra.mxu1 %v6323_v21  ;;  %v6820_v0 = vld [vmem:[#allocation2 + $0x8] sm:$0xff]   ;;  %s6539_s13 = scalar_lea.vmem %s6538_s12, 8192 }
  0x42   : > { %5080 = vmatpush3.bf16.msra.mxu0 %v6296_v3  ;;  %6163 = vmatprep.subr.bf16.mxu1 %v6324_v22  ;;  %v6327_v30 = vld [vmem:[%s8429_s2 + $0x30] sm:$0xff]   ;;  %v6328_v31 = vld [vmem:[%s8429_s2 + $0x38] sm:$0xff]   ;;  %v5075_v13 = vld [vmem:[%s8431_s4 + $0x8] sm:$0xff]  }
  0x43   : > { %5081 = vmatprep.subr.bf16.mxu0 %v6297_v4  ;;  %v6823_v1 = vld [vmem:[#allocation2 + $0x50] sm:$0xff]   ;;  %v6829_v3 = vld [vmem:[#allocation2 + $0x58] sm:$0xff]   ;;  %vm6948_vm5 = vmand %vm1379_vm3, %vm1380_vm4 }
  0x44   : > { %v6826_v2 = vld [vmem:[#allocation2 + $0x10] sm:$0xff]   ;;  %v6832_v4 = vld [vmem:[#allocation2 + $0x18] sm:$0xff]  }
  0x45   : > { %6164 = vmatpush3.bf16.msra.mxu1 %v6324_v22  ;;  %v5069_v22 = vunpack.c.l.bf16 %v5075_v13 }
  0x46   : > { %5082 = vmatpush3.bf16.msra.mxu0 %v6298_v5  ;;  %6165 = vmatprep.subr.bf16.mxu1 %v6325_v28  ;;  %v6835_v5 = vld [vmem:[#allocation2 + $0x60] sm:$0xff]  }
  0x47   : > { %5083 = vmatprep.subr.bf16.mxu0 %v6299_v6  ;;  %v6838_v6 = vld [vmem:[#allocation2 + $0x20] sm:$0xff]  }
  0x49   : > { %6166 = vmatpush3.bf16.msra.mxu1 %v6325_v28 }
  0x4a   : > { %5084 = vmatpush3.bf16.msra.mxu0 %v6300_v7  ;;  %6167 = vmatprep.subr.bf16.mxu1 %v6326_v29  ;;  %v6841_v7 = vld [vmem:[#allocation2 + $0x68] sm:$0xff]  }
  0x4b   : > { %5085 = vmatprep.subr.bf16.mxu0 %v6301_v8  ;;  %v6844_v8 = vld [vmem:[#allocation2 + $0x28] sm:$0xff]  }
  0x4d   : > { %6168 = vmatpush3.bf16.msra.mxu1 %v6326_v29 }
  0x4e   : > { %5086 = vmatpush3.bf16.msra.mxu0 %v6302_v9  ;;  %6169 = vmatprep.subr.bf16.mxu1 %v6327_v30  ;;  %v6847_v9 = vld [vmem:[#allocation2 + $0x70] sm:$0xff]  }
  0x4f   : > { %5087 = vmatprep.subr.bf16.mxu0 %v6303_v10  ;;  %v6850_v10 = vld [vmem:[#allocation2 + $0x30] sm:$0xff]  }
  0x51   : > { %6170 = vmatpush3.bf16.msra.mxu1 %v6327_v30 }
  0x52   : > { %5088 = vmatpush3.bf16.msra.mxu0 %v6304_v11  ;;  %6171 = vmatprep.subr.bf16.mxu1 %v6328_v31  ;;  %v4870_v11 = vld [vmem:[%s8430_s3] ss:$0 sm:$0xff] }
  0x53   : > { %5089 = vmatprep.subr.bf16.mxu0 %v6305_v12 }
  0x55   : > { %6172 = vmatpush3.bf16.msra.mxu1 %v6328_v31 }
  0x56   : > { %5090 = vmatpush3.bf16.msra.mxu0 %v6306_v14 }
  0x57   : > { %5091 = vmatprep.subr.bf16.mxu0 %v6307_v15 }
  0x5a   : > { %5092 = vmatpush3.bf16.msra.mxu0 %v6308_v16  ;;  %v5064_v16 = vld [vmem:[%s8431_s4] sm:$0xff]  }
  0x5b   : > { %5149 = vmatprep.subr.bf16.mxu0 %v6812_v61 }
  0x5d   : > { %529 = vmatmul.mubr.bf16.vlgmr.msra.gmra.mrb[0].mxu0 %v6309_v18 }
  0x5e   : > { %536 = vmatprep.mubr.bf16.mxu0 %v6312_v20  ;;  %5150 = vmatpush3.bf16.msra.mxu0 %v6814_v62 }
  0x5f   : > { %5151 = vmatprep.subr.bf16.mxu0 %v6816_v63 }
  0x62   : > { %5152 = vmatpush3.bf16.msra.mxu0 %v6820_v0 }
  0x63   : > { %5153 = vmatprep.subr.bf16.mxu0 %v6823_v1 }
  0x65   : > { %537 = vmatmul.mubr.bf16.gmra.mrb[4].mxu0 %v6314_v23  ;;  %v5070_v23 = vunpack.c.h.bf16 %v5075_v13 }
  0x66   : > { %544 = vmatprep.mubr.bf16.mxu0 %v6315_v24  ;;  %5154 = vmatpush3.bf16.msra.mxu0 %v6826_v2 }
  0x67   : > { %5155 = vmatprep.subr.bf16.mxu0 %v6829_v3 }
  0x6a   : > { %5156 = vmatpush3.bf16.msra.mxu0 %v6832_v4 }
  0x6b   : > { %5157 = vmatprep.subr.bf16.mxu0 %v6835_v5 }
  0x6d   : > { %545 = vmatmul.mubr.bf16.gmra.mrb[8].mxu0 %v6317_v25 }
  0x6e   : > { %552 = vmatprep.mubr.bf16.mxu0 %v6318_v26  ;;  %5158 = vmatpush3.bf16.msra.mxu0 %v6838_v6  ;;  %v5065_v26 = vunpack.c.l.bf16 %v5064_v16 }
  0x6f   : > { %5159 = vmatprep.subr.bf16.mxu0 %v6841_v7 }
  0x72   : > { %5160 = vmatpush3.bf16.msra.mxu0 %v6844_v8 }
  0x73   : > { %5161 = vmatprep.subr.bf16.mxu0 %v6847_v9 }
  0x75   : > { %553 = vmatmul.mubr.bf16.gmra.mrb[12].mxu0 %v6320_v27  ;;  %v5066_v27 = vunpack.c.h.bf16 %v5064_v16  ;;  %v6331_v16 = vld [vmem:[%s8432_s5 + $0x10] sm:$0xff]  }
  0x76   : > { %5162 = vmatpush3.bf16.msra.mxu0 %v6850_v10 }
 0x130   : > { %v5093_v32 = vpop.f32.mrb[0].mxu0 }
 0x131   : > { %v5094_v33 = vpop.f32.mrb[1].mxu0 }
 0x132   : > { %v5096_v34 = vpop.f32.mrb[2].mxu0  ;;  %v5095_v35 = vadd.f32 %v5094_v33, %v5093_v32 }
 0x133   : > { %v5097_v36 = vpop.f32.mrb[3].mxu0 }
 0x134   : > { %v5098_v37 = vadd.f32 %v5097_v36, %v5096_v34  ;;  %v587_v36 = vld [vmem:[%s8431_s4 + $0x18] sm:$0xf] }
 0x136   : > { %v561_v38 = vpack.c.bf16 %v5098_v37, %v5095_v35 }
 0x138   : > { %v5099_v39 = vpop.f32.mrb[4].mxu0  ;;  %6173 = vmatprep.mubr.bf16.mxu1 %v561_v38  ;;  %v588_v38 = vld [vmem:[%s8431_s4 + $0x1c] sm:$0x1] }
 0x139   : > { %v5100_v40 = vpop.f32.mrb[5].mxu0 }
 0x13a   : > { %v5101_v41 = vadd.f32 %v5100_v40, %v5099_v39  ;;  %v5102_v42 = vpop.f32.mrb[6].mxu0 }
 0x13b   : > { %v5103_v43 = vpop.f32.mrb[7].mxu0 }
 0x13c   : > { %v5104_v44 = vadd.f32 %v5103_v43, %v5102_v42 }
 0x13e   : > { %v562_v45 = vpack.c.bf16 %v5104_v44, %v5101_v41  ;;  %v5076_v41 = vld [vmem:[%s8431_s4 + $0x10] sm:$0xff]   ;;  %v595_v44 = vunpack.c.l.bf16 %v587_v36 }
 0x13f   : > { %v6384_v36 = vld [vmem:[#allocation2 + $0x130] sm:$0xff]  }
 0x140   : > { %v5105_v46 = vpop.f32.mrb[8].mxu0  ;;  %6174 = vmatmul.mubr.bf16.vlgmr.msra.gmra.mrb[0].mxu1 %v562_v45 }
 0x141   : > { %v5106_v47 = vpop.f32.mrb[9].mxu0 }
 0x142   : > { %v5107_v48 = vadd.f32 %v5106_v47, %v5105_v46  ;;  %v5108_v49 = vpop.f32.mrb[10].mxu0  ;;  %v596_v46 = vunpack.c.l.bf16 %v588_v38  ;;  %v6390_v38 = vld [vmem:[#allocation2 + $0x138] sm:$0xff]  }
 0x143   : > { %v5109_v50 = vpop.f32.mrb[11].mxu0 }
 0x144   : > { %v5110_v51 = vadd.f32 %v5109_v50, %v5108_v49 }
 0x146   : > { %v563_v52 = vpack.c.bf16 %v5110_v51, %v5107_v48  ;;  %v5073_v51 = vunpack.c.l.bf16 %v5076_v41 }
 0x148   : > { %v5111_v53 = vpop.f32.mrb[12].mxu0  ;;  %6177 = vmatprep.mubr.bf16.mxu1 %v563_v52  ;;  %v5074_v52 = vunpack.c.h.bf16 %v5076_v41 }
 0x149   : > { %v5112_v54 = vpop.f32.mrb[13].mxu0 }
 0x14a   : > { %v5113_v55 = vadd.f32 %v5112_v54, %v5111_v53  ;;  %v5114_v56 = vpop.f32.mrb[14].mxu0  ;;  %v6604_v54 = vmov 65535  }
 0x14b   : > { %v5115_v57 = vpop.f32.mrb[15].mxu0 }
 0x14c   : > { %v5116_v58 = vadd.f32 %v5115_v57, %v5114_v56 }
 0x14e   : > { %v564_v59 = vpack.c.bf16 %v5116_v58, %v5113_v55  ;;  %v900_v55 = vsel %vm898_vm1, 4294967295, %v6604_v54 }
 0x150   : > { %6178 = vmatmul.mubr.bf16.gmra.mrb[4].mxu1 %v564_v59 }
 0x151   : > { %6189 = vmatprep.mubr.msk.bf16.mxu1 %vm849_vm0, %v6329_v60 }
 0x213   : > { %v6175_v12 = vpop.f32.mrb[0].mxu1 }
 0x214   : > { %v695_v14 = vadd.f32 %v6175_v12, %v4870_v11  ;;  %v686_v15 = vpop.f32.mrb[1].mxu1  ;;  %v901_v12 = vsel %vm899_vm2, %v900_v55, 0 }
 0x215   : > { %v687_v17 = vadd.f32 %v4870_v11, %v686_v15  ;;  %v6176_v18 = vpop.f32.mrb[2].mxu1 }
 0x216   : > { %v719_v19 = vmax.f32 %v695_v14, 0.0  ;;  %v698_v20 = vadd.f32 %v6176_v18, %v4870_v11  ;;  %v689_v21 = vpop.f32.mrb[3].mxu1  ;;  %v6333_v18 = vld [vmem:[%s8432_s5 + $0x20] sm:$0xff]  }
 0x217   : > { %v717_v24 = vmax.f32 %v687_v17, 0.0  ;;  %v690_v25 = vadd.f32 %v4870_v11, %v689_v21  ;;  %v6332_v17 = vld [vmem:[%s8432_s5 + $0x18] sm:$0xff]  }
 0x218   : > { %v720_v28 = vmax.f32 %v698_v20, 0.0  ;;  %v727_v30 = vmul.f32 %v5069_v22, %v719_v19  ;;  %v6361_v22 = vld [vmem:[#allocation2 + $0x140] sm:$0xff]  }
 0x219   : > { %v718_v29 = vmax.f32 %v690_v25, 0.0  ;;  %v725_v32 = vmul.f32 %v5065_v26, %v717_v24  ;;  %v6363_v24 = vld [vmem:[#allocation2 + $0x148] sm:$0xff]   ;;  %v6365_v26 = vld [vmem:[#allocation2 + $0x150] sm:$0xff]  }
 0x21a   : > { %v728_v31 = vmul.f32 %v5070_v23, %v720_v28  ;;  %v6362_v23 = vld [vmem:[#allocation2 + $0x100] sm:$0xff]   ;;  %v6364_v25 = vld [vmem:[#allocation2 + $0x108] sm:$0xff]   ;;  %v6367_v28 = vld [vmem:[#allocation2 + $0x158] sm:$0xff]  }
 0x21b   : > { %v726_v33 = vmul.f32 %v5066_v27, %v718_v29  ;;  %v6366_v27 = vld [vmem:[#allocation2 + $0x110] sm:$0xff]   ;;  %v6368_v29 = vld [vmem:[#allocation2 + $0x118] sm:$0xff]  }
 0x21c   : > { %v766_v34 = vpack.c.bf16 %v728_v31, %v727_v30  ;;  %v6369_v30 = vld [vmem:[#allocation2 + $0x160] sm:$0xff]  }
 0x21d   : > { %v765_v35 = vpack.c.bf16 %v726_v33, %v725_v32  ;;  %v6370_v31 = vld [vmem:[#allocation2 + $0x120] sm:$0xff]   ;;  %v6375_v33 = vld [vmem:[#allocation2 + $0x168] sm:$0xff]  }
 0x21e   : > { %v6371_v32 = vld [vmem:[#allocation2 + $0xc0] sm:$0xff]  }
 0x21f   : > { %6181 = vmatprep.subr.bf16.mxu1 %v765_v35 }
 0x220   : > { %6182 = vmatpush3.bf16.msra.mxu1 %v765_v35  ;;  %v6382_v35 = vld [vmem:[#allocation2 + $0x170] sm:$0xff]  }
 0x221   : > { %6183 = vmatprep.subr.bf16.mxu1 %v766_v34 }
 0x223   : > { %v6179_v37 = vpop.f32.mrb[4].mxu1 }
 0x224   : > { %v711_v39 = vadd.f32 %v6179_v37, %v4870_v11  ;;  %v702_v40 = vpop.f32.mrb[5].mxu1  ;;  %6184 = vmatpush3.bf16.msra.mxu1 %v766_v34  ;;  %v6377_v34 = vld [vmem:[#allocation2 + $0x128] sm:$0xff]   ;;  %v6389_v37 = vld [vmem:[#allocation2 + $0x178] sm:$0xff]  }
 0x225   : > { %v703_v42 = vadd.f32 %v4870_v11, %v702_v40  ;;  %v6180_v43 = vpop.f32.mrb[6].mxu1  ;;  %v6489_v40 = vld [vmem:[%s6742_s26] sm:$0xff]  }
 0x226   : > { %v723_v45 = vmax.f32 %v711_v39, 0.0  ;;  %v714_v47 = vadd.f32 %v6180_v43, %v4870_v11  ;;  %v705_v48 = vpop.f32.mrb[7].mxu1  ;;  %v6395_v39 = vld [vmem:[#allocation2 + $0x240] sm:$0xff]   ;;  %v1090_v41 = vshrl.u32 %v6489_v40, 16 }
 0x227   : > { %v721_v49 = vmax.f32 %v703_v42, 0.0  ;;  %v706_v50 = vadd.f32 %v4870_v11, %v705_v48  ;;  %v6330_v11 = vld [vmem:[%s8432_s5 + $0x8] sm:$0xff]  }
 0x228   : > { %v724_v53 = vmax.f32 %v714_v47, 0.0  ;;  %v731_v57 = vmul.f32 %v723_v45, %v595_v44  ;;  %v6960_v45 = vrot.slane %v1090_v41, 7 }
 0x229   : > { %v722_v56 = vmax.f32 %v706_v50, 0.0  ;;  %v729_v59 = vmul.f32 %v5073_v51, %v721_v49 }
 0x22a   : > { %v732_v58 = vmul.f32 %v724_v53, %v596_v46  ;;  %v1093_v46 = vshll.u32 %v6489_v40, 16 }
 0x22b   : > { %v730_v60 = vmul.f32 %v5074_v52, %v722_v56  ;;  %v6490_v52 = vld [vmem:[%s6742_s26 + $0x8] sm:$0xff]  }
 0x22c   : > { %v768_v13 = vpack.c.bf16 %v732_v58, %v731_v57  ;;  %v1104_v53 = vshrl.u32 %v6490_v52, 16  ;;  %v1095_v55 = vor.u32 %v1093_v46, %v6960_v45 }
 0x22d   : > { %v767_v14 = vpack.c.bf16 %v730_v60, %v729_v59 }
 0x22e   : > { %v903_v15 = vand.u32 %v901_v12, %v768_v13 }
 0x22f   : > { %6185 = vmatprep.subr.bf16.mxu1 %v767_v14 }
 0x230   : > { %6186 = vmatpush3.bf16.msra.mxu1 %v767_v14 }
 0x231   : > { %6187 = vmatprep.subr.bf16.mxu1 %v903_v15 }
 0x234   : > { %6188 = vmatpush3.bf16.msra.mxu1 %v903_v15  ;;  %v6970_v15 = vrot.slane %v1104_v53, 7 }
 0x235   : > { %6221 = vmatprep.subr.bf16.mxu1 %v6812_v61  ;;  %v6334_v61 = vld [vmem:[%s8432_s5 + $0x28] sm:$0xff]  }
 0x237   : > { %6190 = vmatmul.mubr.msk.bf16.vlgmr.msra.gmra.mrb[8].mxu1 %vm849_vm0, %v6330_v11  ;;  %v1107_v11 = vshll.u32 %v6490_v52, 16 }
 0x238   : > { %6193 = vmatprep.mubr.msk.bf16.mxu1 %vm849_vm0, %v6331_v16  ;;  %6229 = vmatpush3.bf16.msra.mxu1 %v6814_v62  ;;  %v6335_v62 = vld [vmem:[%s8432_s5 + $0x30] sm:$0xff]  }
 0x239   : > { %6222 = vmatprep.subr.bf16.mxu1 %v6816_v63  ;;  %v6336_v63 = vld [vmem:[%s8432_s5 + $0x38] sm:$0xff]  }
 0x23c   : > { %6230 = vmatpush3.bf16.msra.mxu1 %v6820_v0  ;;  %v6337_v0 = vld [vmem:[%s8432_s5 + $0x40] sm:$0xff]  }
 0x23d   : > { %6223 = vmatprep.subr.bf16.mxu1 %v6823_v1  ;;  %v6338_v1 = vld [vmem:[%s8432_s5 + $0x48] sm:$0xff]  }
 0x23f   : > { %6194 = vmatmul.mubr.msk.bf16.gmra.mrb[12].mxu1 %vm849_vm0, %v6332_v17 }
 0x240   : > { %6197 = vmatprep.mubr.msk.bf16.mxu1 %vm849_vm0, %v6333_v18  ;;  %6231 = vmatpush3.bf16.msra.mxu1 %v6826_v2  ;;  %v6339_v2 = vld [vmem:[%s8432_s5 + $0x50] sm:$0xff]   ;;  %v6974_v18 = vsel %vm6948_vm5, 0, %v1095_v55 }
 0x241   : > { %6224 = vmatprep.subr.bf16.mxu1 %v6829_v3  ;;  %v6340_v3 = vld [vmem:[%s8432_s5 + $0x58] sm:$0xff]   ;;  %8598 = vst [vmem:[#allocation9_spill] sm:$0xff] %v6974_v18 }
 0x244   : > { %6232 = vmatpush3.bf16.msra.mxu1 %v6832_v4  ;;  %v6341_v4 = vld [vmem:[%s8432_s5 + $0x60] sm:$0xff]  }
 0x245   : > { %6225 = vmatprep.subr.bf16.mxu1 %v6835_v5  ;;  %v6342_v5 = vld [vmem:[%s8432_s5 + $0x68] sm:$0xff]  }
 0x247   : > { %6198 = vmatmul.mubr.msk.bf16.gmra.mrb[16].mxu1 %vm849_vm0, %v6334_v61 }
 0x248   : > { %6201 = vmatprep.mubr.msk.bf16.mxu1 %vm849_vm0, %v6335_v62  ;;  %6233 = vmatpush3.bf16.msra.mxu1 %v6838_v6  ;;  %v6343_v6 = vld [vmem:[%s8432_s5 + $0x70] sm:$0xff]  }
 0x249   : > { %6226 = vmatprep.subr.bf16.mxu1 %v6841_v7  ;;  %v6344_v7 = vld [vmem:[%s8432_s5 + $0x78] sm:$0xff]  }
 0x24c   : > { %6234 = vmatpush3.bf16.msra.mxu1 %v6844_v8  ;;  %v6359_v8 = vld [vmem:[#allocation2 + $0x78] sm:$0xff]  }
 0x24d   : > { %6227 = vmatprep.subr.bf16.mxu1 %v6847_v9  ;;  %v6360_v9 = vld [vmem:[#allocation2 + $0x38] sm:$0xff]   ;;  %5163 = vmatprep.subr.bf16.mxu0 %v6359_v8 }
 0x24e   : > { %5164 = vmatpush3.bf16.msra.mxu0 %v6360_v9 }
 0x24f   : > { %6202 = vmatmul.mubr.msk.bf16.gmra.mrb[20].mxu1 %vm849_vm0, %v6336_v63  ;;  %5373 = vmatprep.subr.bf16.mxu0 %v6361_v22 }
 0x250   : > { %6205 = vmatprep.mubr.msk.bf16.mxu1 %vm849_vm0, %v6337_v0  ;;  %6235 = vmatpush3.bf16.msra.mxu1 %v6850_v10  ;;  %v6605_v10 = vmov 0  }
 0x251   : > { %v6946_v19 = vrot.slane %v6605_v10, 7  ;;  %6228 = vmatprep.subr.bf16.mxu1 %v6359_v8 }
 0x253   : > { %v6955_v21 = vsel %vm6948_vm5, 0, %v6946_v19 }
 0x254   : > { %6236 = vmatpush3.bf16.msra.mxu1 %v6360_v9  ;;  %8597 = vst [vmem:[#allocation8_spill] sm:$0xff] %v6955_v21  ;;  %3268 = vmatprep.mubr.bf16.mxu0 %v6955_v21 }
 0x255   : > { %3269 = vmatmul.mubr.bf16.vlgmr.msra.gmra.mrb[16].mxu0 %v6955_v21  ;;  %5261 = vmatprep.subr.bf16.mxu1 %v6371_v32 }
 0x256   : > { %5374 = vmatpush3.bf16.msra.mxu0 %v6362_v23 }
 0x257   : > { %6206 = vmatmul.mubr.msk.bf16.gmra.mrb[24].mxu1 %vm849_vm0, %v6338_v1  ;;  %5375 = vmatprep.subr.bf16.mxu0 %v6363_v24  ;;  %v6491_v1 = vld [vmem:[%s6742_s26 + $0x10] sm:$0xff]  }
 0x258   : > { %6209 = vmatprep.mubr.msk.bf16.mxu1 %vm849_vm0, %v6339_v2  ;;  %v1118_v2 = vshrl.u32 %v6491_v1, 16  ;;  %v1121_v23 = vshll.u32 %v6491_v1, 16  ;;  %v6495_v1 = vld [vmem:[%s6742_s26 + $0x28] sm:$0xff]  }
 0x25a   : > { %5376 = vmatpush3.bf16.msra.mxu0 %v6364_v25  ;;  %v6992_v22 = vrot.slane %v1118_v2, 7  ;;  %v1160_v2 = vshrl.u32 %v6495_v1, 16 }
 0x25b   : > { %5377 = vmatprep.subr.bf16.mxu0 %v6365_v26 }
 0x25c   : > { %v1123_v32 = vor.u32 %v1121_v23, %v6992_v22 }
 0x25e   : > { %5378 = vmatpush3.bf16.msra.mxu0 %v6366_v27 }
 0x25f   : > { %6210 = vmatmul.mubr.msk.bf16.gmra.mrb[28].mxu1 %vm849_vm0, %v6340_v3  ;;  %5379 = vmatprep.subr.bf16.mxu0 %v6367_v28  ;;  %v1109_v3 = vor.u32 %v1107_v11, %v6970_v15 }
 0x260   : > { %6213 = vmatprep.mubr.msk.bf16.mxu1 %vm849_vm0, %v6341_v4 }
 0x261   : > { %v6996_v26 = vsel %vm6948_vm5, 0, %v1109_v3 }
 0x262   : > { %5380 = vmatpush3.bf16.msra.mxu0 %v6368_v29 }
 0x263   : > { %5381 = vmatprep.subr.bf16.mxu0 %v6369_v30  ;;  %v6492_v30 = vld [vmem:[%s6742_s26 + $0x18] sm:$0xff]  }
 0x264   : > { %v1135_v40 = vshll.u32 %v6492_v30, 16 }
 0x266   : > { %5382 = vmatpush3.bf16.msra.mxu0 %v6370_v31  ;;  %v1132_v31 = vshrl.u32 %v6492_v30, 16  ;;  %v1163_v30 = vshll.u32 %v6495_v1, 16 }
 0x267   : > { %6214 = vmatmul.mubr.msk.bf16.gmra.mrb[32].mxu1 %vm849_vm0, %v6342_v5  ;;  %5383 = vmatprep.subr.bf16.mxu0 %v6375_v33 }
 0x268   : > { %6217 = vmatprep.mubr.msk.bf16.mxu1 %vm849_vm0, %v6343_v6 }
 0x26a   : > { %5384 = vmatpush3.bf16.msra.mxu0 %v6377_v34 }
 0x26b   : > { %5385 = vmatprep.subr.bf16.mxu0 %v6382_v35 }
 0x26e   : > { %5386 = vmatpush3.bf16.msra.mxu0 %v6384_v36 }
 0x26f   : > { %6218 = vmatmul.mubr.msk.bf16.gmra.mrb[36].mxu1 %vm849_vm0, %v6344_v7  ;;  %5387 = vmatprep.subr.bf16.mxu0 %v6389_v37 }
 0x272   : > { %5388 = vmatpush3.bf16.msra.mxu0 %v6390_v38 }
 0x273   : > { %5597 = vmatprep.subr.bf16.mxu0 %v6395_v39  ;;  %v7009_v39 = vrot.slane %v1132_v31, 7 }
 0x30a   : > { %v6191_v42 = vpop.f32.mrb[8].mxu1 }
 0x30b   : > { %v939_v43 = vpop.f32.mrb[9].mxu1 }
 0x30c   : > { %v6192_v44 = vpop.f32.mrb[10].mxu1 }
 0x30d   : > { %v1067_v47 = vpack.c.bf16 %v6192_v44, %v6191_v42  ;;  %v942_v48 = vpop.f32.mrb[11].mxu1 }
 0x30e   : > { %v1066_v49 = vpack.c.bf16 %v942_v48, %v939_v43  ;;  %v7015_v43 = vsel %vm6948_vm5, 0, %v1123_v32  ;;  %v6493_v48 = vld [vmem:[%s6742_s26 + $0x20] sm:$0xff]  }
 0x30f   : > { %v1111_v50 = vshrl.u32 %v1067_v47, 16  ;;  %v1114_v56 = vshll.u32 %v1067_v47, 16 }
 0x310   : > { %v1097_v51 = vshrl.u32 %v1066_v49, 16  ;;  %v1100_v58 = vshll.u32 %v1066_v49, 16  ;;  %v1146_v49 = vshrl.u32 %v6493_v48, 16 }
 0x311   : > { %v6963_v54 = vrot.slane %v1111_v50, 7  ;;  %v1137_v50 = vor.u32 %v1135_v40, %v7009_v39 }
 0x312   : > { %v6966_v57 = vrot.slane %v1097_v51, 7  ;;  %v6195_v59 = vpop.f32.mrb[12].mxu1 }
 0x313   : > { %v955_v60 = vpop.f32.mrb[13].mxu1  ;;  %v1116_v12 = vor.u32 %v1114_v56, %v6963_v54 }
 0x314   : > { %v1102_v13 = vor.u32 %v1100_v58, %v6966_v57  ;;  %v6196_v14 = vpop.f32.mrb[14].mxu1 }
 0x315   : > { %v1069_v16 = vpack.c.bf16 %v6196_v14, %v6195_v59  ;;  %v958_v17 = vpop.f32.mrb[15].mxu1  ;;  %v6984_v0 = vsel %vm6948_vm5, 0, %v1116_v12  ;;  %v7030_v59 = vrot.slane %v1146_v49, 7  ;;  %v7036_v14 = vsel %vm6948_vm5, 0, %v1137_v50 }
 0x316   : > { %v1068_v61 = vpack.c.bf16 %v958_v17, %v955_v60  ;;  %v6978_v62 = vsel %vm6948_vm5, 0, %v1102_v13  ;;  %v1149_v60 = vshll.u32 %v6493_v48, 16 }
 0x317   : > { %8599 = vst [vmem:[#allocation10_spill] sm:$0xff] %v6978_v62  ;;  %3276 = vmatprep.mubr.bf16.mxu0 %v6978_v62  ;;  %v1139_v8 = vshrl.u32 %v1069_v16, 16  ;;  %v1142_v33 = vshll.u32 %v1069_v16, 16  ;;  %v6494_v16 = vld [vmem:[%s6742_s26 + $0x50] sm:$0xff]  }
 0x318   : > { %v1125_v63 = vshrl.u32 %v1068_v61, 16  ;;  %3277 = vmatmul.mubr.bf16.gmra.mrb[20].mxu0 %v6974_v18  ;;  %v1128_v5 = vshll.u32 %v1068_v61, 16  ;;  %v1230_v17 = vshrl.u32 %v6494_v16, 16  ;;  %v1151_v3 = vor.u32 %v1149_v60, %v7030_v59 }
 0x319   : > { %3284 = vmatprep.mubr.bf16.mxu0 %v6984_v0  ;;  %v6998_v28 = vrot.slane %v1139_v8, 7 }
 0x31a   : > { %v6989_v4 = vrot.slane %v1125_v63, 7  ;;  %v6199_v6 = vpop.f32.mrb[16].mxu1  ;;  %v7051_v8 = vrot.slane %v1230_v17, 7 }
 0x31b   : > { %v971_v7 = vpop.f32.mrb[17].mxu1  ;;  %v1144_v36 = vor.u32 %v1142_v33, %v6998_v28  ;;  %v7059_v33 = vsel %vm6948_vm5, 0, %v1151_v3 }
 0x31c   : > { %v1130_v9 = vor.u32 %v1128_v5, %v6989_v4  ;;  %v6200_v10 = vpop.f32.mrb[18].mxu1  ;;  %8600 = vst [vmem:[#allocation11_spill] sm:$0xff] %v7051_v8 }
 0x31d   : > { %v1071_v24 = vpack.c.bf16 %v6200_v10, %v6199_v6  ;;  %v974_v25 = vpop.f32.mrb[19].mxu1  ;;  %v7024_v47 = vsel %vm6948_vm5, 0, %v1144_v36 }
 0x31e   : > { %v1070_v27 = vpack.c.bf16 %v974_v25, %v971_v7  ;;  %v7003_v29 = vsel %vm6948_vm5, 0, %v1130_v9  ;;  %v1233_v9 = vshll.u32 %v6494_v16, 16 }
 0x31f   : > { %v1167_v55 = vshrl.u32 %v1071_v24, 16  ;;  %v1170_v5 = vshll.u32 %v1071_v24, 16 }
 0x320   : > { %3285 = vmatmul.mubr.bf16.gmra.mrb[24].mxu0 %v6996_v26  ;;  %v1153_v37 = vshrl.u32 %v1070_v27, 16  ;;  %v1156_v51 = vshll.u32 %v1070_v27, 16  ;;  %v7055_v27 = vrot.slane %v1160_v2, 7 }
 0x321   : > { %3292 = vmatprep.mubr.bf16.mxu0 %v7003_v29  ;;  %v7041_v61 = vrot.slane %v1167_v55, 7 }
 0x322   : > { %v6203_v34 = vpop.f32.mrb[20].mxu1  ;;  %v7019_v46 = vrot.slane %v1153_v37, 7  ;;  %v1165_v50 = vor.u32 %v1163_v30, %v7055_v27 }
 0x323   : > { %v987_v35 = vpop.f32.mrb[21].mxu1  ;;  %v1172_v10 = vor.u32 %v1170_v5, %v7041_v61 }
 0x324   : > { %v6204_v38 = vpop.f32.mrb[22].mxu1  ;;  %v1158_v56 = vor.u32 %v1156_v51, %v7019_v46  ;;  %v1235_v51 = vor.u32 %v1233_v9, %v7051_v8 }
 0x325   : > { %v7011_v41 = vpack.c.bf16 %v6204_v38, %v6203_v34  ;;  %v990_v42 = vpop.f32.mrb[23].mxu1  ;;  %v6496_v34 = vld [vmem:[%s6742_s26 + $0x58] sm:$0xff]   ;;  %v7067_v40 = vsel %vm6948_vm5, 0, %v1172_v10  ;;  %v7090_v10 = vsel %vm6948_vm5, 0, %v1165_v50 }
 0x326   : > { %v7017_v44 = vpack.c.bf16 %v990_v42, %v987_v35  ;;  %v7046_v63 = vsel %vm6948_vm5, 0, %v1158_v56  ;;  %v1244_v35 = vshrl.u32 %v6496_v34, 16  ;;  %v6497_v42 = vld [vmem:[%s6742_s26 + $0x30] sm:$0xff]   ;;  %v6499_v50 = vld [vmem:[%s6742_s26 + $0x38] sm:$0xff]  }
 0x327   : > { %v1174_v48 = vshrl.u32 %v6497_v42, 16  ;;  %v1195_v16 = vshrl.u32 %v7011_v41, 16  ;;  %v1177_v1 = vshll.u32 %v6497_v42, 16 }
 0x328   : > { %3293 = vmatmul.mubr.bf16.gmra.mrb[28].mxu0 %v7015_v43  ;;  %v1181_v23 = vshrl.u32 %v7017_v44, 16  ;;  %v7078_v60 = vrot.slane %v1244_v35, 7  ;;  %v6373_v35 = vld [vmem:[#allocation2 + $0xc8] sm:$0xff]  }
 0x329   : > { %3300 = vmatprep.mubr.bf16.mxu0 %v7024_v47 }
 0x32a   : > { %v6207_v52 = vpop.f32.mrb[24].mxu1  ;;  %v7062_v37 = vrot.slane %v1181_v23, 7  ;;  %8603 = vst [vmem:[#allocation14_spill] sm:$0xff] %v7078_v60  ;;  %v7094_v23 = vsel %vm6948_vm5, 0, %v1235_v51  ;;  %v1188_v51 = vshrl.u32 %v6499_v50, 16 }
 0x32b   : > { %v1003_v53 = vpop.f32.mrb[25].mxu1  ;;  %8604 = vst [vmem:[#allocation15_spill] sm:$0xff] %v7094_v23 }
 0x32c   : > { %v6208_v58 = vpop.f32.mrb[26].mxu1 }
 0x32d   : > { %v7032_v12 = vpack.c.bf16 %v6208_v58, %v6207_v52  ;;  %v1006_v13 = vpop.f32.mrb[27].mxu1  ;;  %v1184_v52 = vshll.u32 %v7017_v44, 16 }
 0x32e   : > { %v7038_v11 = vpack.c.bf16 %v1006_v13, %v1003_v53  ;;  %v1247_v13 = vshll.u32 %v6496_v34, 16  ;;  %v7101_v34 = vrot.slane %v1195_v16, 7  ;;  %v6374_v16 = vld [vmem:[#allocation2 + $0x88] sm:$0xff]  }
 0x32f   : > { %v1186_v2 = vor.u32 %v1184_v52, %v7062_v37  ;;  %v1198_v52 = vshll.u32 %v7011_v41, 16  ;;  %v6376_v41 = vld [vmem:[#allocation2 + $0xd0] sm:$0xff]  }
 0x330   : > { %3301 = vmatmul.mubr.bf16.gmra.mrb[32].mxu0 %v7036_v14 }
 0x331   : > { %3308 = vmatprep.mubr.bf16.mxu0 %v7046_v63  ;;  %v7108_v42 = vsel %vm6948_vm5, 0, %v1186_v2 }
 0x332   : > { %v6211_v6 = vpop.f32.mrb[28].mxu1 }
 0x333   : > { %v1019_v7 = vpop.f32.mrb[29].mxu1 }
 0x334   : > { %v6212_v25 = vpop.f32.mrb[30].mxu1 }
 0x335   : > { %v1077_v31 = vpack.c.bf16 %v6212_v25, %v6211_v6  ;;  %v1022_v32 = vpop.f32.mrb[31].mxu1  ;;  %v7084_v6 = vrot.slane %v1174_v48, 7 }
 0x336   : > { %v1076_v24 = vpack.c.bf16 %v1022_v32, %v1019_v7  ;;  %v6498_v32 = vld [vmem:[%s6742_s26 + $0x60] sm:$0xff]  }
 0x337   : > { %v1251_v36 = vshrl.u32 %v1077_v31, 16  ;;  %v1254_v53 = vshll.u32 %v1077_v31, 16  ;;  %v6372_v31 = vld [vmem:[#allocation2 + $0x80] sm:$0xff]  }
 0x338   : > { %v1237_v38 = vshrl.u32 %v1076_v24, 16  ;;  %3309 = vmatmul.mubr.bf16.gmra.mrb[36].mxu0 %v7059_v33  ;;  %v1240_v56 = vshll.u32 %v1076_v24, 16  ;;  %v1258_v24 = vshrl.u32 %v6498_v32, 16 }
 0x339   : > { %v7070_v49 = vrot.slane %v1251_v36, 7  ;;  %3316 = vmatprep.mubr.bf16.mxu0 %v7067_v40 }
 0x33a   : > { %v7076_v55 = vrot.slane %v1237_v38, 7  ;;  %v6215_v58 = vpop.f32.mrb[32].mxu1  ;;  %v7122_v2 = vrot.slane %v1258_v24, 7 }
 0x33b   : > { %8601 = vst [vmem:[#allocation12_spill] sm:$0xff] %v7070_v49  ;;  %v1035_v17 = vpop.f32.mrb[33].mxu1  ;;  %v1256_v3 = vor.u32 %v1254_v53, %v7070_v49  ;;  %v1179_v53 = vor.u32 %v1177_v1, %v7084_v6 }
 0x33c   : > { %8602 = vst [vmem:[#allocation13_spill] sm:$0xff] %v7076_v55  ;;  %v1242_v5 = vor.u32 %v1240_v56, %v7076_v55  ;;  %v6216_v44 = vpop.f32.mrb[34].mxu1  ;;  %v1249_v56 = vor.u32 %v1247_v13, %v7078_v60  ;;  %8608 = vst [vmem:[#allocation19_spill] sm:$0xff] %v7122_v2  ;;  %v7281_v55 = vsel %vm6948_vm5, %v6970_v15, 0 }
 0x33d   : > { %v7086_v7 = vpack.c.bf16 %v6216_v44, %v6215_v58  ;;  %v1038_v9 = vpop.f32.mrb[35].mxu1  ;;  %v7112_v48 = vsel %vm6948_vm5, 0, %v1256_v3  ;;  %v1261_v3 = vshll.u32 %v6498_v32, 16  ;;  %v7132_v24 = vsel %vm6948_vm5, 0, %v1179_v53  ;;  %v6379_v53 = vld [vmem:[#allocation2 + $0xd8] sm:$0xff]  }
 0x33e   : > { %v1078_v25 = vpack.c.bf16 %v1038_v9, %v1035_v17  ;;  %v7098_v30 = vsel %vm6948_vm5, 0, %v1242_v5  ;;  %8606 = vst [vmem:[#allocation17_spill] sm:$0xff] %v7112_v48  ;;  %v1200_v5 = vor.u32 %v1198_v52, %v7101_v34  ;;  %v1191_v9 = vshll.u32 %v6499_v50, 16  ;;  %v6378_v52 = vld [vmem:[#allocation2 + $0x90] sm:$0xff]  }
 0x33f   : > { %8605 = vst [vmem:[#allocation16_spill] sm:$0xff] %v7098_v30  ;;  %3356 = vmatprep.mubr.bf16.mxu1 %v7098_v30  ;;  %v1279_v1 = vshrl.u32 %v7086_v7, 16  ;;  %v7136_v32 = vsel %vm6948_vm5, 0, %v1249_v56 }
 0x340   : > { %v1265_v36 = vshrl.u32 %v1078_v25, 16  ;;  %v1268_v38 = vshll.u32 %v1078_v25, 16  ;;  %3317 = vmatmul.mubr.bf16.gmra.mrb[40].mxu0 %v7090_v10  ;;  %3357 = vmatmul.mubr.bf16.vlgmr.msra.gmra.mrb[40].mxu1 %v7094_v23  ;;  %v1209_v25 = vshrl.u32 %v7038_v11, 16  ;;  %8609 = vst [vmem:[#allocation20_spill] sm:$0xff] %v7136_v32  ;;  %v6396_v23 = vld [vmem:[#allocation2 + $0x200] sm:$0xff]  }
 0x341   : > { %3324 = vmatprep.mubr.bf16.mxu0 %v7108_v42  ;;  %3364 = vmatprep.mubr.bf16.mxu1 %v7112_v48  ;;  %v7149_v56 = vrot.slane %v1279_v1, 7 }
 0x342   : > { %v7120_v58 = vrot.slane %v1265_v36, 7  ;;  %5262 = vmatpush3.bf16.msra.mxu1 %v6372_v31  ;;  %v6219_v17 = vpop.f32.mrb[36].mxu1  ;;  %v7128_v31 = vrot.slane %v1188_v51, 7  ;;  %v7145_v51 = vsel %vm6948_vm5, 0, %v1200_v5  ;;  %v7147_v49 = vrot.slane %v1209_v25, 7  ;;  %v6380_v25 = vld [vmem:[#allocation2 + $0x98] sm:$0xff]  }
 0x343   : > { %5263 = vmatprep.subr.bf16.mxu1 %v6373_v35  ;;  %v1051_v44 = vpop.f32.mrb[37].mxu1  ;;  %8611 = vst [vmem:[#allocation22_spill] sm:$0xff] %v7145_v51  ;;  %8612 = vst [vmem:[#allocation23_spill] sm:$0xff] %v7149_v56 }
 0x344   : > { %8607 = vst [vmem:[#allocation18_spill] sm:$0xff] %v7120_v58  ;;  %v1270_v13 = vor.u32 %v1268_v38, %v7120_v58  ;;  %v6220_v36 = vpop.f32.mrb[38].mxu1  ;;  %v6500_v38 = vld [vmem:[%s6742_s26 + $0x40] sm:$0xff]   ;;  %v1193_v5 = vor.u32 %v1191_v9, %v7128_v31 }
 0x345   : > { %v7138_v35 = vpack.c.bf16 %v6220_v36, %v6219_v17  ;;  %v1054_v50 = vpop.f32.mrb[39].mxu1  ;;  %v1202_v58 = vshrl.u32 %v6500_v38, 16  ;;  %v1282_v17 = vshll.u32 %v7086_v7, 16  ;;  %v1212_v7 = vshll.u32 %v7038_v11, 16 }
 0x346   : > { %5264 = vmatpush3.bf16.msra.mxu1 %v6374_v16  ;;  %v7140_v60 = vpack.c.bf16 %v1054_v50, %v1051_v44  ;;  %v7156_v16 = vsel %vm6948_vm5, 0, %v1270_v13  ;;  %v6501_v44 = vld [vmem:[%s6742_s26 + $0x68] sm:$0xff]   ;;  %v1205_v1 = vshll.u32 %v6500_v38, 16  ;;  %v1223_v50 = vshrl.u32 %v7032_v12, 16  ;;  %v6381_v13 = vld [vmem:[#allocation2 + $0xe0] sm:$0xff]  }
 0x347   : > { %8610 = vst [vmem:[#allocation21_spill] sm:$0xff] %v7138_v35  ;;  %5265 = vmatprep.subr.bf16.mxu1 %v6376_v41  ;;  %8613 = vst [vmem:[#allocation24_spill] sm:$0xff] %v7156_v16  ;;  %v1272_v36 = vshrl.u32 %v6501_v44, 16  ;;  %v1263_v41 = vor.u32 %v1261_v3, %v7122_v2  ;;  %v7165_v35 = vrot.slane %v1202_v58, 7  ;;  %v1275_v3 = vshll.u32 %v6501_v44, 16  ;;  %v6383_v58 = vld [vmem:[#allocation2 + $0xa0] sm:$0xff]  }
 0x348   : > { %3325 = vmatmul.mubr.bf16.gmra.mrb[44].mxu0 %v7132_v24  ;;  %3365 = vmatmul.mubr.bf16.gmra.mrb[44].mxu1 %v7136_v32  ;;  %v1214_v32 = vor.u32 %v1212_v7, %v7147_v49  ;;  %v1293_v9 = vshrl.u32 %v7140_v60, 16  ;;  %v7174_v11 = vsel %vm6948_vm5, 0, %v1193_v5  ;;  %v6502_v38 = vld [vmem:[%s6742_s26 + $0x48] sm:$0xff]   ;;  %v7181_v7 = vrot.slane %v1223_v50, 7  ;;  %v6387_v2 = vld [vmem:[#allocation2 + $0xf0] sm:$0xff]  }
 0x349   : > { %3332 = vmatprep.mubr.bf16.mxu0 %v7145_v51  ;;  %3372 = vmatprep.mubr.bf16.mxu1 %v7156_v16  ;;  %v1284_v16 = vor.u32 %v1282_v17, %v7149_v56  ;;  %v7170_v48 = vrot.slane %v1272_v36, 7  ;;  %8615 = vst [vmem:[#allocation26_spill] sm:$0xff] %v7174_v11  ;;  %v6385_v17 = vld [vmem:[#allocation2 + $0xe8] sm:$0xff]   ;;  %v1296_v44 = vshll.u32 %v7140_v60, 16  ;;  %v1207_v60 = vor.u32 %v1205_v1, %v7165_v35 }
 0x34a   : > { %5266 = vmatpush3.bf16.msra.mxu1 %v6378_v52  ;;  %v7178_v52 = vsel %vm6948_vm5, 0, %v1263_v41  ;;  %v7183_v36 = vrot.slane %v1293_v9, 7  ;;  %v7190_v5 = vsel %vm6948_vm5, 0, %v1214_v32  ;;  %v1226_v9 = vshll.u32 %v7032_v12, 16  ;;  %v6386_v56 = vld [vmem:[#allocation2 + $0xa8] sm:$0xff]  }
 0x34b   : > { %5267 = vmatprep.subr.bf16.mxu1 %v6379_v53  ;;  %8614 = vst [vmem:[#allocation25_spill] sm:$0xff] %v7170_v48  ;;  %8616 = vst [vmem:[#allocation27_spill] sm:$0xff] %v7178_v52  ;;  %v1216_v53 = vshrl.u32 %v6502_v38, 16  ;;  %v7194_v41 = vsel %vm6948_vm5, 0, %v1284_v16  ;;  %v1452_v32 = vshll.u32 %v6955_v21, 16  ;;  %v1415_v16 = vsel %vm6948_vm5, %v6946_v19, 0 }
 0x34c   : > { %8617 = vst [vmem:[#allocation28_spill] sm:$0xff] %v7183_v36  ;;  %8618 = vst [vmem:[#allocation29_spill] sm:$0xff] %v7190_v5  ;;  %v1219_v8 = vshll.u32 %v6502_v38, 16  ;;  %v1298_v1 = vor.u32 %v1296_v44, %v7183_v36  ;;  %v6388_v19 = vld [vmem:[#allocation2 + $0xb0] sm:$0xff]   ;;  %v6393_v36 = vld [vmem:[#allocation2 + $0x1c0] sm:$0xff]  }
 0x34d   : > { %8619 = vst [vmem:[#allocation30_spill] sm:$0xff] %v7194_v41  ;;  %v1454_v38 = vrot.slane %v1452_v32, 1  ;;  %v1915_v32 = vrot.slane %v6955_v21, 1 }
 0x34e   : > { %5268 = vmatpush3.bf16.msra.mxu1 %v6380_v25  ;;  %v6503_v25 = vld [vmem:[%s6742_s26 + $0x70] sm:$0xff]  }
 0x34f   : > { %5269 = vmatprep.subr.bf16.mxu1 %v6381_v13  ;;  %v1286_v50 = vshrl.u32 %v6503_v25, 16  ;;  %v1277_v13 = vor.u32 %v1275_v3, %v7170_v48  ;;  %v1289_v12 = vshll.u32 %v6503_v25, 16  ;;  %v1457_v48 = vshll.u32 %v1415_v16, 16 }
 0x350   : > { %3333 = vmatmul.mubr.bf16.gmra.mrb[48].mxu0 %v7174_v11  ;;  %3373 = vmatmul.mubr.bf16.gmra.mrb[48].mxu1 %v7178_v52  ;;  %v7206_v52 = vrot.slane %v1216_v53, 7  ;;  %v1450_v53 = vshrl.u32 %v6955_v21, 16  ;;  %v7229_v25 = vsel %vm6948_vm5, 0, %v1298_v1  ;;  %v1476_v1 = vshll.u32 %v6978_v62, 16 }
 0x351   : > { %3340 = vmatprep.mubr.bf16.mxu0 %v7190_v5  ;;  %3380 = vmatprep.mubr.bf16.mxu1 %v7194_v41  ;;  %v1228_v41 = vor.u32 %v1226_v9, %v7181_v7  ;;  %v7210_v3 = vrot.slane %v1286_v50, 7  ;;  %v6391_v9 = vld [vmem:[#allocation2 + $0xf8] sm:$0xff]   ;;  %8625 = vst [vmem:[#allocation36_spill] sm:$0xff] %v7229_v25 }
 0x352   : > { %5270 = vmatpush3.bf16.msra.mxu1 %v6383_v58  ;;  %8620 = vst [vmem:[#allocation31_spill] sm:$0xff] %v7206_v52  ;;  %v7214_v58 = vsel %vm6948_vm5, 0, %v1207_v60  ;;  %v6392_v50 = vld [vmem:[#allocation2 + $0xb8] sm:$0xff]   ;;  %v1455_v60 = vor.u32 %v1454_v38, %v1450_v53  ;;  %v1464_v53 = vshll.u32 %v6974_v18, 16  ;;  %v1474_v38 = vshrl.u32 %v6978_v62, 16 }
 0x353   : > { %5271 = vmatprep.subr.bf16.mxu1 %v6385_v17  ;;  %8621 = vst [vmem:[#allocation32_spill] sm:$0xff] %v7210_v3  ;;  %8622 = vst [vmem:[#allocation33_spill] sm:$0xff] %v7214_v58  ;;  %v7218_v17 = vsel %vm6948_vm5, 0, %v1277_v13  ;;  %v7225_v44 = vsel %vm6948_vm5, 0, %v1228_v41  ;;  %v1459_v13 = vrot.slane %v1457_v48, 1  ;;  %v1916_v41 = vrot.slane %v1415_v16, 1 }
 0x354   : > { %8623 = vst [vmem:[#allocation34_spill] sm:$0xff] %v7218_v17  ;;  %8624 = vst [vmem:[#allocation35_spill] sm:$0xff] %v7225_v44 }
 0x355   : > { %v7246_v48 = vsel %vm1448_vm6, %v1455_v60, %v1459_v13  ;;  %v7249_v16 = vsel %vm1914_vm7, %v1915_v32, %v1916_v41  ;;  %v1500_v60 = vshll.u32 %v6984_v0, 16  ;;  %v1462_v32 = vshrl.u32 %v6974_v18, 16 }
 0x356   : > { %5272 = vmatpush3.bf16.msra.mxu1 %v6386_v56  ;;  %v1221_v56 = vor.u32 %v1219_v8, %v7206_v52  ;;  %8628 = vst [vmem:[#allocation39_spill] sm:$0xff] %v7246_v48  ;;  %8629 = vst [vmem:[#allocation40_spill] sm:$0xff] %v7249_v16  ;;  %v1466_v41 = vrot.slane %v1464_v53, 1  ;;  %v1493_v52 = vshll.u32 %v7281_v55, 16 }
 0x357   : > { %5273 = vmatprep.subr.bf16.mxu1 %v6387_v2  ;;  %v1291_v2 = vor.u32 %v1289_v12, %v7210_v3  ;;  %v1417_v12 = vsel %vm6948_vm5, %v6966_v57, 0 }
 0x358   : > { %3341 = vmatmul.mubr.bf16.gmra.mrb[52].mxu0 %v7214_v58  ;;  %3381 = vmatmul.mubr.bf16.gmra.mrb[52].mxu1 %v7218_v17  ;;  %v7239_v17 = vsel %vm6948_vm5, 0, %v1221_v56  ;;  %v5165_v56 = vpop.f32.mrb[16].mxu0 }
 0x359   : > { %3348 = vmatprep.mubr.bf16.mxu0 %v7225_v44  ;;  %3388 = vmatprep.mubr.bf16.mxu1 %v7229_v25  ;;  %8626 = vst [vmem:[#allocation37_spill] sm:$0xff] %v7239_v17  ;;  %v7243_v8 = vsel %vm6948_vm5, 0, %v1291_v2  ;;  %v5166_v57 = vpop.f32.mrb[17].mxu0  ;;  %v6394_v25 = vld [vmem:[#allocation2 + $0x180] sm:$0xff]  }
 0x35a   : > { %5274 = vmatpush3.bf16.msra.mxu1 %v6388_v19  ;;  %8627 = vst [vmem:[#allocation38_spill] sm:$0xff] %v7243_v8  ;;  %v1478_v19 = vrot.slane %v1476_v1, 1  ;;  %v5168_v13 = vpop.f32.mrb[18].mxu0 }
 0x35b   : > { %5275 = vmatprep.subr.bf16.mxu1 %v6391_v9  ;;  %v1481_v9 = vshll.u32 %v1417_v12, 16  ;;  %v5169_v21 = vpop.f32.mrb[19].mxu0 }
 0x35c   : > { %v1479_v2 = vor.u32 %v1478_v19, %v1474_v38  ;;  %v1488_v19 = vshll.u32 %v6996_v26, 16  ;;  %v6397_v38 = vld [vmem:[#allocation2 + $0x1c8] sm:$0xff]  }
 0x35d   : > { %v1483_v3 = vrot.slane %v1481_v9, 1 }
 0x35e   : > { %5276 = vmatpush3.bf16.msra.mxu1 %v6392_v50  ;;  %v1921_v50 = vrot.slane %v6978_v62, 1  ;;  %v6399_v62 = vld [vmem:[#allocation2 + $0x248] sm:$0xff]   ;;  %v1490_v15 = vrot.slane %v1488_v19, 1 }
 0x35f   : > { %5485 = vmatprep.subr.bf16.mxu1 %v6393_v36  ;;  %v1416_v36 = vsel %vm6948_vm5, %v6960_v45, 0  ;;  %v1419_v45 = vsel %vm6948_vm5, %v6963_v54, 0  ;;  %v7273_v53 = vsel %vm1448_vm6, %v1479_v2, %v1483_v3  ;;  %v1467_v54 = vor.u32 %v1466_v41, %v1462_v32  ;;  %v6398_v2 = vld [vmem:[#allocation2 + $0x188] sm:$0xff]   ;;  %v6403_v32 = vld [vmem:[#allocation2 + $0x250] sm:$0xff]  }
 0x360   : > { %3349 = vmatmul.mubr.bf16.gmra.mrb[56].mxu0 %v7239_v17  ;;  %3389 = vmatmul.mubr.bf16.gmra.mrb[56].mxu1 %v7243_v8  ;;  %v1469_v1 = vshll.u32 %v1416_v36, 16  ;;  %v1922_v8 = vrot.slane %v1417_v12, 1  ;;  %8630 = vst [vmem:[#allocation41_spill] sm:$0xff] %v7273_v53  ;;  %v1502_v12 = vrot.slane %v1500_v60, 1  ;;  %v1919_v30 = vrot.slane %v1416_v36, 1 }
 0x361   : > { %3429 = vmatprep.mubr.bf16.mxu1 %v7246_v48  ;;  %3590 = vmatprep.mubr.bf16.mxu0 %v7249_v16  ;;  %v1498_v3 = vshrl.u32 %v6984_v0, 16  ;;  %v1486_v60 = vshrl.u32 %v6996_v26, 16  ;;  %v7289_v41 = vadd.f32 %v5166_v57, %v5165_v56  ;;  %v7293_v36 = vadd.f32 %v5169_v21, %v5168_v13  ;;  %v6404_v56 = vld [vmem:[#allocation2 + $0x210] sm:$0xff]   ;;  %v6405_v21 = vld [vmem:[#allocation2 + $0x1d8] sm:$0xff]  }
 0x362   : > { %v7276_v9 = vsel %vm1914_vm7, %v1921_v50, %v1922_v8  ;;  %v1505_v8 = vshll.u32 %v1419_v45, 16  ;;  %v6400_v50 = vld [vmem:[#allocation2 + $0x208] sm:$0xff]   ;;  %v1495_v57 = vrot.slane %v1493_v52, 1  ;;  %v6407_v13 = vld [vmem:[#allocation2 + $0x258] sm:$0xff]  }
 0x363   : > { %8631 = vst [vmem:[#allocation42_spill] sm:$0xff] %v7276_v9  ;;  %8632 = vst [vmem:[#allocation43_spill] sm:$0xff] %v7289_v41 }
 0x364   : > { %8633 = vst [vmem:[#allocation44_spill] sm:$0xff] %v7293_v36  ;;  %v8677_v36 = vld [vmem:[#allocation12_spill] sm:$0xff] }
 0x368   : > { %3430 = vmatmul.mubr.bf16.vlgmr.msra.gmra.mrb[60].mxu1 %v7246_v48  ;;  %3591 = vmatmul.mubr.bf16.vlgmr.msra.gmra.mrb[60].mxu0 %v7249_v16  ;;  %v1471_v48 = vrot.slane %v1469_v1, 1  ;;  %v1918_v16 = vrot.slane %v6974_v18, 1  ;;  %v1503_v1 = vor.u32 %v1502_v12, %v1498_v3  ;;  %v1421_v12 = vsel %vm6948_vm5, %v6989_v4, 0 }
 0x369   : > { %3437 = vmatprep.mubr.bf16.mxu1 %v7273_v53  ;;  %3598 = vmatprep.mubr.bf16.mxu0 %v7276_v9  ;;  %v6401_v9 = vld [vmem:[#allocation2 + $0x1d0] sm:$0xff]   ;;  %v1507_v53 = vrot.slane %v1505_v8, 1  ;;  %v1924_v4 = vrot.slane %v6996_v26, 1  ;;  %v1529_v3 = vshll.u32 %v1421_v12, 16  ;;  %v6406_v8 = vld [vmem:[#allocation2 + $0x198] sm:$0xff]  }
 0x36a   : > { %5486 = vmatpush3.bf16.msra.mxu1 %v6394_v25  ;;  %5598 = vmatpush3.bf16.msra.mxu0 %v6396_v23  ;;  %v1927_v25 = vrot.slane %v6984_v0, 1  ;;  %v1524_v23 = vshll.u32 %v7003_v29, 16  ;;  %v7296_v18 = vsel %vm1448_vm6, %v1467_v54, %v1471_v48  ;;  %v7299_v19 = vsel %vm1914_vm7, %v1918_v16, %v1919_v30 }
 0x36b   : > { %5487 = vmatprep.subr.bf16.mxu1 %v6397_v38  ;;  %5599 = vmatprep.subr.bf16.mxu0 %v6399_v62  ;;  %8634 = vst [vmem:[#allocation45_spill] sm:$0xff] %v7299_v19  ;;  %v1928_v38 = vrot.slane %v1419_v45, 1  ;;  %v6402_v62 = vld [vmem:[#allocation2 + $0x190] sm:$0xff]   ;;  %v7307_v30 = vsel %vm1448_vm6, %v1503_v1, %v1507_v53  ;;  %v1491_v16 = vor.u32 %v1490_v15, %v1486_v60  ;;  %v1925_v45 = vrot.slane %v7281_v55, 1  ;;  %v6411_v60 = vld [vmem:[#allocation2 + $0x260] sm:$0xff]  }
 0x36c   : > { %8635 = vst [vmem:[#allocation46_spill] sm:$0xff] %v7307_v30  ;;  %v1526_v52 = vrot.slane %v1524_v23, 1  ;;  %v1522_v54 = vshrl.u32 %v7003_v29, 16  ;;  %v1420_v53 = vsel %vm6948_vm5, %v6992_v22, 0  ;;  %v1548_v1 = vshll.u32 %v7024_v47, 16 }
 0x36d   : > { %v7310_v48 = vsel %vm1914_vm7, %v1927_v25, %v1928_v38  ;;  %v7322_v15 = vsel %vm1448_vm6, %v1491_v16, %v1495_v57  ;;  %v7327_v25 = vsel %vm1914_vm7, %v1924_v4, %v1925_v45  ;;  %v1510_v22 = vshrl.u32 %v7015_v43, 16  ;;  %v6415_v4 = vld [vmem:[#allocation2 + $0x268] sm:$0xff]  }
 0x36e   : > { %5488 = vmatpush3.bf16.msra.mxu1 %v6398_v2  ;;  %5600 = vmatpush3.bf16.msra.mxu0 %v6400_v50  ;;  %8636 = vst [vmem:[#allocation47_spill] sm:$0xff] %v7310_v48  ;;  %v6408_v2 = vld [vmem:[#allocation2 + $0x218] sm:$0xff]   ;;  %v6409_v50 = vld [vmem:[#allocation2 + $0x1e0] sm:$0xff]   ;;  %8637 = vst [vmem:[#allocation48_spill] sm:$0xff] %v7322_v15  ;;  %v1527_v55 = vor.u32 %v1526_v52, %v1522_v54  ;;  %v1517_v38 = vshll.u32 %v1420_v53, 16  ;;  %v1423_v57 = vsel %vm6948_vm5, %v6998_v28, 0 }
 0x36f   : > { %5489 = vmatprep.subr.bf16.mxu1 %v6401_v9  ;;  %5601 = vmatprep.subr.bf16.mxu0 %v6403_v32  ;;  %v1512_v9 = vshll.u32 %v7015_v43, 16  ;;  %v1933_v32 = vrot.slane %v7003_v29, 1  ;;  %8638 = vst [vmem:[#allocation49_spill] sm:$0xff] %v7327_v25  ;;  %v7336_v16 = vsel %vm6948_vm5, %v7009_v39, 0  ;;  %v6413_v52 = vld [vmem:[#allocation2 + $0x1e8] sm:$0xff]   ;;  %v1550_v28 = vrot.slane %v1548_v1, 1 }
 0x370   : > { %3438 = vmatmul.mubr.bf16.gmra.mrb[64].mxu1 %v7296_v18  ;;  %3599 = vmatmul.mubr.bf16.gmra.mrb[64].mxu0 %v7299_v19  ;;  %v1519_v54 = vrot.slane %v1517_v38, 1  ;;  %v1541_v1 = vshll.u32 %v7336_v16, 16 }
 0x371   : > { %3445 = vmatprep.mubr.bf16.mxu1 %v7307_v30  ;;  %3606 = vmatprep.mubr.bf16.mxu0 %v7310_v48  ;;  %v1514_v23 = vrot.slane %v1512_v9, 1  ;;  %v1536_v9 = vshll.u32 %v7036_v14, 16 }
 0x372   : > { %5490 = vmatpush3.bf16.msra.mxu1 %v6402_v62  ;;  %5602 = vmatpush3.bf16.msra.mxu0 %v6404_v56  ;;  %v1531_v62 = vrot.slane %v1529_v3, 1  ;;  %v1934_v56 = vrot.slane %v1421_v12, 1  ;;  %v1930_v3 = vrot.slane %v7015_v43, 1  ;;  %v1543_v48 = vrot.slane %v1541_v1, 1  ;;  %v6424_v1 = vld [vmem:[#allocation2 + $0x238] sm:$0xff]  }
 0x373   : > { %5491 = vmatprep.subr.bf16.mxu1 %v6405_v21  ;;  %5603 = vmatprep.subr.bf16.mxu0 %v6407_v13  ;;  %v6410_v21 = vld [vmem:[#allocation2 + $0x1a0] sm:$0xff]   ;;  %v1515_v39 = vor.u32 %v1514_v23, %v1510_v22  ;;  %v1939_v23 = vrot.slane %v7024_v47, 1  ;;  %v1538_v38 = vrot.slane %v1536_v9, 1  ;;  %v6421_v9 = vld [vmem:[#allocation2 + $0x1f8] sm:$0xff]  }
 0x374   : > { %v6412_v13 = vld [vmem:[#allocation2 + $0x220] sm:$0xff]   ;;  %v7341_v12 = vsel %vm1448_vm6, %v1527_v55, %v1531_v62  ;;  %v7344_v45 = vsel %vm1914_vm7, %v1933_v32, %v1934_v56  ;;  %v6416_v55 = vld [vmem:[#allocation2 + $0x228] sm:$0xff]   ;;  %v1534_v32 = vshrl.u32 %v7036_v14, 16  ;;  %v6417_v62 = vld [vmem:[#allocation2 + $0x1f0] sm:$0xff]  }
 0x375   : > { %8639 = vst [vmem:[#allocation50_spill] sm:$0xff] %v7341_v12  ;;  %8640 = vst [vmem:[#allocation51_spill] sm:$0xff] %v7344_v45  ;;  %v6419_v56 = vld [vmem:[#allocation2 + $0x270] sm:$0xff]  }
 0x376   : > { %5492 = vmatpush3.bf16.msra.mxu1 %v6406_v8  ;;  %5604 = vmatpush3.bf16.msra.mxu0 %v6408_v2  ;;  %v1931_v8 = vrot.slane %v1420_v53, 1  ;;  %v1546_v2 = vshrl.u32 %v7024_v47, 16  ;;  %v1572_v53 = vshll.u32 %v7046_v63, 16 }
 0x377   : > { %5493 = vmatprep.subr.bf16.mxu1 %v6409_v50  ;;  %5605 = vmatprep.subr.bf16.mxu0 %v6411_v60  ;;  %v1553_v50 = vshll.u32 %v1423_v57, 16  ;;  %v6414_v60 = vld [vmem:[#allocation2 + $0x1a8] sm:$0xff]  }
 0x378   : > { %3446 = vmatmul.mubr.bf16.gmra.mrb[68].mxu1 %v7322_v15  ;;  %3607 = vmatmul.mubr.bf16.gmra.mrb[68].mxu0 %v7327_v25  ;;  %v1551_v22 = vor.u32 %v1550_v28, %v1546_v2  ;;  %v1940_v25 = vrot.slane %v1423_v57, 1  ;;  %v1425_v28 = vsel %vm6948_vm5, %v7019_v46, 0  ;;  %v6423_v2 = vld [vmem:[#allocation2 + $0x278] sm:$0xff]   ;;  %v1936_v46 = vrot.slane %v7036_v14, 1 }
 0x379   : > { %3453 = vmatprep.mubr.bf16.mxu1 %v7341_v12  ;;  %3614 = vmatprep.mubr.bf16.mxu0 %v7344_v45  ;;  %v7356_v45 = vsel %vm1448_vm6, %v1515_v39, %v1519_v54  ;;  %v1539_v54 = vor.u32 %v1538_v38, %v1534_v32  ;;  %v6422_v32 = vld [vmem:[#allocation2 + $0x1b8] sm:$0xff]   ;;  %v1596_v38 = vshll.u32 %v7067_v40, 16 }
 0x37a   : > { %5494 = vmatpush3.bf16.msra.mxu1 %v6410_v21  ;;  %5606 = vmatpush3.bf16.msra.mxu0 %v6412_v13  ;;  %8641 = vst [vmem:[#allocation52_spill] sm:$0xff] %v7356_v45  ;;  %v7359_v21 = vsel %vm1914_vm7, %v1930_v3, %v1931_v8  ;;  %v1555_v13 = vrot.slane %v1553_v50, 1  ;;  %v7370_v57 = vsel %vm1914_vm7, %v1939_v23, %v1940_v25  ;;  %v1574_v3 = vrot.slane %v1572_v53, 1 }
 0x37b   : > { %5495 = vmatprep.subr.bf16.mxu1 %v6413_v52  ;;  %5607 = vmatprep.subr.bf16.mxu0 %v6415_v4  ;;  %8642 = vst [vmem:[#allocation53_spill] sm:$0xff] %v7359_v21  ;;  %v6418_v52 = vld [vmem:[#allocation2 + $0x1b0] sm:$0xff]   ;;  %8644 = vst [vmem:[#allocation55_spill] sm:$0xff] %v7370_v57  ;;  %v1937_v8 = vrot.slane %v7336_v16, 1  ;;  %v1560_v50 = vshll.u32 %v7059_v33, 16  ;;  %v1424_v25 = vsel %vm6948_vm5, %v7030_v59, 0 }
 0x37c   : > { %v6420_v4 = vld [vmem:[#allocation2 + $0x230] sm:$0xff]   ;;  %v7367_v39 = vsel %vm1448_vm6, %v1551_v22, %v1555_v13  ;;  %v7382_v22 = vsel %vm1448_vm6, %v1539_v54, %v1543_v48  ;;  %v1945_v23 = vrot.slane %v7046_v63, 1  ;;  %v1558_v59 = vshrl.u32 %v7059_v33, 16 }
 0x37d   : > { %8643 = vst [vmem:[#allocation54_spill] sm:$0xff] %v7367_v39  ;;  %8645 = vst [vmem:[#allocation56_spill] sm:$0xff] %v7382_v22  ;;  %v7387_v53 = vsel %vm1914_vm7, %v1936_v46, %v1937_v8  ;;  %v1562_v13 = vrot.slane %v1560_v50, 1  ;;  %v1427_v48 = vsel %vm6948_vm5, %v7041_v61, 0  ;;  %v1426_v46 = vsel %vm6948_vm5, %v7055_v27, 0 }
 0x37e   : > { %5496 = vmatpush3.bf16.msra.mxu1 %v6414_v60  ;;  %5608 = vmatpush3.bf16.msra.mxu0 %v6416_v55  ;;  %v1570_v60 = vshrl.u32 %v7046_v63, 16  ;;  %v1577_v55 = vshll.u32 %v1425_v28, 16  ;;  %8646 = vst [vmem:[#allocation57_spill] sm:$0xff] %v7387_v53  ;;  %v1942_v50 = vrot.slane %v7059_v33, 1  ;;  %v1951_v27 = vrot.slane %v7067_v40, 1 }
 0x37f   : > { %5497 = vmatprep.subr.bf16.mxu1 %v6417_v62  ;;  %5609 = vmatprep.subr.bf16.mxu0 %v6419_v56  ;;  %v6425_v62 = vld [vmem:[#allocation2 + $0x2c0] sm:$0xff]   ;;  %v1563_v61 = vor.u32 %v1562_v13, %v1558_v59 }
 0x380   : > { %3454 = vmatmul.mubr.bf16.gmra.mrb[72].mxu1 %v7356_v45  ;;  %3615 = vmatmul.mubr.bf16.gmra.mrb[72].mxu0 %v7359_v21  ;;  %v6427_v56 = vld [vmem:[#allocation2 + $0x340] sm:$0xff]   ;;  %v1575_v16 = vor.u32 %v1574_v3, %v1570_v60  ;;  %v1943_v60 = vrot.slane %v1424_v25, 1 }
 0x381   : > { %3461 = vmatprep.mubr.bf16.mxu1 %v7367_v39  ;;  %3622 = vmatprep.mubr.bf16.mxu0 %v7370_v57 }
 0x382   : > { %5498 = vmatpush3.bf16.msra.mxu1 %v6418_v52  ;;  %5610 = vmatpush3.bf16.msra.mxu0 %v6420_v4  ;;  %v1565_v52 = vshll.u32 %v1424_v25, 16  ;;  %v1579_v4 = vrot.slane %v1577_v55, 1  ;;  %v1594_v55 = vshrl.u32 %v7067_v40, 16  ;;  %v7416_v59 = vsel %vm1914_vm7, %v1942_v50, %v1943_v60 }
 0x383   : > { %5499 = vmatprep.subr.bf16.mxu1 %v6421_v9  ;;  %5611 = vmatprep.subr.bf16.mxu0 %v6423_v2  ;;  %v1946_v9 = vrot.slane %v1425_v28, 1  ;;  %v1584_v2 = vshll.u32 %v7090_v10, 16  ;;  %v1598_v28 = vrot.slane %v1596_v38, 1  ;;  %8650 = vst [vmem:[#allocation61_spill] sm:$0xff] %v7416_v59  ;;  %v1952_v25 = vrot.slane %v1427_v48, 1 }
 0x384   : > { %v7397_v54 = vsel %vm1448_vm6, %v1575_v16, %v1579_v4  ;;  %v1567_v8 = vrot.slane %v1565_v52, 1  ;;  %v1620_v16 = vshll.u32 %v7108_v42, 16  ;;  %v1429_v52 = vsel %vm6948_vm5, %v7062_v37, 0 }
 0x385   : > { %8647 = vst [vmem:[#allocation58_spill] sm:$0xff] %v7397_v54  ;;  %v7400_v3 = vsel %vm1914_vm7, %v1945_v23, %v1946_v9  ;;  %v1599_v23 = vor.u32 %v1598_v28, %v1594_v55  ;;  %v1949_v37 = vrot.slane %v1426_v46, 1  ;;  %v1618_v50 = vshrl.u32 %v7108_v42, 16 }
 0x386   : > { %5500 = vmatpush3.bf16.msra.mxu1 %v6422_v32  ;;  %5612 = vmatpush3.bf16.msra.mxu0 %v6424_v1  ;;  %8648 = vst [vmem:[#allocation59_spill] sm:$0xff] %v7400_v3  ;;  %v1601_v32 = vshll.u32 %v1427_v48, 16  ;;  %v1582_v1 = vshrl.u32 %v7090_v10, 16  ;;  %v7413_v38 = vsel %vm1448_vm6, %v1563_v61, %v1567_v8  ;;  %v7427_v61 = vsel %vm1914_vm7, %v1951_v27, %v1952_v25 }
 0x387   : > { %5709 = vmatprep.subr.bf16.mxu1 %v6425_v62  ;;  %5821 = vmatprep.subr.bf16.mxu0 %v6427_v56  ;;  %v1586_v62 = vrot.slane %v1584_v2, 1  ;;  %v1589_v56 = vshll.u32 %v1426_v46, 16  ;;  %8649 = vst [vmem:[#allocation60_spill] sm:$0xff] %v7413_v38  ;;  %v1622_v2 = vrot.slane %v1620_v16, 1  ;;  %8652 = vst [vmem:[#allocation63_spill] sm:$0xff] %v7427_v61  ;;  %v1948_v8 = vrot.slane %v7090_v10, 1 }
 0x388   : > { %3462 = vmatmul.mubr.bf16.gmra.mrb[76].mxu1 %v7382_v22  ;;  %3623 = vmatmul.mubr.bf16.gmra.mrb[76].mxu0 %v7387_v53  ;;  %v1603_v13 = vrot.slane %v1601_v32, 1  ;;  %v1608_v48 = vshll.u32 %v7132_v24, 16  ;;  %v1625_v60 = vshll.u32 %v1429_v52, 16  ;;  %v1428_v55 = vsel %vm6948_vm5, %v7084_v6, 0 }
 0x389   : > { %3469 = vmatprep.mubr.bf16.mxu1 %v7397_v54  ;;  %3630 = vmatprep.mubr.bf16.mxu0 %v7400_v3  ;;  %v1587_v4 = vor.u32 %v1586_v62, %v1582_v1  ;;  %v1591_v9 = vrot.slane %v1589_v56, 1  ;;  %v1623_v32 = vor.u32 %v1622_v2, %v1618_v50  ;;  %v1957_v1 = vrot.slane %v7108_v42, 1 }
 0x38a   : > { %v7424_v28 = vsel %vm1448_vm6, %v1599_v23, %v1603_v13  ;;  %v1606_v62 = vshrl.u32 %v7132_v24, 16  ;;  %v1610_v56 = vrot.slane %v1608_v48, 1  ;;  %v1613_v16 = vshll.u32 %v1428_v55, 16 }
 0x38b   : > { %8651 = vst [vmem:[#allocation62_spill] sm:$0xff] %v7424_v28  ;;  %v1644_v23 = vshll.u32 %v7145_v51, 16  ;;  %v7441_v27 = vsel %vm1448_vm6, %v1587_v4, %v1591_v9  ;;  %v7444_v46 = vsel %vm1914_vm7, %v1948_v8, %v1949_v37  ;;  %v1627_v13 = vrot.slane %v1625_v60, 1 }
 0x38c   : > { %8653 = vst [vmem:[#allocation64_spill] sm:$0xff] %v7441_v27  ;;  %8654 = vst [vmem:[#allocation65_spill] sm:$0xff] %v7444_v46  ;;  %v1958_v25 = vrot.slane %v1429_v52, 1  ;;  %v1954_v2 = vrot.slane %v7132_v24, 1  ;;  %v1431_v48 = vsel %vm6948_vm5, %v7101_v34, 0  ;;  %v1611_v4 = vor.u32 %v1610_v56, %v1606_v62 }
 0x38d   : > { %v1615_v9 = vrot.slane %v1613_v16, 1  ;;  %v1955_v8 = vrot.slane %v1428_v55, 1  ;;  %v1646_v52 = vrot.slane %v1644_v23, 1  ;;  %v1632_v37 = vshll.u32 %v7174_v11, 16 }
 0x38e   : > { %v7450_v6 = vsel %vm1914_vm7, %v1957_v1, %v1958_v25  ;;  %v1642_v50 = vshrl.u32 %v7145_v51, 16  ;;  %v1649_v60 = vshll.u32 %v1431_v48, 16  ;;  %v1430_v34 = vsel %vm6948_vm5, %v7128_v31, 0 }
 0x38f   : > { %8656 = vst [vmem:[#allocation67_spill] sm:$0xff] %v7450_v6  ;;  %v7467_v1 = vsel %vm1448_vm6, %v1611_v4, %v1615_v9  ;;  %v7470_v55 = vsel %vm1914_vm7, %v1954_v2, %v1955_v8  ;;  %v1668_v56 = vshll.u32 %v7190_v5, 16  ;;  %v1964_v16 = vrot.slane %v1431_v48, 1 }
 0x390   : > { %3470 = vmatmul.mubr.bf16.gmra.mrb[80].mxu1 %v7413_v38  ;;  %3631 = vmatmul.mubr.bf16.gmra.mrb[80].mxu0 %v7416_v59  ;;  %8657 = vst [vmem:[#allocation68_spill] sm:$0xff] %v7467_v1  ;;  %8658 = vst [vmem:[#allocation69_spill] sm:$0xff] %v7470_v55  ;;  %v1647_v62 = vor.u32 %v1646_v52, %v1642_v50  ;;  %v1630_v23 = vshrl.u32 %v7174_v11, 16  ;;  %v1637_v25 = vshll.u32 %v1430_v34, 16  ;;  %v1433_v31 = vsel %vm6948_vm5, %v7147_v49, 0 }
 0x391   : > { %3477 = vmatprep.mubr.bf16.mxu1 %v7424_v28  ;;  %3638 = vmatprep.mubr.bf16.mxu0 %v7427_v61  ;;  %v7447_v61 = vsel %vm1448_vm6, %v1623_v32, %v1627_v13  ;;  %v1963_v32 = vrot.slane %v7145_v51, 1  ;;  %v1634_v13 = vrot.slane %v1632_v37, 1  ;;  %v1960_v48 = vrot.slane %v7174_v11, 1 }
 0x392   : > { %8655 = vst [vmem:[#allocation66_spill] sm:$0xff] %v7447_v61  ;;  %v1961_v4 = vrot.slane %v1430_v34, 1  ;;  %v1670_v9 = vrot.slane %v1668_v56, 1  ;;  %v1639_v52 = vrot.slane %v1637_v25, 1  ;;  %v1656_v37 = vshll.u32 %v7214_v58, 16 }
 0x393   : > { %v1635_v8 = vor.u32 %v1634_v13, %v1630_v23  ;;  %v1666_v49 = vshrl.u32 %v7190_v5, 16  ;;  %v1673_v50 = vshll.u32 %v1433_v31, 16  ;;  %v1692_v56 = vshll.u32 %v7225_v44, 16 }
 0x394   : > { %v7495_v34 = vsel %vm1914_vm7, %v1960_v48, %v1961_v4  ;;  %v1654_v23 = vshrl.u32 %v7214_v58, 16  ;;  %v1658_v13 = vrot.slane %v1656_v37, 1  ;;  %v1966_v48 = vrot.slane %v7214_v58, 1 }
 0x395   : > { %8661 = vst [vmem:[#allocation72_spill] sm:$0xff] %v7495_v34  ;;  %v1680_v37 = vshll.u32 %v7239_v17, 16 }
 0x398   : > { %3478 = vmatmul.mubr.bf16.gmra.mrb[84].mxu1 %v7441_v27  ;;  %3639 = vmatmul.mubr.bf16.gmra.mrb[84].mxu0 %v7444_v46  ;;  %v7475_v46 = vsel %vm1914_vm7, %v1963_v32, %v1964_v16  ;;  %v1671_v32 = vor.u32 %v1670_v9, %v1666_v49  ;;  %v7499_v16 = vsel %vm1448_vm6, %v1635_v8, %v1639_v52  ;;  %v1694_v9 = vrot.slane %v1692_v56, 1  ;;  %v8667_v56 = vld [vmem:[#allocation16_spill] sm:$0xff] }
 0x399   : > { %3485 = vmatprep.mubr.bf16.mxu1 %v7447_v61  ;;  %3646 = vmatprep.mubr.bf16.mxu0 %v7450_v6  ;;  %v1651_v6 = vrot.slane %v1649_v60, 1  ;;  %8659 = vst [vmem:[#allocation70_spill] sm:$0xff] %v7475_v46  ;;  %v1969_v60 = vrot.slane %v7190_v5, 1  ;;  %8662 = vst [vmem:[#allocation73_spill] sm:$0xff] %v7499_v16  ;;  %v1659_v8 = vor.u32 %v1658_v13, %v1654_v23  ;;  %v1678_v13 = vshrl.u32 %v7239_v17, 16 }
 0x39b   : > { %v7483_v2 = vsel %vm1448_vm6, %v1647_v62, %v1651_v6  ;;  %v1432_v6 = vsel %vm6948_vm5, %v7165_v35, 0  ;;  %v1970_v62 = vrot.slane %v1433_v31, 1  ;;  %v1435_v35 = vsel %vm6948_vm5, %v7181_v7, 0 }
 0x39c   : > { %8660 = vst [vmem:[#allocation71_spill] sm:$0xff] %v7483_v2  ;;  %v1661_v25 = vshll.u32 %v1432_v6, 16  ;;  %v1967_v4 = vrot.slane %v1432_v6, 1  ;;  %v1690_v7 = vshrl.u32 %v7225_v44, 16  ;;  %v1697_v49 = vshll.u32 %v1435_v35, 16 }
 0x39e   : > { %v1663_v52 = vrot.slane %v1661_v25, 1  ;;  %v7523_v6 = vsel %vm1914_vm7, %v1966_v48, %v1967_v4  ;;  %v1682_v25 = vrot.slane %v1680_v37, 1  ;;  %v1699_v59 = vrot.slane %v1697_v49, 1 }
 0x39f   : > { %v1972_v4 = vrot.slane %v7239_v17, 1 }
 0x3a0   : > { %3486 = vmatmul.mubr.bf16.gmra.mrb[88].mxu1 %v7467_v1  ;;  %3647 = vmatmul.mubr.bf16.gmra.mrb[88].mxu0 %v7470_v55  ;;  %v7503_v55 = vsel %vm1914_vm7, %v1969_v60, %v1970_v62  ;;  %v1975_v60 = vrot.slane %v7225_v44, 1  ;;  %v1976_v62 = vrot.slane %v1435_v35, 1  ;;  %v7527_v23 = vsel %vm1448_vm6, %v1659_v8, %v1663_v52 }
 0x3a1   : > { %3493 = vmatprep.mubr.bf16.mxu1 %v7483_v2  ;;  %3654 = vmatprep.mubr.bf16.mxu0 %v7475_v46  ;;  %v1675_v46 = vrot.slane %v1673_v50, 1  ;;  %8663 = vst [vmem:[#allocation74_spill] sm:$0xff] %v7503_v55  ;;  %v8665_v50 = vld [vmem:[#allocation31_spill] sm:$0xff]  ;;  %8668 = vst [vmem:[#allocation76_spill] sm:$0xff] %v7527_v23  ;;  %v1683_v52 = vor.u32 %v1682_v25, %v1678_v13 }
 0x3a2   : > { %8666 = vst [vmem:[#allocation31_spill] sm:$0xff] %v7523_v6  ;;  %v7531_v3 = vsel %vm1914_vm7, %v1975_v60, %v1976_v62  ;;  %v1714_v60 = vshrl.u32 %v8667_v56, 16 }
 0x3a3   : > { %v7511_v31 = vsel %vm1448_vm6, %v1671_v32, %v1675_v46  ;;  %v1434_v46 = vsel %vm6948_vm5, %v8665_v50, 0  ;;  %v1695_v32 = vor.u32 %v1694_v9, %v1690_v7  ;;  %8669 = vst [vmem:[#allocation77_spill] sm:$0xff] %v7531_v3  ;;  %v8670_v50 = vld [vmem:[#allocation13_spill] sm:$0xff]  ;;  %v8672_v7 = vld [vmem:[#allocation15_spill] sm:$0xff] }
 0x3a4   : > { %8664 = vst [vmem:[#allocation75_spill] sm:$0xff] %v7511_v31  ;;  %v1437_v48 = vsel %vm6948_vm5, %v8670_v50, 0  ;;  %v1973_v9 = vrot.slane %v1434_v46, 1  ;;  %v1704_v49 = vshll.u32 %v8672_v7, 16  ;;  %v8673_v50 = vld [vmem:[#allocation11_spill] sm:$0xff]  ;;  %v1978_v19 = vrot.slane %v8672_v7, 1 }
 0x3a5   : > { %v7539_v35 = vsel %vm1448_vm6, %v1695_v32, %v1699_v59  ;;  %v1721_v62 = vshll.u32 %v1437_v48, 16  ;;  %v1436_v59 = vsel %vm6948_vm5, %v8673_v50, 0  ;;  %v1982_v21 = vrot.slane %v1437_v48, 1 }
 0x3a6   : > { %8671 = vst [vmem:[#allocation13_spill] sm:$0xff] %v7539_v35  ;;  %v7550_v32 = vsel %vm1914_vm7, %v1972_v4, %v1973_v9  ;;  %v1706_v25 = vrot.slane %v1704_v49, 1  ;;  %v1979_v50 = vrot.slane %v1436_v59, 1  ;;  %v1439_v4 = vsel %vm6948_vm5, %v8677_v36, 0  ;;  %v8680_v49 = vld [vmem:[#allocation20_spill] sm:$0xff] }
 0x3a7   : > { %8674 = vst [vmem:[#allocation11_spill] sm:$0xff] %v7550_v32  ;;  %v1723_v57 = vrot.slane %v1721_v62, 1  ;;  %v1745_v62 = vshll.u32 %v1439_v4, 16 }
 0x3a8   : > { %3494 = vmatmul.mubr.bf16.gmra.mrb[92].mxu1 %v7499_v16  ;;  %3655 = vmatmul.mubr.bf16.gmra.mrb[92].mxu0 %v7495_v34  ;;  %v1685_v34 = vshll.u32 %v1434_v46, 16 }
 0x3a9   : > { %3501 = vmatprep.mubr.bf16.mxu1 %v7511_v31  ;;  %3662 = vmatprep.mubr.bf16.mxu0 %v7503_v55  ;;  %v1716_v55 = vshll.u32 %v8667_v56, 16 }
 0x3aa   : > { %v1687_v37 = vrot.slane %v1685_v34, 1  ;;  %v1702_v34 = vshrl.u32 %v8672_v7, 16  ;;  %v8685_v7 = vld [vmem:[#allocation18_spill] sm:$0xff] }
 0x3ab   : > { %v1718_v8 = vrot.slane %v1716_v55, 1  ;;  %v1981_v55 = vrot.slane %v8667_v56, 1 }
 0x3ac   : > { %v7555_v13 = vsel %vm1448_vm6, %v1683_v52, %v1687_v37  ;;  %v1707_v48 = vor.u32 %v1706_v25, %v1702_v34  ;;  %v8683_v34 = vld [vmem:[#allocation24_spill] sm:$0xff] }
 0x3ad   : > { %v1719_v46 = vor.u32 %v1718_v8, %v1714_v60  ;;  %8676 = vst [vmem:[#allocation78_spill] sm:$0xff] %v7555_v13  ;;  %v7568_v8 = vsel %vm1914_vm7, %v1981_v55, %v1982_v21  ;;  %v1728_v60 = vshll.u32 %v8680_v49, 16  ;;  %v1988_v55 = vrot.slane %v1439_v4, 1 }
 0x3ae   : > { %8679 = vst [vmem:[#allocation79_spill] sm:$0xff] %v7568_v8 }
 0x3af   : > { %v7565_v9 = vsel %vm1448_vm6, %v1719_v46, %v1723_v57  ;;  %v7578_v46 = vsel %vm1914_vm7, %v1978_v19, %v1979_v50  ;;  %v1984_v50 = vrot.slane %v8680_v49, 1 }
 0x3b0   : > { %3502 = vmatmul.mubr.bf16.gmra.mrb[96].mxu1 %v7527_v23  ;;  %3663 = vmatmul.mubr.bf16.gmra.mrb[96].mxu0 %v7523_v6  ;;  %v8675_v6 = vld [vmem:[#allocation17_spill] sm:$0xff]  ;;  %8678 = vst [vmem:[#allocation12_spill] sm:$0xff] %v7565_v9 }
 0x3b1   : > { %3509 = vmatprep.mubr.bf16.mxu1 %v7539_v35  ;;  %3670 = vmatprep.mubr.bf16.mxu0 %v7531_v3  ;;  %v1740_v53 = vshll.u32 %v8675_v6, 16  ;;  %v1709_v3 = vshll.u32 %v1436_v59, 16  ;;  %v1738_v36 = vshrl.u32 %v8675_v6, 16  ;;  %v8681_v59 = vld [vmem:[#allocation14_spill] sm:$0xff]  ;;  %v1987_v21 = vrot.slane %v8675_v6, 1 }
 0x3b2   : > { %v1438_v57 = vsel %vm6948_vm5, %v8681_v59, 0  ;;  %8682 = vst [vmem:[#allocation14_spill] sm:$0xff] %v7578_v46  ;;  %v1441_v59 = vsel %vm6948_vm5, %v8685_v7, 0  ;;  %v8691_v6 = vld [vmem:[#allocation30_spill] sm:$0xff] }
 0x3b3   : > { %v1742_v52 = vrot.slane %v1740_v53, 1  ;;  %v1711_v37 = vrot.slane %v1709_v3, 1  ;;  %v1764_v3 = vshll.u32 %v8683_v34, 16  ;;  %v1733_v41 = vshll.u32 %v1438_v57, 16 }
 0x3b4   : > { %v7590_v19 = vsel %vm1914_vm7, %v1987_v21, %v1988_v55  ;;  %v1985_v4 = vrot.slane %v1438_v57, 1  ;;  %v8689_v57 = vld [vmem:[#allocation19_spill] sm:$0xff] }
 0x3b5   : > { %v1743_v53 = vor.u32 %v1742_v52, %v1738_v36  ;;  %v7584_v25 = vsel %vm1448_vm6, %v1707_v48, %v1711_v37  ;;  %8686 = vst [vmem:[#allocation18_spill] sm:$0xff] %v7590_v19  ;;  %v1762_v48 = vshrl.u32 %v8683_v34, 16  ;;  %v1766_v37 = vrot.slane %v1764_v3, 1 }
 0x3b6   : > { %8684 = vst [vmem:[#allocation80_spill] sm:$0xff] %v7584_v25  ;;  %v1735_v36 = vrot.slane %v1733_v41, 1  ;;  %v1440_v55 = vsel %vm6948_vm5, %v8689_v57, 0 }
 0x3b7   : > { %v1767_v3 = vor.u32 %v1766_v37, %v1762_v48  ;;  %v1786_v37 = vshrl.u32 %v8691_v6, 16 }
 0x3b8   : > { %3510 = vmatmul.mubr.bf16.gmra.mrb[100].mxu1 %v7555_v13  ;;  %3671 = vmatmul.mubr.bf16.gmra.mrb[100].mxu0 %v7550_v32  ;;  %v1730_v32 = vrot.slane %v1728_v60, 1  ;;  %v1769_v60 = vshll.u32 %v1441_v59, 16 }
 0x3b9   : > { %3517 = vmatprep.mubr.bf16.mxu1 %v7565_v9  ;;  %3678 = vmatprep.mubr.bf16.mxu0 %v7568_v8  ;;  %v1726_v8 = vshrl.u32 %v8680_v49, 16  ;;  %v1747_v9 = vrot.slane %v1745_v62, 1  ;;  %v8688_v62 = vld [vmem:[#allocation27_spill] sm:$0xff] }
 0x3ba   : > { %v1752_v21 = vshll.u32 %v8688_v62, 16  ;;  %v1771_v49 = vrot.slane %v1769_v60, 1 }
 0x3bb   : > { %v7596_v52 = vsel %vm1448_vm6, %v1743_v53, %v1747_v9  ;;  %v1731_v7 = vor.u32 %v1730_v32, %v1726_v8  ;;  %v1993_v9 = vrot.slane %v8683_v34, 1  ;;  %v1994_v53 = vrot.slane %v1441_v59, 1  ;;  %v8699_v34 = vld [vmem:[#allocation36_spill] sm:$0xff] }
 0x3bc   : > { %8687 = vst [vmem:[#allocation81_spill] sm:$0xff] %v7596_v52  ;;  %v1754_v32 = vrot.slane %v1752_v21, 1  ;;  %v1757_v8 = vshll.u32 %v1440_v55, 16  ;;  %v1990_v59 = vrot.slane %v8688_v62, 1  ;;  %v7624_v48 = vsel %vm1448_vm6, %v1767_v3, %v1771_v49  ;;  %v8696_v21 = vld [vmem:[#allocation34_spill] sm:$0xff] }
 0x3bd   : > { %v7612_v41 = vsel %vm1448_vm6, %v1731_v7, %v1735_v36  ;;  %8695 = vst [vmem:[#allocation82_spill] sm:$0xff] %v7624_v48  ;;  %v1999_v49 = vrot.slane %v8691_v6, 1 }
 0x3be   : > { %8692 = vst [vmem:[#allocation30_spill] sm:$0xff] %v7612_v41  ;;  %v1759_v36 = vrot.slane %v1757_v8, 1 }
 0x3c0   : > { %3518 = vmatmul.mubr.bf16.gmra.mrb[104].mxu1 %v7584_v25  ;;  %3679 = vmatmul.mubr.bf16.gmra.mrb[104].mxu0 %v7578_v46  ;;  %v7606_v46 = vsel %vm1914_vm7, %v1984_v50, %v1985_v4  ;;  %v8693_v25 = vld [vmem:[#allocation23_spill] sm:$0xff]  ;;  %v7618_v50 = vsel %vm1914_vm7, %v1993_v9, %v1994_v53  ;;  %v1991_v4 = vrot.slane %v1440_v55, 1  ;;  %v1776_v9 = vshll.u32 %v8696_v21, 16  ;;  %v8697_v55 = vld [vmem:[#allocation25_spill] sm:$0xff] }
 0x3c1   : > { %3525 = vmatprep.mubr.bf16.mxu1 %v7596_v52  ;;  %3686 = vmatprep.mubr.bf16.mxu0 %v7590_v19  ;;  %8690 = vst [vmem:[#allocation19_spill] sm:$0xff] %v7606_v46  ;;  %v1750_v52 = vshrl.u32 %v8688_v62, 16  ;;  %v1788_v19 = vshll.u32 %v8691_v6, 16  ;;  %v1443_v57 = vsel %vm6948_vm5, %v8693_v25, 0  ;;  %8694 = vst [vmem:[#allocation23_spill] sm:$0xff] %v7618_v50  ;;  %v1442_v53 = vsel %vm6948_vm5, %v8697_v55, 0 }
 0x3c2   : > { %v1793_v7 = vshll.u32 %v1443_v57, 16  ;;  %v2000_v3 = vrot.slane %v1443_v57, 1  ;;  %v1781_v8 = vshll.u32 %v1442_v53, 16  ;;  %v1996_v57 = vrot.slane %v8696_v21, 1 }
 0x3c3   : > { %v1790_v60 = vrot.slane %v1788_v19, 1  ;;  %v1755_v25 = vor.u32 %v1754_v32, %v1750_v52  ;;  %v1778_v32 = vrot.slane %v1776_v9, 1  ;;  %v8704_v9 = vld [vmem:[#allocation38_spill] sm:$0xff] }
 0x3c4   : > { %v1795_v62 = vrot.slane %v1793_v7, 1 }
 0x3c5   : > { %v1791_v19 = vor.u32 %v1790_v60, %v1786_v37  ;;  %v7640_v52 = vsel %vm1448_vm6, %v1755_v25, %v1759_v36  ;;  %v1810_v60 = vshrl.u32 %v8699_v34, 16  ;;  %v1783_v36 = vrot.slane %v1781_v8, 1 }
 0x3c6   : > { %8700 = vst [vmem:[#allocation36_spill] sm:$0xff] %v7640_v52 }
 0x3c7   : > { %v7652_v37 = vsel %vm1448_vm6, %v1791_v19, %v1795_v62 }
 0x3c8   : > { %3526 = vmatmul.mubr.bf16.gmra.mrb[108].mxu1 %v7612_v41  ;;  %3687 = vmatmul.mubr.bf16.gmra.mrb[108].mxu0 %v7606_v46  ;;  %v7634_v46 = vsel %vm1914_vm7, %v1990_v59, %v1991_v4  ;;  %v8701_v41 = vld [vmem:[#allocation28_spill] sm:$0xff]  ;;  %v7646_v59 = vsel %vm1914_vm7, %v1999_v49, %v2000_v3  ;;  %v1997_v4 = vrot.slane %v1442_v53, 1  ;;  %8703 = vst [vmem:[#allocation83_spill] sm:$0xff] %v7652_v37  ;;  %v1800_v49 = vshll.u32 %v8704_v9, 16 }
 0x3c9   : > { %3533 = vmatprep.mubr.bf16.mxu1 %v7624_v48  ;;  %3694 = vmatprep.mubr.bf16.mxu0 %v7618_v50  ;;  %8698 = vst [vmem:[#allocation25_spill] sm:$0xff] %v7634_v46  ;;  %v1774_v48 = vshrl.u32 %v8696_v21, 16  ;;  %v1812_v50 = vshll.u32 %v8699_v34, 16  ;;  %v1445_v55 = vsel %vm6948_vm5, %v8701_v41, 0  ;;  %8702 = vst [vmem:[#allocation28_spill] sm:$0xff] %v7646_v59  ;;  %v8705_v53 = vld [vmem:[#allocation32_spill] sm:$0xff] }
 0x3ca   : > { %v1817_v25 = vshll.u32 %v1445_v55, 16  ;;  %v1444_v3 = vsel %vm6948_vm5, %v8705_v53, 0  ;;  %v2006_v21 = vrot.slane %v1445_v55, 1 }
 0x3cb   : > { %v1814_v7 = vrot.slane %v1812_v50, 1  ;;  %v1779_v41 = vor.u32 %v1778_v32, %v1774_v48  ;;  %v2005_v50 = vrot.slane %v8699_v34, 1  ;;  %v1798_v48 = vshrl.u32 %v8704_v9, 16 }
 0x3cc   : > { %v1819_v19 = vrot.slane %v1817_v25, 1  ;;  %v1802_v32 = vrot.slane %v1800_v49, 1  ;;  %v1805_v8 = vshll.u32 %v1444_v3, 16  ;;  %v6426_v49 = vld [vmem:[#allocation2 + $0x280] sm:$0xff]  }
 0x3cd   : > { %v1815_v62 = vor.u32 %v1814_v7, %v1810_v60  ;;  %v2002_v60 = vrot.slane %v8704_v9, 1  ;;  %v2003_v7 = vrot.slane %v1444_v3, 1  ;;  %v6430_v3 = vld [vmem:[#allocation2 + $0x288] sm:$0xff]  }
 0x3ce   : > { %v1803_v55 = vor.u32 %v1802_v32, %v1798_v48  ;;  %v8714_v48 = vld [vmem:[#allocation9_spill] sm:$0xff] }
 0x3cf   : > { %v7672_v53 = vsel %vm1448_vm6, %v1815_v62, %v1819_v19  ;;  %v6428_v62 = vld [vmem:[#allocation2 + $0x300] sm:$0xff]   ;;  %v6429_v19 = vld [vmem:[#allocation2 + $0x2c8] sm:$0xff]  }
 0x3d0   : > { %3534 = vmatmul.mubr.bf16.gmra.mrb[112].mxu1 %v7640_v52  ;;  %3695 = vmatmul.mubr.bf16.gmra.mrb[112].mxu0 %v7634_v46  ;;  %v7662_v46 = vsel %vm1914_vm7, %v1996_v57, %v1997_v4  ;;  %8708 = vst [vmem:[#allocation84_spill] sm:$0xff] %v7672_v53  ;;  %v7675_v57 = vsel %vm1914_vm7, %v2005_v50, %v2006_v21  ;;  %v1807_v4 = vrot.slane %v1805_v8, 1  ;;  %v8712_v21 = vld [vmem:[#allocation10_spill] sm:$0xff]  ;;  %v6431_v50 = vld [vmem:[#allocation2 + $0x348] sm:$0xff]  }
 0x3d1   : > { %3541 = vmatprep.mubr.bf16.mxu1 %v7652_v37  ;;  %3702 = vmatprep.mubr.bf16.mxu0 %v7646_v59  ;;  %8706 = vst [vmem:[#allocation38_spill] sm:$0xff] %v7662_v46  ;;  %v7666_v37 = vsel %vm1448_vm6, %v1779_v41, %v1783_v36  ;;  %8709 = vst [vmem:[#allocation85_spill] sm:$0xff] %v7675_v57  ;;  %v7684_v41 = vsel %vm1914_vm7, %v2002_v60, %v2003_v7  ;;  %v8713_v36 = vld [vmem:[#allocation41_spill] sm:$0xff] }
 0x3d2   : > { %8707 = vst [vmem:[#allocation32_spill] sm:$0xff] %v7666_v37  ;;  %v7681_v25 = vsel %vm1448_vm6, %v1803_v55, %v1807_v4  ;;  %8711 = vst [vmem:[#allocation87_spill] sm:$0xff] %v7684_v41  ;;  %v6432_v32 = vld [vmem:[#allocation2 + $0x308] sm:$0xff]   ;;  %v6433_v55 = vld [vmem:[#allocation2 + $0x2d0] sm:$0xff]  }
 0x3d3   : > { %8710 = vst [vmem:[#allocation86_spill] sm:$0xff] %v7681_v25  ;;  %v6435_v4 = vld [vmem:[#allocation2 + $0x350] sm:$0xff]  }
 0x3d8   : > { %3542 = vmatmul.mubr.bf16.gmra.mrb[116].mxu1 %v7666_v37  ;;  %3703 = vmatmul.mubr.bf16.gmra.mrb[116].mxu0 %v7662_v46 }
 0x3d9   : > { %3549 = vmatprep.mubr.bf16.mxu1 %v7672_v53  ;;  %3710 = vmatprep.mubr.bf16.mxu0 %v7675_v57 }
 0x3e0   : > { %3550 = vmatmul.mubr.bf16.gmra.mrb[120].mxu1 %v7681_v25  ;;  %3711 = vmatmul.mubr.bf16.gmra.mrb[120].mxu0 %v7684_v41 }
 0x3e1   : > { %3751 = vmatprep.mubr.bf16.mxu1 %v8712_v21  ;;  %3912 = vmatprep.mubr.bf16.mxu0 %v8713_v36 }
 0x3e8   : > { %3752 = vmatmul.mubr.bf16.vlgmr.msra.gmra.mrb[124].mxu1 %v8714_v48  ;;  %3913 = vmatmul.mubr.bf16.vlgmr.msra.gmra.mrb[124].mxu0 %v7296_v18  ;;  %v6434_v18 = vld [vmem:[#allocation2 + $0x290] sm:$0xff]  }
 0x3e9   : > { %3759 = vmatprep.mubr.bf16.mxu1 %v6984_v0  ;;  %3920 = vmatprep.mubr.bf16.mxu0 %v7307_v30  ;;  %v6436_v48 = vld [vmem:[#allocation2 + $0x310] sm:$0xff]  }
 0x3ea   : > { %5710 = vmatpush3.bf16.msra.mxu1 %v6426_v49  ;;  %5822 = vmatpush3.bf16.msra.mxu0 %v6428_v62  ;;  %v6437_v49 = vld [vmem:[#allocation2 + $0x2d8] sm:$0xff]  }
 0x3eb   : > { %v5171_v8 = vpop.f32.mrb[20].mxu0  ;;  %5711 = vmatprep.subr.bf16.mxu1 %v6429_v19  ;;  %5823 = vmatprep.subr.bf16.mxu0 %v6431_v50  ;;  %v6439_v62 = vld [vmem:[#allocation2 + $0x358] sm:$0xff]  }
 0x3ec   : > { %v5172_v60 = vpop.f32.mrb[21].mxu0  ;;  %v6438_v19 = vld [vmem:[#allocation2 + $0x298] sm:$0xff]  }
 0x3ed   : > { %v7694_v7 = vadd.f32 %v5172_v60, %v5171_v8  ;;  %v5174_v21 = vpop.f32.mrb[22].mxu0  ;;  %v6440_v50 = vld [vmem:[#allocation2 + $0x318] sm:$0xff]   ;;  %v6443_v8 = vld [vmem:[#allocation2 + $0x360] sm:$0xff]  }
 0x3ee   : > { %v5175_v36 = vpop.f32.mrb[23].mxu0  ;;  %5712 = vmatpush3.bf16.msra.mxu1 %v6430_v3  ;;  %5824 = vmatpush3.bf16.msra.mxu0 %v6432_v32  ;;  %v6441_v32 = vld [vmem:[#allocation2 + $0x2e0] sm:$0xff]  }
 0x3ef   : > { %v7696_v41 = vadd.f32 %v5175_v36, %v5174_v21  ;;  %5713 = vmatprep.subr.bf16.mxu1 %v6433_v55  ;;  %5825 = vmatprep.subr.bf16.mxu0 %v6435_v4  ;;  %v6442_v36 = vld [vmem:[#allocation2 + $0x2a0] sm:$0xff]  }
 0x3f0   : > { %3760 = vmatmul.mubr.bf16.gmra.mrb[128].mxu1 %v6996_v26  ;;  %3921 = vmatmul.mubr.bf16.gmra.mrb[128].mxu0 %v7322_v15  ;;  %v6444_v15 = vld [vmem:[#allocation2 + $0x320] sm:$0xff]  }
 0x3f1   : > { %3767 = vmatprep.mubr.bf16.mxu1 %v7003_v29  ;;  %3928 = vmatprep.mubr.bf16.mxu0 %v7341_v12 }
 0x3f2   : > { %5714 = vmatpush3.bf16.msra.mxu1 %v6434_v18  ;;  %5826 = vmatpush3.bf16.msra.mxu0 %v6436_v48  ;;  %v6445_v18 = vld [vmem:[#allocation2 + $0x2e8] sm:$0xff]  }
 0x3f3   : > { %v5177_v3 = vpop.f32.mrb[24].mxu0  ;;  %5715 = vmatprep.subr.bf16.mxu1 %v6437_v49  ;;  %5827 = vmatprep.subr.bf16.mxu0 %v6439_v62  ;;  %v6447_v48 = vld [vmem:[#allocation2 + $0x368] sm:$0xff]  }
 0x3f4   : > { %v5178_v55 = vpop.f32.mrb[25].mxu0  ;;  %v6446_v49 = vld [vmem:[#allocation2 + $0x2a8] sm:$0xff]  }
 0x3f5   : > { %v7702_v4 = vadd.f32 %v5178_v55, %v5177_v3  ;;  %v5180_v60 = vpop.f32.mrb[26].mxu0  ;;  %v6448_v62 = vld [vmem:[#allocation2 + $0x328] sm:$0xff]   ;;  %v6451_v3 = vld [vmem:[#allocation2 + $0x370] sm:$0xff]  }
 0x3f6   : > { %v5181_v21 = vpop.f32.mrb[27].mxu0  ;;  %5716 = vmatpush3.bf16.msra.mxu1 %v6438_v19  ;;  %5828 = vmatpush3.bf16.msra.mxu0 %v6440_v50  ;;  %v6449_v50 = vld [vmem:[#allocation2 + $0x2f0] sm:$0xff]  }
 0x3f7   : > { %v7704_v30 = vadd.f32 %v5181_v21, %v5180_v60  ;;  %5717 = vmatprep.subr.bf16.mxu1 %v6441_v32  ;;  %5829 = vmatprep.subr.bf16.mxu0 %v6443_v8  ;;  %v6450_v21 = vld [vmem:[#allocation2 + $0x2b0] sm:$0xff]  }
 0x3f8   : > { %3768 = vmatmul.mubr.bf16.gmra.mrb[132].mxu1 %v7015_v43  ;;  %3929 = vmatmul.mubr.bf16.gmra.mrb[132].mxu0 %v7356_v45  ;;  %v6452_v45 = vld [vmem:[#allocation2 + $0x330] sm:$0xff]  }
 0x3f9   : > { %3775 = vmatprep.mubr.bf16.mxu1 %v7024_v47  ;;  %3936 = vmatprep.mubr.bf16.mxu0 %v7367_v39 }
 0x3fa   : > { %5718 = vmatpush3.bf16.msra.mxu1 %v6442_v36  ;;  %5830 = vmatpush3.bf16.msra.mxu0 %v6444_v15  ;;  %v6453_v15 = vld [vmem:[#allocation2 + $0x2f8] sm:$0xff]  }
 0x3fb   : > { %v5183_v19 = vpop.f32.mrb[28].mxu0  ;;  %5719 = vmatprep.subr.bf16.mxu1 %v6445_v18  ;;  %5831 = vmatprep.subr.bf16.mxu0 %v6447_v48  ;;  %v6455_v36 = vld [vmem:[#allocation2 + $0x378] sm:$0xff]  }
 0x3fc   : > { %v5184_v32 = vpop.f32.mrb[29].mxu0  ;;  %v6454_v18 = vld [vmem:[#allocation2 + $0x2b8] sm:$0xff]  }
 0x3fd   : > { %v7710_v8 = vadd.f32 %v5184_v32, %v5183_v19  ;;  %v5186_v55 = vpop.f32.mrb[30].mxu0  ;;  %v6456_v48 = vld [vmem:[#allocation2 + $0x338] sm:$0xff]   ;;  %v6459_v19 = vld [vmem:[#allocation2 + $0x440] sm:$0xff]  }
 0x3fe   : > { %v5187_v60 = vpop.f32.mrb[31].mxu0  ;;  %5720 = vmatpush3.bf16.msra.mxu1 %v6446_v49  ;;  %5832 = vmatpush3.bf16.msra.mxu0 %v6448_v62  ;;  %v6457_v62 = vld [vmem:[#allocation2 + $0x3c0] sm:$0xff]  }
 0x3ff   : > { %v7712_v12 = vadd.f32 %v5187_v60, %v5186_v55  ;;  %5721 = vmatprep.subr.bf16.mxu1 %v6449_v50  ;;  %5833 = vmatprep.subr.bf16.mxu0 %v6451_v3 }
 0x400   : > { %3776 = vmatmul.mubr.bf16.gmra.mrb[136].mxu1 %v7036_v14  ;;  %3937 = vmatmul.mubr.bf16.gmra.mrb[136].mxu0 %v7382_v22 }
 0x401   : > { %3783 = vmatprep.mubr.bf16.mxu1 %v7046_v63  ;;  %3944 = vmatprep.mubr.bf16.mxu0 %v7397_v54 }
 0x402   : > { %5722 = vmatpush3.bf16.msra.mxu1 %v6450_v21  ;;  %5834 = vmatpush3.bf16.msra.mxu0 %v6452_v45 }
 0x403   : > { %v5189_v49 = vpop.f32.mrb[32].mxu0  ;;  %5723 = vmatprep.subr.bf16.mxu1 %v6453_v15  ;;  %5835 = vmatprep.subr.bf16.mxu0 %v6455_v36 }
 0x404   : > { %v5190_v50 = vpop.f32.mrb[33].mxu0 }
 0x405   : > { %v7718_v3 = vadd.f32 %v5190_v50, %v5189_v49  ;;  %v5192_v32 = vpop.f32.mrb[34].mxu0 }
 0x406   : > { %v5193_v55 = vpop.f32.mrb[35].mxu0  ;;  %5724 = vmatpush3.bf16.msra.mxu1 %v6454_v18  ;;  %5836 = vmatpush3.bf16.msra.mxu0 %v6456_v48 }
 0x407   : > { %v7720_v60 = vadd.f32 %v5193_v55, %v5192_v32  ;;  %5933 = vmatprep.subr.bf16.mxu1 %v6457_v62  ;;  %6045 = vmatprep.subr.bf16.mxu0 %v6459_v19 }
 0x408   : > { %3784 = vmatmul.mubr.bf16.gmra.mrb[140].mxu1 %v7059_v33  ;;  %3945 = vmatmul.mubr.bf16.gmra.mrb[140].mxu0 %v7413_v38 }
 0x409   : > { %3791 = vmatprep.mubr.bf16.mxu1 %v7067_v40  ;;  %3952 = vmatprep.mubr.bf16.mxu0 %v7424_v28 }
 0x40b   : > { %v5195_v45 = vpop.f32.mrb[36].mxu0 }
 0x40c   : > { %v5196_v21 = vpop.f32.mrb[37].mxu0 }
 0x40d   : > { %v7726_v15 = vadd.f32 %v5196_v21, %v5195_v45  ;;  %v5198_v36 = vpop.f32.mrb[38].mxu0 }
 0x40e   : > { %v5199_v49 = vpop.f32.mrb[39].mxu0 }
 0x40f   : > { %v7728_v18 = vadd.f32 %v5199_v49, %v5198_v36 }
 0x410   : > { %3792 = vmatmul.mubr.bf16.gmra.mrb[144].mxu1 %v7090_v10  ;;  %3953 = vmatmul.mubr.bf16.gmra.mrb[144].mxu0 %v7441_v27 }
 0x411   : > { %3799 = vmatprep.mubr.bf16.mxu1 %v7108_v42  ;;  %3960 = vmatprep.mubr.bf16.mxu0 %v7447_v61 }
 0x413   : > { %v5201_v48 = vpop.f32.mrb[40].mxu0  ;;  %v5231_v62 = vpop.f32.mrb[40].mxu1 }
 0x414   : > { %v5202_v19 = vpop.f32.mrb[41].mxu0  ;;  %v5232_v50 = vpop.f32.mrb[41].mxu1 }
 0x415   : > { %v7734_v32 = vadd.f32 %v5202_v19, %v5201_v48  ;;  %v7736_v55 = vadd.f32 %v5232_v50, %v5231_v62  ;;  %v5204_v45 = vpop.f32.mrb[42].mxu0  ;;  %v5234_v21 = vpop.f32.mrb[42].mxu1 }
 0x416   : > { %v5205_v36 = vpop.f32.mrb[43].mxu0  ;;  %v5235_v49 = vpop.f32.mrb[43].mxu1 }
 0x417   : > { %8715 = vst [vmem:[#allocation10_spill] sm:$0xff] %v7736_v55  ;;  %v7738_v28 = vadd.f32 %v5205_v36, %v5204_v45  ;;  %v7740_v38 = vadd.f32 %v5235_v49, %v5234_v21 }
 0x418   : > { %3800 = vmatmul.mubr.bf16.gmra.mrb[148].mxu1 %v7132_v24  ;;  %3961 = vmatmul.mubr.bf16.gmra.mrb[148].mxu0 %v7467_v1 }
 0x419   : > { %8716 = vst [vmem:[#allocation41_spill] sm:$0xff] %v7740_v38  ;;  %3807 = vmatprep.mubr.bf16.mxu1 %v7145_v51  ;;  %3968 = vmatprep.mubr.bf16.mxu0 %v7483_v2  ;;  %v8734_v38 = vld [vmem:[#allocation30_spill] sm:$0xff] }
 0x41b   : > { %v5207_v48 = vpop.f32.mrb[44].mxu0  ;;  %v5237_v19 = vpop.f32.mrb[44].mxu1 }
 0x41c   : > { %v5208_v62 = vpop.f32.mrb[45].mxu0  ;;  %v5238_v50 = vpop.f32.mrb[45].mxu1 }
 0x41d   : > { %v7746_v61 = vadd.f32 %v5208_v62, %v5207_v48  ;;  %v7748_v27 = vadd.f32 %v5238_v50, %v5237_v19  ;;  %v5210_v45 = vpop.f32.mrb[46].mxu0  ;;  %v5240_v36 = vpop.f32.mrb[46].mxu1 }
 0x41e   : > { %v5211_v21 = vpop.f32.mrb[47].mxu0  ;;  %v5241_v49 = vpop.f32.mrb[47].mxu1 }
 0x41f   : > { %8717 = vst [vmem:[#allocation9_spill] sm:$0xff] %v7748_v27  ;;  %v7750_v54 = vadd.f32 %v5211_v21, %v5210_v45  ;;  %v7752_v22 = vadd.f32 %v5241_v49, %v5240_v36 }
 0x420   : > { %3808 = vmatmul.mubr.bf16.gmra.mrb[152].mxu1 %v7174_v11  ;;  %3969 = vmatmul.mubr.bf16.gmra.mrb[152].mxu0 %v7499_v16  ;;  %v8733_v11 = vld [vmem:[#allocation20_spill] sm:$0xff] }
 0x421   : > { %8718 = vst [vmem:[#allocation88_spill] sm:$0xff] %v7752_v22  ;;  %3815 = vmatprep.mubr.bf16.mxu1 %v7190_v5  ;;  %3976 = vmatprep.mubr.bf16.mxu0 %v7511_v31 }
 0x423   : > { %v5213_v48 = vpop.f32.mrb[48].mxu0  ;;  %v5243_v62 = vpop.f32.mrb[48].mxu1 }
 0x424   : > { %v5214_v19 = vpop.f32.mrb[49].mxu0  ;;  %v5244_v50 = vpop.f32.mrb[49].mxu1 }
 0x425   : > { %v7758_v2 = vadd.f32 %v5214_v19, %v5213_v48  ;;  %v7760_v1 = vadd.f32 %v5244_v50, %v5243_v62  ;;  %v5216_v45 = vpop.f32.mrb[50].mxu0  ;;  %v5246_v21 = vpop.f32.mrb[50].mxu1 }
 0x426   : > { %v5217_v36 = vpop.f32.mrb[51].mxu0  ;;  %v5247_v49 = vpop.f32.mrb[51].mxu1 }
 0x427   : > { %8719 = vst [vmem:[#allocation89_spill] sm:$0xff] %v7760_v1  ;;  %v7762_v39 = vadd.f32 %v5217_v36, %v5216_v45  ;;  %v7764_v57 = vadd.f32 %v5247_v49, %v5246_v21 }
 0x428   : > { %3816 = vmatmul.mubr.bf16.gmra.mrb[156].mxu1 %v7214_v58  ;;  %3977 = vmatmul.mubr.bf16.gmra.mrb[156].mxu0 %v7527_v23  ;;  %v8732_v58 = vld [vmem:[#allocation44_spill] sm:$0xff] }
 0x429   : > { %8720 = vst [vmem:[#allocation90_spill] sm:$0xff] %v7764_v57  ;;  %3823 = vmatprep.mubr.bf16.mxu1 %v7225_v44  ;;  %3984 = vmatprep.mubr.bf16.mxu0 %v7539_v35  ;;  %v8723_v35 = vld [vmem:[#allocation12_spill] sm:$0xff]  ;;  %v8729_v57 = vld [vmem:[#allocation81_spill] sm:$0xff] }
 0x42b   : > { %v5219_v48 = vpop.f32.mrb[52].mxu0  ;;  %v5249_v19 = vpop.f32.mrb[52].mxu1 }
 0x42c   : > { %v5220_v62 = vpop.f32.mrb[53].mxu0  ;;  %v5250_v50 = vpop.f32.mrb[53].mxu1 }
 0x42d   : > { %v7770_v31 = vadd.f32 %v5220_v62, %v5219_v48  ;;  %v7772_v16 = vadd.f32 %v5250_v50, %v5249_v19  ;;  %v5222_v45 = vpop.f32.mrb[54].mxu0  ;;  %v5252_v36 = vpop.f32.mrb[54].mxu1 }
 0x42e   : > { %v5223_v21 = vpop.f32.mrb[55].mxu0  ;;  %v5253_v49 = vpop.f32.mrb[55].mxu1 }
 0x42f   : > { %8721 = vst [vmem:[#allocation91_spill] sm:$0xff] %v7772_v16  ;;  %v7774_v46 = vadd.f32 %v5223_v21, %v5222_v45  ;;  %v7776_v59 = vadd.f32 %v5253_v49, %v5252_v36 }
 0x430   : > { %3824 = vmatmul.mubr.bf16.gmra.mrb[160].mxu1 %v7239_v17  ;;  %3985 = vmatmul.mubr.bf16.gmra.mrb[160].mxu0 %v7555_v13  ;;  %v8726_v13 = vld [vmem:[#allocation15_spill] sm:$0xff] }
 0x431   : > { %8722 = vst [vmem:[#allocation92_spill] sm:$0xff] %v7776_v59  ;;  %3831 = vmatprep.mubr.bf16.mxu1 %v8667_v56  ;;  %3992 = vmatprep.mubr.bf16.mxu0 %v8723_v35  ;;  %v8727_v56 = vld [vmem:[#allocation80_spill] sm:$0xff]  ;;  %v8728_v35 = vld [vmem:[#allocation17_spill] sm:$0xff] }
 0x433   : > { %v5225_v48 = vpop.f32.mrb[56].mxu0  ;;  %v5255_v62 = vpop.f32.mrb[56].mxu1 }
 0x434   : > { %v5226_v19 = vpop.f32.mrb[57].mxu0  ;;  %v5256_v50 = vpop.f32.mrb[57].mxu1 }
 0x435   : > { %v7782_v23 = vadd.f32 %v5226_v19, %v5225_v48  ;;  %v7784_v16 = vadd.f32 %v5256_v50, %v5255_v62  ;;  %v5228_v45 = vpop.f32.mrb[58].mxu0  ;;  %v5258_v21 = vpop.f32.mrb[58].mxu1  ;;  %v7797_v48 = vld [vmem:[%s8434_s7] ss:$0 sm:$0xff] }
 0x436   : > { %v5229_v36 = vpop.f32.mrb[59].mxu0  ;;  %v5259_v49 = vpop.f32.mrb[59].mxu1  ;;  %v3274_v22 = vadd.f32 %v8732_v58, %v7797_v48 }
 0x437   : > { %8724 = vst [vmem:[#allocation93_spill] sm:$0xff] %v7784_v16  ;;  %v7786_v59 = vadd.f32 %v5229_v36, %v5228_v45  ;;  %v7788_v17 = vadd.f32 %v5259_v49, %v5258_v21  ;;  %v8730_v36 = vld [vmem:[#allocation21_spill] sm:$0xff]  ;;  %v8731_v49 = vld [vmem:[#allocation43_spill] sm:$0xff] }
 0x438   : > { %3832 = vmatmul.mubr.bf16.gmra.mrb[164].mxu1 %v8726_v13  ;;  %3993 = vmatmul.mubr.bf16.gmra.mrb[164].mxu0 %v8727_v56  ;;  %v1307_v21 = vshrl.u32 %v8730_v36, 16 }
 0x439   : > { %8725 = vst [vmem:[#allocation94_spill] sm:$0xff] %v7788_v17  ;;  %3839 = vmatprep.mubr.bf16.mxu1 %v8728_v35  ;;  %4000 = vmatprep.mubr.bf16.mxu0 %v8729_v57  ;;  %v3271_v17 = vadd.f32 %v8731_v49, %v7797_v48  ;;  %v1310_v49 = vshll.u32 %v8730_v36, 16 }
 0x43a   : > { %v1309_v55 = vrot.slane %v1307_v21, 7  ;;  %v3279_v21 = vadd.f32 %v7694_v7, %v7797_v48 }
 0x43b   : > { %v5277_v62 = vpop.f32.mrb[60].mxu1  ;;  %v5389_v19 = vpop.f32.mrb[60].mxu0 }
 0x43c   : > { %v5278_v50 = vpop.f32.mrb[61].mxu1  ;;  %v5390_v45 = vpop.f32.mrb[61].mxu0 }
 0x43d   : > { %v5279_v16 = vadd.f32 %v5278_v50, %v5277_v62  ;;  %v5391_v56 = vadd.f32 %v5390_v45, %v5389_v19  ;;  %v5280_v13 = vpop.f32.mrb[62].mxu1  ;;  %v5392_v35 = vpop.f32.mrb[62].mxu0  ;;  %v8736_v50 = vld [vmem:[#allocation24_spill] sm:$0xff]  ;;  %v8737_v45 = vld [vmem:[#allocation82_spill] sm:$0xff] }
 0x43e   : > { %v5281_v57 = vpop.f32.mrb[63].mxu1  ;;  %v5393_v1 = vpop.f32.mrb[63].mxu0 }
 0x43f   : > { %v3432_v44 = vadd.f32 %v5279_v16, %v3271_v17  ;;  %v5282_v27 = vadd.f32 %v5281_v57, %v5280_v13  ;;  %v5394_v5 = vadd.f32 %v5393_v1, %v5392_v35  ;;  %v6504_v17 = vld [vmem:[%s6742_s26 + $0x78] sm:$0xff]   ;;  %v1312_v57 = vor.u32 %v1310_v49, %v1309_v55  ;;  %s311_s26 = sand.u32 1, %s6591_s28  }
 0x440   : > { %3840 = vmatmul.mubr.bf16.gmra.mrb[168].mxu1 %v8733_v11  ;;  %4001 = vmatmul.mubr.bf16.gmra.mrb[168].mxu0 %v8734_v38  ;;  %v1300_v16 = vshrl.u32 %v6504_v17, 16  ;;  %v1303_v38 = vshll.u32 %v6504_v17, 16  ;;  %v8739_v11 = vld [vmem:[#allocation27_spill] sm:$0xff]  ;;  %s4843_s21 = sshll.u32 %s311_s26, 8  ;;  %s8386_s19 = scalar_lea.sflag [#allocation4], %s311_s26 }
 0x441   : > { %v7807_v62 = vadd.f32 %v5391_v56, %v3432_v44  ;;  %v3435_v19 = vadd.f32 %v5282_v27, %v3274_v22  ;;  %3847 = vmatprep.mubr.bf16.mxu1 %v8736_v50  ;;  %4008 = vmatprep.mubr.bf16.mxu0 %v8737_v45  ;;  %v7826_v17 = vsel %vm6948_vm5, 0, %v1312_v57  ;;  %v7835_v57 = vsel %vm6948_vm5, %v1309_v55, 0  ;;  %s8311_s22 = scalar_lea.vmem [#allocation5], %s4843_s21 }
 0x442   : > { %v1302_v27 = vrot.slane %v1300_v16, 7  ;;  %8741 = vst [vmem:[#allocation44_spill] sm:$0xff] %v7835_v57  ;;  %s4763_s24 = sshll.u32 %s8311_s22, 4  ;;  %s8380_s24 = int_to_ptr.vmem [resolvable:$true] %s4763_s24 }
 0x443   : > { %8735 = vst [vmem:[#allocation21_spill] sm:$0xff] %v7807_v62  ;;  %v7812_v51 = vadd.f32 %v5394_v5, %v3435_v19  ;;  %v5283_v58 = vpop.f32.mrb[64].mxu1  ;;  %v5395_v1 = vpop.f32.mrb[64].mxu0  ;;  %v3282_v5 = vadd.f32 %v7696_v41, %v7797_v48  ;;  %s6533_s9 = scalar_lea.vmem %s8380_s24, 4096  ;;  %p6540_p2 = scmp.lt.s32.totalorder %s8380_s24, %s6538_s12 }
 0x444   : > { %v5284_v35 = vpop.f32.mrb[65].mxu1  ;;  %v5396_v13 = vpop.f32.mrb[65].mxu0  ;;  %v1305_v16 = vor.u32 %v1303_v38, %v1302_v27  ;;  %p6534_p6 = scmp.ne.s32.totalorder %s8380_s24, %s6533_s9  ;;  %p6541_p3 = scmp.lt.s32.totalorder %s6539_s13, %s6533_s9 }
 0x445   : > { %8738 = vst [vmem:[#allocation43_spill] sm:$0xff] %v7812_v51  ;;  %v5285_v36 = vadd.f32 %v5284_v35, %v5283_v58  ;;  %v5397_v44 = vadd.f32 %v5396_v13, %v5395_v1  ;;  %v5286_v56 = vpop.f32.mrb[66].mxu1  ;;  %v5398_v22 = vpop.f32.mrb[66].mxu0  ;;  %v8740_v58 = vld [vmem:[#allocation83_spill] sm:$0xff]  ;;  %v2054_v13 = vshll.u32 %v7826_v17, 16 }
 0x446   : > { %v5287_v62 = vpop.f32.mrb[67].mxu1  ;;  %v5399_v45 = vpop.f32.mrb[67].mxu0  ;;  %p6535_p10 = pnand %p6534_p6, %p8859_p9  ;;  %p6542_p4 = por %p6541_p3, %p6540_p2 }
 0x447   : > { %v3440_v50 = vadd.f32 %v5285_v36, %v3279_v21  ;;  %v5288_v19 = vadd.f32 %v5287_v62, %v5286_v56  ;;  %v5400_v51 = vadd.f32 %v5399_v45, %v5398_v22  ;;  %v7839_v22 = vsel %vm6948_vm5, 0, %v1305_v16 }
 0x448   : > { %3848 = vmatmul.mubr.bf16.gmra.mrb[172].mxu1 %v8739_v11  ;;  %4009 = vmatmul.mubr.bf16.gmra.mrb[172].mxu0 %v7640_v52  ;;  %v2056_v55 = vrot.slane %v2054_v13, 1  ;;  %v2042_v16 = vshll.u32 %v7839_v22, 16  ;;  %p6536_p12 = pneg %p6535_p10 }
 0x449   : > { %v7820_v49 = vadd.f32 %v5397_v44, %v3440_v50  ;;  %v3443_v7 = vadd.f32 %v5288_v19, %v3282_v5  ;;  %3855 = vmatprep.mubr.bf16.mxu1 %v8691_v6  ;;  %4016 = vmatprep.mubr.bf16.mxu0 %v8740_v58  ;;  %v3287_v50 = vadd.f32 %v7702_v4, %v7797_v48 }
 0x44a   : > { %v3290_v19 = vadd.f32 %v7704_v30, %v7797_v48  ;;  %v7853_v30 = vsel %vm6948_vm5, %v1302_v27, 0  ;;  %p6543_p7 = pnand %p6542_p4, %p6536_p12 }
 0x44b   : > { %v7828_v1 = vadd.f32 %v5400_v51, %v3443_v7  ;;  %v5289_v41 = vpop.f32.mrb[68].mxu1  ;;  %v5401_v62 = vpop.f32.mrb[68].mxu0 }
 0x44c   : > { %v5290_v45 = vpop.f32.mrb[69].mxu1  ;;  %v5402_v35 = vpop.f32.mrb[69].mxu0 }
 0x44d   : > { %v5291_v21 = vadd.f32 %v5290_v45, %v5289_v41  ;;  %v5403_v36 = vadd.f32 %v5402_v35, %v5401_v62  ;;  %v5292_v44 = vpop.f32.mrb[70].mxu1  ;;  %v5404_v56 = vpop.f32.mrb[70].mxu0  ;;  %v8742_v41 = vld [vmem:[#allocation34_spill] sm:$0xff]  ;;  %v2052_v62 = vshrl.u32 %v7826_v17, 16  ;;  %v2059_v45 = vshll.u32 %v7835_v57, 16 }
 0x44e   : > { %v5293_v38 = vpop.f32.mrb[71].mxu1  ;;  %v5405_v51 = vpop.f32.mrb[71].mxu0  ;;  %v3298_v57 = vadd.f32 %v7712_v12, %v7797_v48 }
 0x44f   : > { %v3448_v5 = vadd.f32 %v5291_v21, %v3287_v50  ;;  %v5294_v7 = vadd.f32 %v5293_v38, %v5292_v44  ;;  %v5406_v4 = vadd.f32 %v5405_v51, %v5404_v56  ;;  %v2057_v38 = vor.u32 %v2056_v55, %v2052_v62 }
 0x450   : > { %3856 = vmatmul.mubr.bf16.gmra.mrb[176].mxu1 %v8742_v41  ;;  %4017 = vmatmul.mubr.bf16.gmra.mrb[176].mxu0 %v7666_v37  ;;  %v2040_v51 = vshrl.u32 %v7839_v22, 16  ;;  %v2044_v37 = vrot.slane %v2042_v16, 1 }
 0x451   : > { %v7847_v35 = vadd.f32 %v5403_v36, %v3448_v5  ;;  %v3451_v58 = vadd.f32 %v5294_v7, %v3290_v19  ;;  %3863 = vmatprep.mubr.bf16.mxu1 %v8699_v34  ;;  %4024 = vmatprep.mubr.bf16.mxu0 %v7672_v53  ;;  %v2061_v36 = vrot.slane %v2059_v45, 1  ;;  %v2047_v5 = vshll.u32 %v7853_v30, 16 }
 0x452   : > { %v3295_v19 = vadd.f32 %v7710_v8, %v7797_v48  ;;  %v2045_v16 = vor.u32 %v2044_v37, %v2040_v51  ;;  %v3306_v51 = vadd.f32 %v7720_v60, %v7797_v48  ;;  %v3311_v60 = vadd.f32 %v7726_v15, %v7797_v48 }
 0x453   : > { %v7856_v50 = vadd.f32 %v5406_v4, %v3451_v58  ;;  %v5295_v21 = vpop.f32.mrb[72].mxu1  ;;  %v5407_v44 = vpop.f32.mrb[72].mxu0  ;;  %v7867_v45 = vsel %vm1448_vm6, %v2057_v38, %v2061_v36 }
 0x454   : > { %v5296_v13 = vpop.f32.mrb[73].mxu1  ;;  %v5408_v56 = vpop.f32.mrb[73].mxu0  ;;  %8743 = vst [vmem:[#allocation27_spill] sm:$0xff] %v7867_v45 }
 0x455   : > { %v5297_v20 = vadd.f32 %v5296_v13, %v5295_v21  ;;  %v5409_v27 = vadd.f32 %v5408_v56, %v5407_v44  ;;  %v5298_v7 = vpop.f32.mrb[74].mxu1  ;;  %v5410_v53 = vpop.f32.mrb[74].mxu0  ;;  %v2049_v44 = vrot.slane %v2047_v5, 1 }
 0x456   : > { %v5299_v58 = vpop.f32.mrb[75].mxu1  ;;  %v5411_v4 = vpop.f32.mrb[75].mxu0 }
 0x457   : > { %v3456_v52 = vadd.f32 %v5297_v20, %v3295_v19  ;;  %v5300_v62 = vadd.f32 %v5299_v58, %v5298_v7  ;;  %v5412_v55 = vadd.f32 %v5411_v4, %v5410_v53  ;;  %v3303_v20 = vadd.f32 %v7718_v3, %v7797_v48 }
 0x458   : > { %3864 = vmatmul.mubr.bf16.gmra.mrb[180].mxu1 %v8704_v9  ;;  %4025 = vmatmul.mubr.bf16.gmra.mrb[180].mxu0 %v7681_v25 }
 0x459   : > { %v7869_v8 = vadd.f32 %v5409_v27, %v3456_v52  ;;  %v3459_v21 = vadd.f32 %v5300_v62, %v3298_v57  ;;  %3871 = vmatprep.mubr.bf16.mxu1 %v7826_v17  ;;  %4032 = vmatprep.mubr.bf16.mxu0 %v7867_v45  ;;  %v7878_v57 = vsel %vm1448_vm6, %v2045_v16, %v2049_v44  ;;  %v8769_v45 = vld [vmem:[#allocation33_spill] sm:$0xff] }
 0x45a   : > { %8744 = vst [vmem:[#allocation34_spill] sm:$0xff] %v7878_v57 }
 0x45b   : > { %v7873_v13 = vadd.f32 %v5412_v55, %v3459_v21  ;;  %v5301_v12 = vpop.f32.mrb[76].mxu1  ;;  %v5413_v53 = vpop.f32.mrb[76].mxu0  ;;  %v8745_v55 = vld [vmem:[#allocation42_spill] sm:$0xff] }
 0x45c   : > { %v5302_v56 = vpop.f32.mrb[77].mxu1  ;;  %v5414_v19 = vpop.f32.mrb[77].mxu0 }
 0x45d   : > { %v5303_v38 = vadd.f32 %v5302_v56, %v5301_v12  ;;  %v5415_v36 = vadd.f32 %v5414_v19, %v5413_v53  ;;  %v5304_v52 = vpop.f32.mrb[78].mxu1  ;;  %v5416_v27 = vpop.f32.mrb[78].mxu0 }
 0x45e   : > { %v5305_v7 = vpop.f32.mrb[79].mxu1  ;;  %v5417_v58 = vpop.f32.mrb[79].mxu0 }
 0x45f   : > { %v3464_v37 = vadd.f32 %v5303_v38, %v3303_v20  ;;  %v5306_v5 = vadd.f32 %v5305_v7, %v5304_v52  ;;  %v5418_v4 = vadd.f32 %v5417_v58, %v5416_v27  ;;  %v6458_v27 = vld [vmem:[#allocation2 + $0x380] sm:$0xff]  }
 0x460   : > { %3872 = vmatmul.mubr.bf16.gmra.mrb[184].mxu1 %v7839_v22  ;;  %4033 = vmatmul.mubr.bf16.gmra.mrb[184].mxu0 %v7878_v57  ;;  %v6460_v7 = vld [vmem:[#allocation2 + $0x400] sm:$0xff]  }
 0x461   : > { %v7884_v3 = vadd.f32 %v5415_v36, %v3464_v37  ;;  %v3467_v62 = vadd.f32 %v5306_v5, %v3306_v51  ;;  %4073 = vmatprep.mubr.bf16.mxu1 %v8745_v55  ;;  %4234 = vmatprep.mubr.bf16.mxu0 %v6984_v0  ;;  %v3314_v0 = vadd.f32 %v7728_v18, %v7797_v48  ;;  %v6461_v5 = vld [vmem:[#allocation2 + $0x3c8] sm:$0xff]  }
 0x463   : > { %v7888_v21 = vadd.f32 %v5418_v4, %v3467_v62  ;;  %v5307_v16 = vpop.f32.mrb[80].mxu1  ;;  %v5419_v44 = vpop.f32.mrb[80].mxu0  ;;  %v6463_v4 = vld [vmem:[#allocation2 + $0x448] sm:$0xff]  }
 0x464   : > { %v5308_v12 = vpop.f32.mrb[81].mxu1  ;;  %v5420_v53 = vpop.f32.mrb[81].mxu0  ;;  %v8746_v62 = vld [vmem:[#allocation45_spill] sm:$0xff] }
 0x465   : > { %v5309_v56 = vadd.f32 %v5308_v12, %v5307_v16  ;;  %v5421_v19 = vadd.f32 %v5420_v53, %v5419_v44  ;;  %v5310_v20 = vpop.f32.mrb[82].mxu1  ;;  %v5422_v38 = vpop.f32.mrb[82].mxu0  ;;  %v8747_v16 = vld [vmem:[#allocation47_spill] sm:$0xff]  ;;  %v6462_v44 = vld [vmem:[#allocation2 + $0x388] sm:$0xff]  }
 0x466   : > { %v5311_v36 = vpop.f32.mrb[83].mxu1  ;;  %v5423_v52 = vpop.f32.mrb[83].mxu0  ;;  %v6464_v12 = vld [vmem:[#allocation2 + $0x408] sm:$0xff]  }
 0x467   : > { %v3472_v58 = vadd.f32 %v5309_v56, %v3311_v60  ;;  %v5312_v37 = vadd.f32 %v5311_v36, %v5310_v20  ;;  %v5424_v51 = vadd.f32 %v5423_v52, %v5422_v38  ;;  %v6465_v56 = vld [vmem:[#allocation2 + $0x3d0] sm:$0xff]   ;;  %v3319_v38 = vadd.f32 %v7734_v32, %v7797_v48  ;;  %v6471_v32 = vld [vmem:[#allocation2 + $0x458] sm:$0xff]  }
 0x468   : > { %4074 = vmatmul.mubr.bf16.vlgmr.msra.gmra.mrb[188].mxu1 %v8746_v62  ;;  %4235 = vmatmul.mubr.bf16.vlgmr.msra.gmra.mrb[188].mxu0 %v6996_v26  ;;  %v6467_v20 = vld [vmem:[#allocation2 + $0x450] sm:$0xff]  }
 0x469   : > { %v7896_v15 = vadd.f32 %v5421_v19, %v3472_v58  ;;  %v3475_v55 = vadd.f32 %v5312_v37, %v3314_v0  ;;  %4081 = vmatprep.mubr.bf16.mxu1 %v8747_v16  ;;  %4242 = vmatprep.mubr.bf16.mxu0 %v7003_v29  ;;  %v6466_v37 = vld [vmem:[#allocation2 + $0x390] sm:$0xff]  }
 0x46a   : > { %5934 = vmatpush3.bf16.msra.mxu1 %v6458_v27  ;;  %6046 = vmatpush3.bf16.msra.mxu0 %v6460_v7  ;;  %v3322_v7 = vadd.f32 %v7738_v28, %v7797_v48 }
 0x46b   : > { %v7900_v18 = vadd.f32 %v5424_v51, %v3475_v55  ;;  %v5313_v53 = vpop.f32.mrb[84].mxu1  ;;  %v5425_v60 = vpop.f32.mrb[84].mxu0  ;;  %5935 = vmatprep.subr.bf16.mxu1 %v6461_v5  ;;  %6047 = vmatprep.subr.bf16.mxu0 %v6463_v4  ;;  %v6468_v51 = vld [vmem:[#allocation2 + $0x410] sm:$0xff]   ;;  %v6469_v55 = vld [vmem:[#allocation2 + $0x3d8] sm:$0xff]  }
 0x46c   : > { %v5314_v26 = vpop.f32.mrb[85].mxu1  ;;  %v5426_v19 = vpop.f32.mrb[85].mxu0 }
 0x46d   : > { %v5315_v36 = vadd.f32 %v5314_v26, %v5313_v53  ;;  %v5427_v52 = vadd.f32 %v5426_v19, %v5425_v60  ;;  %v5316_v29 = vpop.f32.mrb[86].mxu1  ;;  %v5428_v27 = vpop.f32.mrb[86].mxu0  ;;  %v8748_v53 = vld [vmem:[#allocation49_spill] sm:$0xff]  ;;  %v8749_v26 = vld [vmem:[#allocation51_spill] sm:$0xff] }
 0x46e   : > { %v5317_v58 = vpop.f32.mrb[87].mxu1  ;;  %v5429_v0 = vpop.f32.mrb[87].mxu0  ;;  %5936 = vmatpush3.bf16.msra.mxu1 %v6462_v44  ;;  %6048 = vmatpush3.bf16.msra.mxu0 %v6464_v12  ;;  %v6470_v44 = vld [vmem:[#allocation2 + $0x398] sm:$0xff]  }
 0x46f   : > { %v3480_v5 = vadd.f32 %v5315_v36, %v3319_v38  ;;  %v5318_v4 = vadd.f32 %v5317_v58, %v5316_v29  ;;  %v5430_v62 = vadd.f32 %v5429_v0, %v5428_v27  ;;  %5937 = vmatprep.subr.bf16.mxu1 %v6465_v56  ;;  %6049 = vmatprep.subr.bf16.mxu0 %v6467_v20  ;;  %v6472_v12 = vld [vmem:[#allocation2 + $0x418] sm:$0xff]   ;;  %v6473_v38 = vld [vmem:[#allocation2 + $0x3e0] sm:$0xff]  }
 0x470   : > { %4082 = vmatmul.mubr.bf16.gmra.mrb[192].mxu1 %v8748_v53  ;;  %4243 = vmatmul.mubr.bf16.gmra.mrb[192].mxu0 %v7015_v43  ;;  %v6475_v36 = vld [vmem:[#allocation2 + $0x460] sm:$0xff]   ;;  %v3327_v29 = vadd.f32 %v7746_v61, %v7797_v48  ;;  %v3330_v0 = vadd.f32 %v7750_v54, %v7797_v48  ;;  %v6479_v61 = vld [vmem:[#allocation2 + $0x468] sm:$0xff]  }
 0x471   : > { %v7908_v60 = vadd.f32 %v5427_v52, %v3480_v5  ;;  %v3483_v28 = vadd.f32 %v5318_v4, %v3322_v7  ;;  %4089 = vmatprep.mubr.bf16.mxu1 %v8749_v26  ;;  %4250 = vmatprep.mubr.bf16.mxu0 %v7024_v47  ;;  %v6474_v5 = vld [vmem:[#allocation2 + $0x3a0] sm:$0xff]  }
 0x472   : > { %5938 = vmatpush3.bf16.msra.mxu1 %v6466_v37  ;;  %6050 = vmatpush3.bf16.msra.mxu0 %v6468_v51  ;;  %v6476_v4 = vld [vmem:[#allocation2 + $0x420] sm:$0xff]  }
 0x473   : > { %v7912_v19 = vadd.f32 %v5430_v62, %v3483_v28  ;;  %v5319_v56 = vpop.f32.mrb[88].mxu1  ;;  %v5431_v20 = vpop.f32.mrb[88].mxu0  ;;  %5939 = vmatprep.subr.bf16.mxu1 %v6469_v55  ;;  %6051 = vmatprep.subr.bf16.mxu0 %v6471_v32  ;;  %v6477_v28 = vld [vmem:[#allocation2 + $0x3e8] sm:$0xff]  }
 0x474   : > { %v5320_v43 = vpop.f32.mrb[89].mxu1  ;;  %v5432_v52 = vpop.f32.mrb[89].mxu0 }
 0x475   : > { %v5321_v27 = vadd.f32 %v5320_v43, %v5319_v56  ;;  %v5433_v7 = vadd.f32 %v5432_v52, %v5431_v20  ;;  %v5322_v47 = vpop.f32.mrb[90].mxu1  ;;  %v5434_v58 = vpop.f32.mrb[90].mxu0  ;;  %v8750_v56 = vld [vmem:[#allocation53_spill] sm:$0xff]  ;;  %v8751_v43 = vld [vmem:[#allocation55_spill] sm:$0xff] }
 0x476   : > { %v5323_v37 = vpop.f32.mrb[91].mxu1  ;;  %v5435_v51 = vpop.f32.mrb[91].mxu0  ;;  %5940 = vmatpush3.bf16.msra.mxu1 %v6470_v44  ;;  %6052 = vmatpush3.bf16.msra.mxu0 %v6472_v12  ;;  %v6478_v44 = vld [vmem:[#allocation2 + $0x3a8] sm:$0xff]  }
 0x477   : > { %v3488_v62 = vadd.f32 %v5321_v27, %v3327_v29  ;;  %v5324_v55 = vadd.f32 %v5323_v37, %v5322_v47  ;;  %v5436_v32 = vadd.f32 %v5435_v51, %v5434_v58  ;;  %5941 = vmatprep.subr.bf16.mxu1 %v6473_v38  ;;  %6053 = vmatprep.subr.bf16.mxu0 %v6475_v36  ;;  %v6480_v12 = vld [vmem:[#allocation2 + $0x428] sm:$0xff]   ;;  %v6481_v29 = vld [vmem:[#allocation2 + $0x3f0] sm:$0xff]  }
 0x478   : > { %4090 = vmatmul.mubr.bf16.gmra.mrb[196].mxu1 %v8750_v56  ;;  %4251 = vmatmul.mubr.bf16.gmra.mrb[196].mxu0 %v7036_v14  ;;  %v6483_v27 = vld [vmem:[#allocation2 + $0x470] sm:$0xff]   ;;  %v3335_v47 = vadd.f32 %v7758_v2, %v7797_v48  ;;  %v3338_v51 = vadd.f32 %v7762_v39, %v7797_v48  ;;  %v6487_v2 = vld [vmem:[#allocation2 + $0x478] sm:$0xff]  }
 0x479   : > { %v7920_v20 = vadd.f32 %v5433_v7, %v3488_v62  ;;  %v3491_v54 = vadd.f32 %v5324_v55, %v3330_v0  ;;  %4097 = vmatprep.mubr.bf16.mxu1 %v8751_v43  ;;  %4258 = vmatprep.mubr.bf16.mxu0 %v7046_v63  ;;  %v6482_v62 = vld [vmem:[#allocation2 + $0x3b0] sm:$0xff]  }
 0x47a   : > { %5942 = vmatpush3.bf16.msra.mxu1 %v6474_v5  ;;  %6054 = vmatpush3.bf16.msra.mxu0 %v6476_v4  ;;  %v6484_v55 = vld [vmem:[#allocation2 + $0x430] sm:$0xff]  }
 0x47b   : > { %v7924_v52 = vadd.f32 %v5436_v32, %v3491_v54  ;;  %v5325_v38 = vpop.f32.mrb[92].mxu1  ;;  %v5437_v36 = vpop.f32.mrb[92].mxu0  ;;  %5943 = vmatprep.subr.bf16.mxu1 %v6477_v28  ;;  %6055 = vmatprep.subr.bf16.mxu0 %v6479_v61  ;;  %v6485_v54 = vld [vmem:[#allocation2 + $0x3f8] sm:$0xff]  }
 0x47c   : > { %v5326_v14 = vpop.f32.mrb[93].mxu1  ;;  %v5438_v7 = vpop.f32.mrb[93].mxu0 }
 0x47d   : > { %v5327_v58 = vadd.f32 %v5326_v14, %v5325_v38  ;;  %v5439_v0 = vadd.f32 %v5438_v7, %v5437_v36  ;;  %v5328_v63 = vpop.f32.mrb[94].mxu1  ;;  %v5440_v37 = vpop.f32.mrb[94].mxu0  ;;  %v8752_v38 = vld [vmem:[#allocation57_spill] sm:$0xff]  ;;  %v8753_v14 = vld [vmem:[#allocation59_spill] sm:$0xff] }
 0x47e   : > { %v5329_v5 = vpop.f32.mrb[95].mxu1  ;;  %v5441_v4 = vpop.f32.mrb[95].mxu0  ;;  %5944 = vmatpush3.bf16.msra.mxu1 %v6478_v44  ;;  %6056 = vmatpush3.bf16.msra.mxu0 %v6480_v12  ;;  %v6486_v44 = vld [vmem:[#allocation2 + $0x3b8] sm:$0xff]  }
 0x47f   : > { %v3496_v32 = vadd.f32 %v5327_v58, %v3335_v47  ;;  %v5330_v28 = vadd.f32 %v5329_v5, %v5328_v63  ;;  %v5442_v61 = vadd.f32 %v5441_v4, %v5440_v37  ;;  %5945 = vmatprep.subr.bf16.mxu1 %v6481_v29  ;;  %6057 = vmatprep.subr.bf16.mxu0 %v6483_v27  ;;  %v6488_v12 = vld [vmem:[#allocation2 + $0x438] sm:$0xff]  }
 0x480   : > { %4098 = vmatmul.mubr.bf16.gmra.mrb[200].mxu1 %v8752_v38  ;;  %4259 = vmatmul.mubr.bf16.gmra.mrb[200].mxu0 %v7059_v33  ;;  %v3343_v33 = vadd.f32 %v7770_v31, %v7797_v48 }
 0x481   : > { %v7932_v36 = vadd.f32 %v5439_v0, %v3496_v32  ;;  %v3499_v39 = vadd.f32 %v5330_v28, %v3338_v51  ;;  %4105 = vmatprep.mubr.bf16.mxu1 %v8753_v14  ;;  %4266 = vmatprep.mubr.bf16.mxu0 %v7067_v40  ;;  %v8754_v28 = vld [vmem:[#allocation61_spill] sm:$0xff] }
 0x482   : > { %5946 = vmatpush3.bf16.msra.mxu1 %v6482_v62  ;;  %6058 = vmatpush3.bf16.msra.mxu0 %v6484_v55  ;;  %v3346_v62 = vadd.f32 %v7774_v46, %v7797_v48  ;;  %v3351_v46 = vadd.f32 %v7782_v23, %v7797_v48  ;;  %v8757_v23 = vld [vmem:[#allocation67_spill] sm:$0xff] }
 0x483   : > { %v7936_v7 = vadd.f32 %v5442_v61, %v3499_v39  ;;  %v5331_v29 = vpop.f32.mrb[96].mxu1  ;;  %v5443_v27 = vpop.f32.mrb[96].mxu0  ;;  %5947 = vmatprep.subr.bf16.mxu1 %v6485_v54  ;;  %6059 = vmatprep.subr.bf16.mxu0 %v6487_v2  ;;  %v8755_v54 = vld [vmem:[#allocation63_spill] sm:$0xff] }
 0x484   : > { %v5332_v47 = vpop.f32.mrb[97].mxu1  ;;  %v5444_v58 = vpop.f32.mrb[97].mxu0 }
 0x485   : > { %v5333_v0 = vadd.f32 %v5332_v47, %v5331_v29  ;;  %v5445_v63 = vadd.f32 %v5444_v58, %v5443_v27  ;;  %v5334_v37 = vpop.f32.mrb[98].mxu1  ;;  %v5446_v51 = vpop.f32.mrb[98].mxu0 }
 0x486   : > { %v5335_v40 = vpop.f32.mrb[99].mxu1  ;;  %v5447_v5 = vpop.f32.mrb[99].mxu0  ;;  %5948 = vmatpush3.bf16.msra.mxu1 %v6486_v44  ;;  %6060 = vmatpush3.bf16.msra.mxu0 %v6488_v12 }
 0x487   : > { %v3504_v4 = vadd.f32 %v5333_v0, %v3343_v33  ;;  %v5336_v55 = vadd.f32 %v5335_v40, %v5334_v37  ;;  %v5448_v32 = vadd.f32 %v5447_v5, %v5446_v51  ;;  %v3354_v37 = vadd.f32 %v7786_v59, %v7797_v48  ;;  %v8756_v40 = vld [vmem:[#allocation65_spill] sm:$0xff]  ;;  %v8759_v59 = vld [vmem:[#allocation10_spill] sm:$0xff] }
 0x488   : > { %4106 = vmatmul.mubr.bf16.gmra.mrb[204].mxu1 %v8754_v28  ;;  %4267 = vmatmul.mubr.bf16.gmra.mrb[204].mxu0 %v7090_v10 }
 0x489   : > { %v7944_v61 = vadd.f32 %v5445_v63, %v3504_v4  ;;  %v3507_v31 = vadd.f32 %v5336_v55, %v3346_v62  ;;  %4113 = vmatprep.mubr.bf16.mxu1 %v8755_v54  ;;  %4274 = vmatprep.mubr.bf16.mxu0 %v7108_v42  ;;  %v8758_v62 = vld [vmem:[#allocation22_spill] sm:$0xff] }
 0x48b   : > { %v7948_v2 = vadd.f32 %v5448_v32, %v3507_v31  ;;  %v5337_v39 = vpop.f32.mrb[100].mxu1  ;;  %v5449_v44 = vpop.f32.mrb[100].mxu0 }
 0x48c   : > { %v5338_v12 = vpop.f32.mrb[101].mxu1  ;;  %v5450_v29 = vpop.f32.mrb[101].mxu0 }
 0x48d   : > { %v5339_v27 = vadd.f32 %v5338_v12, %v5337_v39  ;;  %v5451_v47 = vadd.f32 %v5450_v29, %v5449_v44  ;;  %v5340_v58 = vpop.f32.mrb[102].mxu1  ;;  %v5452_v10 = vpop.f32.mrb[102].mxu0  ;;  %v3359_v12 = vadd.f32 %v8759_v59, %v7797_v48  ;;  %v8763_v59 = vld [vmem:[#allocation70_spill] sm:$0xff] }
 0x48e   : > { %v5341_v33 = vpop.f32.mrb[103].mxu1  ;;  %v5453_v0 = vpop.f32.mrb[103].mxu0 }
 0x48f   : > { %v3512_v63 = vadd.f32 %v5339_v27, %v3351_v46  ;;  %v5342_v42 = vadd.f32 %v5341_v33, %v5340_v58  ;;  %v5454_v51 = vadd.f32 %v5453_v0, %v5452_v10  ;;  %v8760_v33 = vld [vmem:[#allocation41_spill] sm:$0xff] }
 0x490   : > { %4114 = vmatmul.mubr.bf16.gmra.mrb[208].mxu1 %v8756_v40  ;;  %4275 = vmatmul.mubr.bf16.gmra.mrb[208].mxu0 %v7132_v24  ;;  %v3362_v0 = vadd.f32 %v8760_v33, %v7797_v48 }
 0x491   : > { %v7956_v5 = vadd.f32 %v5451_v47, %v3512_v63  ;;  %v3515_v4 = vadd.f32 %v5342_v42, %v3354_v37  ;;  %4121 = vmatprep.mubr.bf16.mxu1 %v8757_v23  ;;  %4282 = vmatprep.mubr.bf16.mxu0 %v8758_v62  ;;  %v8761_v42 = vld [vmem:[#allocation69_spill] sm:$0xff] }
 0x493   : > { %v7960_v55 = vadd.f32 %v5454_v51, %v3515_v4  ;;  %v5343_v32 = vpop.f32.mrb[104].mxu1  ;;  %v5455_v31 = vpop.f32.mrb[104].mxu0  ;;  %v8762_v51 = vld [vmem:[#allocation26_spill] sm:$0xff] }
 0x494   : > { %v5344_v39 = vpop.f32.mrb[105].mxu1  ;;  %v5456_v44 = vpop.f32.mrb[105].mxu0 }
 0x495   : > { %v5345_v29 = vadd.f32 %v5344_v39, %v5343_v32  ;;  %v5457_v46 = vadd.f32 %v5456_v44, %v5455_v31  ;;  %v5346_v27 = vpop.f32.mrb[106].mxu1  ;;  %v5458_v24 = vpop.f32.mrb[106].mxu0  ;;  %v8764_v32 = vld [vmem:[#allocation29_spill] sm:$0xff] }
 0x496   : > { %v5347_v47 = vpop.f32.mrb[107].mxu1  ;;  %v5459_v58 = vpop.f32.mrb[107].mxu0 }
 0x497   : > { %v3520_v10 = vadd.f32 %v5345_v29, %v3359_v12  ;;  %v5348_v63 = vadd.f32 %v5347_v47, %v5346_v27  ;;  %v5460_v37 = vadd.f32 %v5459_v58, %v5458_v24  ;;  %v8766_v27 = vld [vmem:[#allocation9_spill] sm:$0xff] }
 0x498   : > { %4122 = vmatmul.mubr.bf16.gmra.mrb[212].mxu1 %v8761_v42  ;;  %4283 = vmatmul.mubr.bf16.gmra.mrb[212].mxu0 %v8762_v51  ;;  %v3367_v24 = vadd.f32 %v8766_v27, %v7797_v48  ;;  %v8771_v27 = vld [vmem:[#allocation74_spill] sm:$0xff] }
 0x499   : > { %v7968_v4 = vadd.f32 %v5457_v46, %v3520_v10  ;;  %v3523_v62 = vadd.f32 %v5348_v63, %v3362_v0  ;;  %4129 = vmatprep.mubr.bf16.mxu1 %v8763_v59  ;;  %4290 = vmatprep.mubr.bf16.mxu0 %v8764_v32  ;;  %v8767_v63 = vld [vmem:[#allocation88_spill] sm:$0xff] }
 0x49a   : > { %v3370_v57 = vadd.f32 %v8767_v63, %v7797_v48 }
 0x49b   : > { %v7972_v31 = vadd.f32 %v5460_v37, %v3523_v62  ;;  %v5349_v39 = vpop.f32.mrb[108].mxu1  ;;  %v5461_v44 = vpop.f32.mrb[108].mxu0  ;;  %v8768_v62 = vld [vmem:[#allocation72_spill] sm:$0xff] }
 0x49c   : > { %v5350_v12 = vpop.f32.mrb[109].mxu1  ;;  %v5462_v29 = vpop.f32.mrb[109].mxu0 }
 0x49d   : > { %8765 = vst [vmem:[#allocation42_spill] sm:$0xff] %v7972_v31  ;;  %v5351_v47 = vadd.f32 %v5350_v12, %v5349_v39  ;;  %v5463_v58 = vadd.f32 %v5462_v29, %v5461_v44  ;;  %v5352_v33 = vpop.f32.mrb[110].mxu1  ;;  %v5464_v51 = vpop.f32.mrb[110].mxu0  ;;  %v8772_v39 = vld [vmem:[#allocation35_spill] sm:$0xff] }
 0x49e   : > { %v5353_v46 = vpop.f32.mrb[111].mxu1  ;;  %v5465_v10 = vpop.f32.mrb[111].mxu0 }
 0x49f   : > { %v3528_v0 = vadd.f32 %v5351_v47, %v3367_v24  ;;  %v5354_v32 = vadd.f32 %v5353_v46, %v5352_v33  ;;  %v5466_v37 = vadd.f32 %v5465_v10, %v5464_v51  ;;  %v8774_v33 = vld [vmem:[#allocation89_spill] sm:$0xff] }
 0x4a0   : > { %4130 = vmatmul.mubr.bf16.gmra.mrb[216].mxu1 %v8768_v62  ;;  %4291 = vmatmul.mubr.bf16.gmra.mrb[216].mxu0 %v8769_v45  ;;  %v3375_v51 = vadd.f32 %v8774_v33, %v7797_v48  ;;  %v8779_v33 = vld [vmem:[#allocation77_spill] sm:$0xff] }
 0x4a1   : > { %v7980_v25 = vadd.f32 %v5463_v58, %v3528_v0  ;;  %v3531_v31 = vadd.f32 %v5354_v32, %v3370_v57  ;;  %4137 = vmatprep.mubr.bf16.mxu1 %v8771_v27  ;;  %4298 = vmatprep.mubr.bf16.mxu0 %v8772_v39  ;;  %v8775_v32 = vld [vmem:[#allocation90_spill] sm:$0xff] }
 0x4a3   : > { %8770 = vst [vmem:[#allocation45_spill] sm:$0xff] %v7980_v25  ;;  %v7984_v44 = vadd.f32 %v5466_v37, %v3531_v31  ;;  %v5355_v12 = vpop.f32.mrb[112].mxu1  ;;  %v5467_v29 = vpop.f32.mrb[112].mxu0  ;;  %v3378_v25 = vadd.f32 %v8775_v32, %v7797_v48  ;;  %v8776_v37 = vld [vmem:[#allocation31_spill] sm:$0xff] }
 0x4a4   : > { %v5356_v24 = vpop.f32.mrb[113].mxu1  ;;  %v5468_v47 = vpop.f32.mrb[113].mxu0 }
 0x4a5   : > { %8773 = vst [vmem:[#allocation47_spill] sm:$0xff] %v7984_v44  ;;  %v5357_v46 = vadd.f32 %v5356_v24, %v5355_v12  ;;  %v5469_v10 = vadd.f32 %v5468_v47, %v5467_v29  ;;  %v5358_v63 = vpop.f32.mrb[114].mxu1  ;;  %v5470_v45 = vpop.f32.mrb[114].mxu0  ;;  %v8777_v44 = vld [vmem:[#allocation37_spill] sm:$0xff]  ;;  %v8780_v12 = vld [vmem:[#allocation16_spill] sm:$0xff] }
 0x4a6   : > { %v5359_v58 = vpop.f32.mrb[115].mxu1  ;;  %v5471_v0 = vpop.f32.mrb[115].mxu0 }
 0x4a7   : > { %v3536_v57 = vadd.f32 %v5357_v46, %v3375_v51  ;;  %v5360_v39 = vadd.f32 %v5359_v58, %v5358_v63  ;;  %v5472_v31 = vadd.f32 %v5471_v0, %v5470_v45  ;;  %v8782_v63 = vld [vmem:[#allocation91_spill] sm:$0xff] }
 0x4a8   : > { %4138 = vmatmul.mubr.bf16.gmra.mrb[220].mxu1 %v8776_v37  ;;  %4299 = vmatmul.mubr.bf16.gmra.mrb[220].mxu0 %v8777_v44  ;;  %v3383_v45 = vadd.f32 %v8782_v63, %v7797_v48  ;;  %v8787_v63 = vld [vmem:[#allocation79_spill] sm:$0xff] }
 0x4a9   : > { %v7992_v27 = vadd.f32 %v5469_v10, %v3536_v57  ;;  %v3539_v62 = vadd.f32 %v5360_v39, %v3378_v25  ;;  %4145 = vmatprep.mubr.bf16.mxu1 %v8779_v33  ;;  %4306 = vmatprep.mubr.bf16.mxu0 %v8780_v12  ;;  %v8783_v39 = vld [vmem:[#allocation92_spill] sm:$0xff] }
 0x4ab   : > { %8778 = vst [vmem:[#allocation49_spill] sm:$0xff] %v7992_v27  ;;  %v7996_v29 = vadd.f32 %v5472_v31, %v3539_v62  ;;  %v5361_v24 = vpop.f32.mrb[116].mxu1  ;;  %v5473_v47 = vpop.f32.mrb[116].mxu0  ;;  %v3386_v27 = vadd.f32 %v8783_v39, %v7797_v48  ;;  %v8784_v31 = vld [vmem:[#allocation11_spill] sm:$0xff] }
 0x4ac   : > { %v5362_v51 = vpop.f32.mrb[117].mxu1  ;;  %v5474_v46 = vpop.f32.mrb[117].mxu0 }
 0x4ad   : > { %8781 = vst [vmem:[#allocation51_spill] sm:$0xff] %v7996_v29  ;;  %v5363_v58 = vadd.f32 %v5362_v51, %v5361_v24  ;;  %v5475_v0 = vadd.f32 %v5474_v46, %v5473_v47  ;;  %v5364_v32 = vpop.f32.mrb[118].mxu1  ;;  %v5476_v44 = vpop.f32.mrb[118].mxu0  ;;  %v8785_v29 = vld [vmem:[#allocation15_spill] sm:$0xff]  ;;  %v8788_v24 = vld [vmem:[#allocation17_spill] sm:$0xff] }
 0x4ae   : > { %v5365_v10 = vpop.f32.mrb[119].mxu1  ;;  %v5477_v57 = vpop.f32.mrb[119].mxu0 }
 0x4af   : > { %v3544_v25 = vadd.f32 %v5363_v58, %v3383_v45  ;;  %v5366_v12 = vadd.f32 %v5365_v10, %v5364_v32  ;;  %v5478_v62 = vadd.f32 %v5477_v57, %v5476_v44  ;;  %v8790_v32 = vld [vmem:[#allocation93_spill] sm:$0xff] }
 0x4b0   : > { %4146 = vmatmul.mubr.bf16.gmra.mrb[224].mxu1 %v8784_v31  ;;  %4307 = vmatmul.mubr.bf16.gmra.mrb[224].mxu0 %v8785_v29  ;;  %v3391_v44 = vadd.f32 %v8790_v32, %v7797_v48  ;;  %v8794_v32 = vld [vmem:[#allocation18_spill] sm:$0xff] }
 0x4b1   : > { %v8004_v33 = vadd.f32 %v5475_v0, %v3544_v25  ;;  %v3547_v37 = vadd.f32 %v5366_v12, %v3386_v27  ;;  %4153 = vmatprep.mubr.bf16.mxu1 %v8787_v63  ;;  %4314 = vmatprep.mubr.bf16.mxu0 %v8788_v24  ;;  %v8791_v12 = vld [vmem:[#allocation94_spill] sm:$0xff] }
 0x4b3   : > { %8786 = vst [vmem:[#allocation53_spill] sm:$0xff] %v8004_v33  ;;  %v8008_v47 = vadd.f32 %v5478_v62, %v3547_v37  ;;  %v5367_v51 = vpop.f32.mrb[120].mxu1  ;;  %v5479_v46 = vpop.f32.mrb[120].mxu0  ;;  %v3394_v33 = vadd.f32 %v8791_v12, %v7797_v48  ;;  %v8792_v62 = vld [vmem:[#allocation14_spill] sm:$0xff] }
 0x4b4   : > { %v5368_v45 = vpop.f32.mrb[121].mxu1  ;;  %v5480_v58 = vpop.f32.mrb[121].mxu0 }
 0x4b5   : > { %8789 = vst [vmem:[#allocation55_spill] sm:$0xff] %v8008_v47  ;;  %v5369_v10 = vadd.f32 %v5368_v45, %v5367_v51  ;;  %v5481_v57 = vadd.f32 %v5480_v58, %v5479_v46  ;;  %v5370_v39 = vpop.f32.mrb[122].mxu1  ;;  %v5482_v29 = vpop.f32.mrb[122].mxu0  ;;  %v8793_v47 = vld [vmem:[#allocation20_spill] sm:$0xff] }
 0x4b6   : > { %v5371_v0 = vpop.f32.mrb[123].mxu1  ;;  %v5483_v25 = vpop.f32.mrb[123].mxu0  ;;  %v8795_v51 = vld [vmem:[#allocation24_spill] sm:$0xff] }
 0x4b7   : > { %v3552_v27 = vadd.f32 %v5369_v10, %v3391_v44  ;;  %v5372_v24 = vadd.f32 %v5371_v0, %v5370_v39  ;;  %v5484_v37 = vadd.f32 %v5483_v25, %v5482_v29 }
 0x4b8   : > { %4154 = vmatmul.mubr.bf16.gmra.mrb[228].mxu1 %v8792_v62  ;;  %4315 = vmatmul.mubr.bf16.gmra.mrb[228].mxu0 %v8793_v47  ;;  %v8797_v47 = vld [vmem:[#allocation21_spill] sm:$0xff] }
 0x4b9   : > { %v8016_v63 = vadd.f32 %v5481_v57, %v3552_v27  ;;  %v3555_v31 = vadd.f32 %v5372_v24, %v3394_v33  ;;  %4161 = vmatprep.mubr.bf16.mxu1 %v8794_v32  ;;  %4322 = vmatprep.mubr.bf16.mxu0 %v8795_v51  ;;  %v8798_v24 = vld [vmem:[#allocation19_spill] sm:$0xff] }
 0x4bb   : > { %v8020_v46 = vadd.f32 %v5484_v37, %v3555_v31  ;;  %v5501_v45 = vpop.f32.mrb[124].mxu1  ;;  %v5613_v58 = vpop.f32.mrb[124].mxu0  ;;  %v8799_v37 = vld [vmem:[#allocation43_spill] sm:$0xff] }
 0x4bc   : > { %v5502_v44 = vpop.f32.mrb[125].mxu1  ;;  %v5614_v10 = vpop.f32.mrb[125].mxu0 }
 0x4bd   : > { %8796 = vst [vmem:[#allocation57_spill] sm:$0xff] %v8020_v46  ;;  %v5503_v48 = vadd.f32 %v5502_v44, %v5501_v45  ;;  %v5615_v39 = vadd.f32 %v5614_v10, %v5613_v58  ;;  %v5504_v29 = vpop.f32.mrb[126].mxu1  ;;  %v5616_v0 = vpop.f32.mrb[126].mxu0  ;;  %v8800_v46 = vld [vmem:[#allocation23_spill] sm:$0xff] }
 0x4be   : > { %v5505_v25 = vpop.f32.mrb[127].mxu1  ;;  %v5617_v12 = vpop.f32.mrb[127].mxu0 }
 0x4bf   : > { %v3754_v57 = vadd.f32 %v5503_v48, %v8797_v47  ;;  %v5506_v27 = vadd.f32 %v5505_v25, %v5504_v29  ;;  %v5618_v33 = vadd.f32 %v5617_v12, %v5616_v0 }
 0x4c0   : > { %4162 = vmatmul.mubr.bf16.gmra.mrb[232].mxu1 %v8798_v24  ;;  %4323 = vmatmul.mubr.bf16.gmra.mrb[232].mxu0 %v8739_v11 }
 0x4c1   : > { %v8025_v31 = vadd.f32 %v5615_v39, %v3754_v57  ;;  %v3757_v51 = vadd.f32 %v5506_v27, %v8799_v37  ;;  %4169 = vmatprep.mubr.bf16.mxu1 %v8800_v46  ;;  %4330 = vmatprep.mubr.bf16.mxu0 %v8691_v6  ;;  %v8801_v37 = vld [vmem:[#allocation25_spill] sm:$0xff] }
 0x4c3   : > { %v8030_v45 = vadd.f32 %v5618_v33, %v3757_v51  ;;  %v5507_v58 = vpop.f32.mrb[128].mxu1  ;;  %v5619_v44 = vpop.f32.mrb[128].mxu0  ;;  %v8802_v51 = vld [vmem:[#allocation28_spill] sm:$0xff] }
 0x4c4   : > { %v5508_v10 = vpop.f32.mrb[129].mxu1  ;;  %v5620_v48 = vpop.f32.mrb[129].mxu0 }
 0x4c5   : > { %v5509_v29 = vadd.f32 %v5508_v10, %v5507_v58  ;;  %v5621_v0 = vadd.f32 %v5620_v48, %v5619_v44  ;;  %v5510_v25 = vpop.f32.mrb[130].mxu1  ;;  %v5622_v12 = vpop.f32.mrb[130].mxu0 }
 0x4c6   : > { %v5511_v47 = vpop.f32.mrb[131].mxu1  ;;  %v5623_v11 = vpop.f32.mrb[131].mxu0 }
 0x4c7   : > { %v3762_v39 = vadd.f32 %v5509_v29, %v7820_v49  ;;  %v5512_v57 = vadd.f32 %v5511_v47, %v5510_v25  ;;  %v5624_v27 = vadd.f32 %v5623_v11, %v5622_v12 }
 0x4c8   : > { %4170 = vmatmul.mubr.bf16.gmra.mrb[236].mxu1 %v8801_v37  ;;  %4331 = vmatmul.mubr.bf16.gmra.mrb[236].mxu0 %v8742_v41 }
 0x4c9   : > { %v8035_v6 = vadd.f32 %v5621_v0, %v3762_v39  ;;  %v3765_v33 = vadd.f32 %v5512_v57, %v7828_v1  ;;  %4177 = vmatprep.mubr.bf16.mxu1 %v8802_v51  ;;  %4338 = vmatprep.mubr.bf16.mxu0 %v8699_v34  ;;  %v8803_v57 = vld [vmem:[#allocation38_spill] sm:$0xff] }
 0x4cb   : > { %v8040_v58 = vadd.f32 %v5624_v27, %v3765_v33  ;;  %v5513_v44 = vpop.f32.mrb[132].mxu1  ;;  %v5625_v10 = vpop.f32.mrb[132].mxu0  ;;  %v8805_v33 = vld [vmem:[#allocation85_spill] sm:$0xff] }
 0x4cc   : > { %v5514_v48 = vpop.f32.mrb[133].mxu1  ;;  %v5626_v49 = vpop.f32.mrb[133].mxu0 }
 0x4cd   : > { %v5515_v29 = vadd.f32 %v5514_v48, %v5513_v44  ;;  %v5627_v25 = vadd.f32 %v5626_v49, %v5625_v10  ;;  %v5516_v12 = vpop.f32.mrb[134].mxu1  ;;  %v5628_v47 = vpop.f32.mrb[134].mxu0 }
 0x4ce   : > { %v5517_v11 = vpop.f32.mrb[135].mxu1  ;;  %v5629_v41 = vpop.f32.mrb[135].mxu0 }
 0x4cf   : > { %v3770_v0 = vadd.f32 %v5515_v29, %v7847_v35  ;;  %v5518_v39 = vadd.f32 %v5517_v11, %v5516_v12  ;;  %v5630_v1 = vadd.f32 %v5629_v41, %v5628_v47  ;;  %v2072_v29 = vrot.slane %v7826_v17, 1  ;;  %v8806_v12 = vld [vmem:[#allocation44_spill] sm:$0xff] }
 0x4d0   : > { %4178 = vmatmul.mubr.bf16.gmra.mrb[240].mxu1 %v8803_v57  ;;  %4339 = vmatmul.mubr.bf16.gmra.mrb[240].mxu0 %v8704_v9  ;;  %v2073_v47 = vrot.slane %v8806_v12, 1 }
 0x4d1   : > { %v8045_v34 = vadd.f32 %v5627_v25, %v3770_v0  ;;  %v3773_v27 = vadd.f32 %v5518_v39, %v7856_v50  ;;  %4185 = vmatprep.mubr.bf16.mxu1 %v8805_v33  ;;  %4346 = vmatprep.mubr.bf16.mxu0 %v7826_v17 }
 0x4d3   : > { %8804 = vst [vmem:[#allocation59_spill] sm:$0xff] %v8045_v34  ;;  %v8050_v44 = vadd.f32 %v5630_v1, %v3773_v27  ;;  %v5519_v10 = vpop.f32.mrb[136].mxu1  ;;  %v5631_v48 = vpop.f32.mrb[136].mxu0  ;;  %v8807_v1 = vld [vmem:[#allocation87_spill] sm:$0xff]  ;;  %v8058_v27 = vsel %vm1914_vm7, %v2072_v29, %v2073_v47 }
 0x4d4   : > { %v5520_v49 = vpop.f32.mrb[137].mxu1  ;;  %v5632_v35 = vpop.f32.mrb[137].mxu0 }
 0x4d5   : > { %v5521_v11 = vadd.f32 %v5520_v49, %v5519_v10  ;;  %v5633_v9 = vadd.f32 %v5632_v35, %v5631_v48  ;;  %v5522_v25 = vpop.f32.mrb[138].mxu1  ;;  %v5634_v41 = vpop.f32.mrb[138].mxu0  ;;  %v8809_v48 = vld [vmem:[#allocation8_spill] sm:$0xff]  ;;  %v2069_v49 = vrot.slane %v7839_v22, 1 }
 0x4d6   : > { %v5523_v0 = vpop.f32.mrb[139].mxu1  ;;  %v5635_v50 = vpop.f32.mrb[139].mxu0 }
 0x4d7   : > { %v3778_v39 = vadd.f32 %v5521_v11, %v7869_v8  ;;  %v5524_v34 = vadd.f32 %v5523_v0, %v5522_v25  ;;  %v5636_v33 = vadd.f32 %v5635_v50, %v5634_v41  ;;  %v2070_v8 = vrot.slane %v7853_v30, 1 }
 0x4d8   : > { %4186 = vmatmul.mubr.bf16.gmra.mrb[244].mxu1 %v8807_v1  ;;  %4347 = vmatmul.mubr.bf16.gmra.mrb[244].mxu0 %v7839_v22 }
 0x4d9   : > { %v8060_v17 = vadd.f32 %v5633_v9, %v3778_v39  ;;  %v3781_v10 = vadd.f32 %v5524_v34, %v7873_v13  ;;  %4193 = vmatprep.mubr.bf16.mxu1 %v8058_v27  ;;  %4354 = vmatprep.mubr.bf16.mxu0 %v8809_v48  ;;  %v8070_v13 = vsel %vm1914_vm7, %v2069_v49, %v2070_v8 }
 0x4db   : > { %8808 = vst [vmem:[#allocation61_spill] sm:$0xff] %v8060_v17  ;;  %v8067_v35 = vadd.f32 %v5636_v33, %v3781_v10  ;;  %v5525_v12 = vpop.f32.mrb[140].mxu1  ;;  %v5637_v11 = vpop.f32.mrb[140].mxu0  ;;  %v8810_v10 = vld [vmem:[#allocation46_spill] sm:$0xff] }
 0x4dc   : > { %v5526_v25 = vpop.f32.mrb[141].mxu1  ;;  %v5638_v41 = vpop.f32.mrb[141].mxu0 }
 0x4dd   : > { %v5527_v29 = vadd.f32 %v5526_v25, %v5525_v12  ;;  %v5639_v47 = vadd.f32 %v5638_v41, %v5637_v11  ;;  %v5528_v9 = vpop.f32.mrb[142].mxu1  ;;  %v5640_v0 = vpop.f32.mrb[142].mxu0 }
 0x4de   : > { %v5529_v34 = vpop.f32.mrb[143].mxu1  ;;  %v5641_v50 = vpop.f32.mrb[143].mxu0 }
 0x4df   : > { %v3786_v39 = vadd.f32 %v5527_v29, %v7884_v3  ;;  %v5530_v22 = vadd.f32 %v5529_v34, %v5528_v9  ;;  %v5642_v17 = vadd.f32 %v5641_v50, %v5640_v0  ;;  %v8811_v50 = vld [vmem:[#allocation48_spill] sm:$0xff] }
 0x4e0   : > { %4194 = vmatmul.mubr.bf16.gmra.mrb[248].mxu1 %v8070_v13  ;;  %4355 = vmatmul.mubr.bf16.gmra.mrb[248].mxu0 %v8809_v48 }
 0x4e1   : > { %v8075_v30 = vadd.f32 %v5639_v47, %v3786_v39  ;;  %v3789_v33 = vadd.f32 %v5530_v22, %v7888_v21  ;;  %4395 = vmatprep.mubr.bf16.mxu1 %v8810_v10  ;;  %4556 = vmatprep.mubr.bf16.mxu0 %v8747_v16  ;;  %v8812_v39 = vld [vmem:[#allocation50_spill] sm:$0xff] }
 0x4e3   : > { %v8080_v49 = vadd.f32 %v5642_v17, %v3789_v33  ;;  %v5531_v8 = vpop.f32.mrb[144].mxu1  ;;  %v5643_v12 = vpop.f32.mrb[144].mxu0 }
 0x4e4   : > { %v5532_v11 = vpop.f32.mrb[145].mxu1  ;;  %v5644_v3 = vpop.f32.mrb[145].mxu0 }
 0x4e5   : > { %v5533_v25 = vadd.f32 %v5532_v11, %v5531_v8  ;;  %v5645_v41 = vadd.f32 %v5644_v3, %v5643_v12  ;;  %v5534_v29 = vpop.f32.mrb[146].mxu1  ;;  %v5646_v9 = vpop.f32.mrb[146].mxu0 }
 0x4e6   : > { %v5535_v0 = vpop.f32.mrb[147].mxu1  ;;  %v5647_v48 = vpop.f32.mrb[147].mxu0 }
 0x4e7   : > { %v3794_v47 = vadd.f32 %v5533_v25, %v7896_v15  ;;  %v5536_v34 = vadd.f32 %v5535_v0, %v5534_v29  ;;  %v5648_v21 = vadd.f32 %v5647_v48, %v5646_v9  ;;  %v8813_v0 = vld [vmem:[#allocation52_spill] sm:$0xff] }
 0x4e8   : > { %4396 = vmatmul.mubr.bf16.vlgmr.msra.gmra.mrb[252].mxu1 %v8811_v50  ;;  %4557 = vmatmul.mubr.bf16.vlgmr.msra.gmra.mrb[252].mxu0 %v8748_v53 }
 0x4e9   : > { %v8085_v16 = vadd.f32 %v5645_v41, %v3794_v47  ;;  %v3797_v17 = vadd.f32 %v5536_v34, %v7900_v18  ;;  %4403 = vmatprep.mubr.bf16.mxu1 %v8812_v39  ;;  %4564 = vmatprep.mubr.bf16.mxu0 %v8749_v26  ;;  %v8814_v47 = vld [vmem:[#allocation54_spill] sm:$0xff] }
 0x4eb   : > { %v8090_v22 = vadd.f32 %v5648_v21, %v3797_v17  ;;  %v5537_v33 = vpop.f32.mrb[148].mxu1  ;;  %v5649_v10 = vpop.f32.mrb[148].mxu0 }
 0x4ec   : > { %v5538_v8 = vpop.f32.mrb[149].mxu1  ;;  %v5650_v15 = vpop.f32.mrb[149].mxu0 }
 0x4ed   : > { %v5539_v12 = vadd.f32 %v5538_v8, %v5537_v33  ;;  %v5651_v11 = vadd.f32 %v5650_v15, %v5649_v10  ;;  %v5540_v3 = vpop.f32.mrb[150].mxu1  ;;  %v5652_v25 = vpop.f32.mrb[150].mxu0 }
 0x4ee   : > { %v5541_v29 = vpop.f32.mrb[151].mxu1  ;;  %v5653_v53 = vpop.f32.mrb[151].mxu0 }
 0x4ef   : > { %v3802_v41 = vadd.f32 %v5539_v12, %v7908_v60  ;;  %v5542_v9 = vadd.f32 %v5541_v29, %v5540_v3  ;;  %v5654_v18 = vadd.f32 %v5653_v53, %v5652_v25  ;;  %v8815_v3 = vld [vmem:[#allocation56_spill] sm:$0xff]  ;;  %v8816_v29 = vld [vmem:[#allocation58_spill] sm:$0xff] }
 0x4f0   : > { %4404 = vmatmul.mubr.bf16.gmra.mrb[0].mxu1 %v8813_v0  ;;  %4565 = vmatmul.mubr.bf16.gmra.mrb[0].mxu0 %v8750_v56 }
 0x4f1   : > { %v8095_v26 = vadd.f32 %v5651_v11, %v3802_v41  ;;  %v3805_v48 = vadd.f32 %v5542_v9, %v7912_v19  ;;  %4411 = vmatprep.mubr.bf16.mxu1 %v8814_v47  ;;  %4572 = vmatprep.mubr.bf16.mxu0 %v8751_v43 }
 0x4f3   : > { %v8100_v34 = vadd.f32 %v5654_v18, %v3805_v48  ;;  %v5543_v21 = vpop.f32.mrb[152].mxu1  ;;  %v5655_v50 = vpop.f32.mrb[152].mxu0 }
 0x4f4   : > { %v5544_v17 = vpop.f32.mrb[153].mxu1  ;;  %v5656_v60 = vpop.f32.mrb[153].mxu0 }
 0x4f5   : > { %v5545_v39 = vadd.f32 %v5544_v17, %v5543_v21  ;;  %v5657_v33 = vadd.f32 %v5656_v60, %v5655_v50  ;;  %v5546_v10 = vpop.f32.mrb[154].mxu1  ;;  %v5658_v8 = vpop.f32.mrb[154].mxu0 }
 0x4f6   : > { %v5547_v15 = vpop.f32.mrb[155].mxu1  ;;  %v5659_v56 = vpop.f32.mrb[155].mxu0 }
 0x4f7   : > { %v3810_v12 = vadd.f32 %v5545_v39, %v7920_v20  ;;  %v5548_v11 = vadd.f32 %v5547_v15, %v5546_v10  ;;  %v5660_v19 = vadd.f32 %v5659_v56, %v5658_v8  ;;  %v8817_v39 = vld [vmem:[#allocation60_spill] sm:$0xff]  ;;  %v8818_v10 = vld [vmem:[#allocation62_spill] sm:$0xff] }
 0x4f8   : > { %4412 = vmatmul.mubr.bf16.gmra.mrb[4].mxu1 %v8815_v3  ;;  %4573 = vmatmul.mubr.bf16.gmra.mrb[4].mxu0 %v8752_v38 }
 0x4f9   : > { %v8105_v43 = vadd.f32 %v5657_v33, %v3810_v12  ;;  %v3813_v25 = vadd.f32 %v5548_v11, %v7924_v52  ;;  %4419 = vmatprep.mubr.bf16.mxu1 %v8816_v29  ;;  %4580 = vmatprep.mubr.bf16.mxu0 %v8753_v14 }
 0x4fb   : > { %v8110_v53 = vadd.f32 %v5660_v19, %v3813_v25  ;;  %v5549_v41 = vpop.f32.mrb[156].mxu1  ;;  %v5661_v9 = vpop.f32.mrb[156].mxu0 }
 0x4fc   : > { %v5550_v18 = vpop.f32.mrb[157].mxu1  ;;  %v5662_v20 = vpop.f32.mrb[157].mxu0 }
 0x4fd   : > { %v5551_v0 = vadd.f32 %v5550_v18, %v5549_v41  ;;  %v5663_v48 = vadd.f32 %v5662_v20, %v5661_v9  ;;  %v5552_v47 = vpop.f32.mrb[158].mxu1  ;;  %v5664_v21 = vpop.f32.mrb[158].mxu0  ;;  %v8819_v18 = vld [vmem:[#allocation64_spill] sm:$0xff] }
 0x4fe   : > { %v5553_v50 = vpop.f32.mrb[159].mxu1  ;;  %v5665_v38 = vpop.f32.mrb[159].mxu0 }
 0x4ff   : > { %v3818_v17 = vadd.f32 %v5551_v0, %v7932_v36  ;;  %v5554_v60 = vadd.f32 %v5553_v50, %v5552_v47  ;;  %v5666_v52 = vadd.f32 %v5665_v38, %v5664_v21  ;;  %v8820_v0 = vld [vmem:[#allocation66_spill] sm:$0xff] }
 0x500   : > { %4420 = vmatmul.mubr.bf16.gmra.mrb[8].mxu1 %v8817_v39  ;;  %4581 = vmatmul.mubr.bf16.gmra.mrb[8].mxu0 %v8754_v28 }
 0x501   : > { %v8115_v14 = vadd.f32 %v5663_v48, %v3818_v17  ;;  %v3821_v33 = vadd.f32 %v5554_v60, %v7936_v7  ;;  %4427 = vmatprep.mubr.bf16.mxu1 %v8818_v10  ;;  %4588 = vmatprep.mubr.bf16.mxu0 %v8755_v54 }
 0x503   : > { %v8120_v8 = vadd.f32 %v5666_v52, %v3821_v33  ;;  %v5555_v15 = vpop.f32.mrb[160].mxu1  ;;  %v5667_v56 = vpop.f32.mrb[160].mxu0 }
 0x504   : > { %v5556_v12 = vpop.f32.mrb[161].mxu1  ;;  %v5668_v36 = vpop.f32.mrb[161].mxu0 }
 0x505   : > { %v5557_v11 = vadd.f32 %v5556_v12, %v5555_v15  ;;  %v5669_v19 = vadd.f32 %v5668_v36, %v5667_v56  ;;  %v5558_v3 = vpop.f32.mrb[162].mxu1  ;;  %v5670_v25 = vpop.f32.mrb[162].mxu0  ;;  %v8821_v15 = vld [vmem:[#allocation68_spill] sm:$0xff]  ;;  %v8822_v12 = vld [vmem:[#allocation71_spill] sm:$0xff] }
 0x506   : > { %v5559_v29 = vpop.f32.mrb[163].mxu1  ;;  %v5671_v28 = vpop.f32.mrb[163].mxu0 }
 0x507   : > { %v3826_v41 = vadd.f32 %v5557_v11, %v7944_v61  ;;  %v5560_v9 = vadd.f32 %v5559_v29, %v5558_v3  ;;  %v5672_v7 = vadd.f32 %v5671_v28, %v5670_v25 }
 0x508   : > { %4428 = vmatmul.mubr.bf16.gmra.mrb[12].mxu1 %v8819_v18  ;;  %4589 = vmatmul.mubr.bf16.gmra.mrb[12].mxu0 %v8756_v40 }
 0x509   : > { %v8125_v54 = vadd.f32 %v5669_v19, %v3826_v41  ;;  %v3829_v20 = vadd.f32 %v5560_v9, %v7948_v2  ;;  %4435 = vmatprep.mubr.bf16.mxu1 %v8820_v0  ;;  %4596 = vmatprep.mubr.bf16.mxu0 %v8757_v23  ;;  %v8824_v0 = vld [vmem:[#allocation72_spill] sm:$0xff] }
 0x50b   : > { %v8130_v48 = vadd.f32 %v5672_v7, %v3829_v20  ;;  %v5561_v47 = vpop.f32.mrb[164].mxu1  ;;  %v5673_v21 = vpop.f32.mrb[164].mxu0  ;;  %v8823_v20 = vld [vmem:[#allocation73_spill] sm:$0xff] }
 0x50c   : > { %v5562_v50 = vpop.f32.mrb[165].mxu1  ;;  %v5674_v61 = vpop.f32.mrb[165].mxu0 }
 0x50d   : > { %v5563_v38 = vadd.f32 %v5562_v50, %v5561_v47  ;;  %v5675_v17 = vadd.f32 %v5674_v61, %v5673_v21  ;;  %v5564_v60 = vpop.f32.mrb[166].mxu1  ;;  %v5676_v52 = vpop.f32.mrb[166].mxu0  ;;  %v8825_v47 = vld [vmem:[#allocation42_spill] sm:$0xff]  ;;  %v8826_v50 = vld [vmem:[#allocation75_spill] sm:$0xff] }
 0x50e   : > { %v5565_v39 = vpop.f32.mrb[167].mxu1  ;;  %v5677_v40 = vpop.f32.mrb[167].mxu0  ;;  %v8827_v61 = vld [vmem:[#allocation74_spill] sm:$0xff] }
 0x50f   : > { %v3834_v33 = vadd.f32 %v5563_v38, %v7956_v5  ;;  %v5566_v10 = vadd.f32 %v5565_v39, %v5564_v60  ;;  %v5678_v2 = vadd.f32 %v5677_v40, %v5676_v52 }
 0x510   : > { %4436 = vmatmul.mubr.bf16.gmra.mrb[16].mxu1 %v8821_v15  ;;  %4597 = vmatmul.mubr.bf16.gmra.mrb[16].mxu0 %v8761_v42 }
 0x511   : > { %v8135_v23 = vadd.f32 %v5675_v17, %v3834_v33  ;;  %v3837_v56 = vadd.f32 %v5566_v10, %v7960_v55  ;;  %4443 = vmatprep.mubr.bf16.mxu1 %v8822_v12  ;;  %4604 = vmatprep.mubr.bf16.mxu0 %v8763_v59 }
 0x513   : > { %v8140_v36 = vadd.f32 %v5678_v2, %v3837_v56  ;;  %v5567_v11 = vpop.f32.mrb[168].mxu1  ;;  %v5679_v19 = vpop.f32.mrb[168].mxu0  ;;  %v8828_v56 = vld [vmem:[#allocation45_spill] sm:$0xff] }
 0x514   : > { %v5568_v3 = vpop.f32.mrb[169].mxu1  ;;  %v5680_v5 = vpop.f32.mrb[169].mxu0 }
 0x515   : > { %v5569_v25 = vadd.f32 %v5568_v3, %v5567_v11  ;;  %v5681_v29 = vadd.f32 %v5680_v5, %v5679_v19  ;;  %v5570_v28 = vpop.f32.mrb[170].mxu1  ;;  %v5682_v41 = vpop.f32.mrb[170].mxu0  ;;  %v8829_v3 = vld [vmem:[#allocation76_spill] sm:$0xff]  ;;  %v8830_v5 = vld [vmem:[#allocation31_spill] sm:$0xff] }
 0x516   : > { %v5571_v9 = vpop.f32.mrb[171].mxu1  ;;  %v5683_v42 = vpop.f32.mrb[171].mxu0 }
 0x517   : > { %v3842_v7 = vadd.f32 %v5569_v25, %v7968_v4  ;;  %v5572_v18 = vadd.f32 %v5571_v9, %v5570_v28  ;;  %v5684_v55 = vadd.f32 %v5683_v42, %v5682_v41  ;;  %v8832_v41 = vld [vmem:[#allocation13_spill] sm:$0xff] }
 0x518   : > { %4444 = vmatmul.mubr.bf16.gmra.mrb[20].mxu1 %v8823_v20  ;;  %4605 = vmatmul.mubr.bf16.gmra.mrb[20].mxu0 %v8824_v0  ;;  %v8833_v9 = vld [vmem:[#allocation77_spill] sm:$0xff] }
 0x519   : > { %v8145_v59 = vadd.f32 %v5681_v29, %v3842_v7  ;;  %v3845_v21 = vadd.f32 %v5572_v18, %v8825_v47  ;;  %4451 = vmatprep.mubr.bf16.mxu1 %v8826_v50  ;;  %4612 = vmatprep.mubr.bf16.mxu0 %v8827_v61  ;;  %v8831_v29 = vld [vmem:[#allocation47_spill] sm:$0xff] }
 0x51b   : > { %v8150_v38 = vadd.f32 %v5684_v55, %v3845_v21  ;;  %v5573_v17 = vpop.f32.mrb[172].mxu1  ;;  %v5685_v60 = vpop.f32.mrb[172].mxu0 }
 0x51c   : > { %v5574_v52 = vpop.f32.mrb[173].mxu1  ;;  %v5686_v4 = vpop.f32.mrb[173].mxu0 }
 0x51d   : > { %v5575_v39 = vadd.f32 %v5574_v52, %v5573_v17  ;;  %v5687_v40 = vadd.f32 %v5686_v4, %v5685_v60  ;;  %v5576_v33 = vpop.f32.mrb[174].mxu1  ;;  %v5688_v10 = vpop.f32.mrb[174].mxu0  ;;  %v8834_v60 = vld [vmem:[#allocation49_spill] sm:$0xff] }
 0x51e   : > { %v5577_v2 = vpop.f32.mrb[175].mxu1  ;;  %v5689_v15 = vpop.f32.mrb[175].mxu0 }
 0x51f   : > { %v3850_v12 = vadd.f32 %v5575_v39, %v8828_v56  ;;  %v5578_v11 = vadd.f32 %v5577_v2, %v5576_v33  ;;  %v5690_v19 = vadd.f32 %v5689_v15, %v5688_v10  ;;  %v8836_v33 = vld [vmem:[#allocation11_spill] sm:$0xff]  ;;  %v8838_v56 = vld [vmem:[#allocation12_spill] sm:$0xff] }
 0x520   : > { %4452 = vmatmul.mubr.bf16.gmra.mrb[24].mxu1 %v8829_v3  ;;  %4613 = vmatmul.mubr.bf16.gmra.mrb[24].mxu0 %v8830_v5  ;;  %v8837_v2 = vld [vmem:[#allocation51_spill] sm:$0xff] }
 0x521   : > { %v8155_v25 = vadd.f32 %v5687_v40, %v3850_v12  ;;  %v3853_v28 = vadd.f32 %v5578_v11, %v8831_v29  ;;  %4459 = vmatprep.mubr.bf16.mxu1 %v8832_v41  ;;  %4620 = vmatprep.mubr.bf16.mxu0 %v8833_v9  ;;  %v8835_v40 = vld [vmem:[#allocation78_spill] sm:$0xff]  ;;  %v8839_v12 = vld [vmem:[#allocation79_spill] sm:$0xff] }
 0x523   : > { %v8160_v42 = vadd.f32 %v5690_v19, %v3853_v28  ;;  %v5579_v7 = vpop.f32.mrb[176].mxu1  ;;  %v5691_v18 = vpop.f32.mrb[176].mxu0 }
 0x524   : > { %v5580_v55 = vpop.f32.mrb[177].mxu1  ;;  %v5692_v20 = vpop.f32.mrb[177].mxu0 }
 0x525   : > { %v5581_v0 = vadd.f32 %v5580_v55, %v5579_v7  ;;  %v5693_v47 = vadd.f32 %v5692_v20, %v5691_v18  ;;  %v5582_v21 = vpop.f32.mrb[178].mxu1  ;;  %v5694_v50 = vpop.f32.mrb[178].mxu0  ;;  %v8840_v20 = vld [vmem:[#allocation53_spill] sm:$0xff] }
 0x526   : > { %v5583_v61 = vpop.f32.mrb[179].mxu1  ;;  %v5695_v17 = vpop.f32.mrb[179].mxu0 }
 0x527   : > { %v3858_v52 = vadd.f32 %v5581_v0, %v8834_v60  ;;  %v5584_v4 = vadd.f32 %v5583_v61, %v5582_v21  ;;  %v5696_v39 = vadd.f32 %v5695_v17, %v5694_v50  ;;  %v8841_v50 = vld [vmem:[#allocation80_spill] sm:$0xff]  ;;  %v8842_v17 = vld [vmem:[#allocation55_spill] sm:$0xff] }
 0x528   : > { %4460 = vmatmul.mubr.bf16.gmra.mrb[28].mxu1 %v8835_v40  ;;  %4621 = vmatmul.mubr.bf16.gmra.mrb[28].mxu0 %v8836_v33 }
 0x529   : > { %v8165_v10 = vadd.f32 %v5693_v47, %v3858_v52  ;;  %v3861_v15 = vadd.f32 %v5584_v4, %v8837_v2  ;;  %4467 = vmatprep.mubr.bf16.mxu1 %v8838_v56  ;;  %4628 = vmatprep.mubr.bf16.mxu0 %v8839_v12  ;;  %v8843_v52 = vld [vmem:[#allocation81_spill] sm:$0xff] }
 0x52b   : > { %v8170_v11 = vadd.f32 %v5696_v39, %v3861_v15  ;;  %v5585_v19 = vpop.f32.mrb[180].mxu1  ;;  %v5697_v3 = vpop.f32.mrb[180].mxu0 }
 0x52c   : > { %v5586_v5 = vpop.f32.mrb[181].mxu1  ;;  %v5698_v29 = vpop.f32.mrb[181].mxu0 }
 0x52d   : > { %v5587_v28 = vadd.f32 %v5586_v5, %v5585_v19  ;;  %v5699_v41 = vadd.f32 %v5698_v29, %v5697_v3  ;;  %v5588_v9 = vpop.f32.mrb[182].mxu1  ;;  %v5700_v7 = vpop.f32.mrb[182].mxu0 }
 0x52e   : > { %v5589_v18 = vpop.f32.mrb[183].mxu1  ;;  %v5701_v55 = vpop.f32.mrb[183].mxu0 }
 0x52f   : > { %v3866_v0 = vadd.f32 %v5587_v28, %v8840_v20  ;;  %v5590_v47 = vadd.f32 %v5589_v18, %v5588_v9  ;;  %v5702_v21 = vadd.f32 %v5701_v55, %v5700_v7  ;;  %v8845_v9 = vld [vmem:[#allocation57_spill] sm:$0xff]  ;;  %v8846_v18 = vld [vmem:[#allocation82_spill] sm:$0xff] }
 0x530   : > { %4468 = vmatmul.mubr.bf16.gmra.mrb[32].mxu1 %v8841_v50  ;;  %4629 = vmatmul.mubr.bf16.gmra.mrb[32].mxu0 %v8792_v62 }
 0x531   : > { %v8175_v61 = vadd.f32 %v5699_v41, %v3866_v0  ;;  %v3869_v60 = vadd.f32 %v5590_v47, %v8842_v17  ;;  %4475 = vmatprep.mubr.bf16.mxu1 %v8843_v52  ;;  %4636 = vmatprep.mubr.bf16.mxu0 %v8794_v32  ;;  %v8844_v41 = vld [vmem:[#allocation30_spill] sm:$0xff] }
 0x533   : > { %v8180_v4 = vadd.f32 %v5702_v21, %v3869_v60  ;;  %v5591_v39 = vpop.f32.mrb[184].mxu1  ;;  %v5703_v40 = vpop.f32.mrb[184].mxu0 }
 0x534   : > { %v5592_v33 = vpop.f32.mrb[185].mxu1  ;;  %v5704_v2 = vpop.f32.mrb[185].mxu0 }
 0x535   : > { %v5593_v15 = vadd.f32 %v5592_v33, %v5591_v39  ;;  %v5705_v56 = vadd.f32 %v5704_v2, %v5703_v40  ;;  %v5594_v12 = vpop.f32.mrb[186].mxu1  ;;  %v5706_v19 = vpop.f32.mrb[186].mxu0  ;;  %v8847_v2 = vld [vmem:[#allocation36_spill] sm:$0xff] }
 0x536   : > { %v5595_v3 = vpop.f32.mrb[187].mxu1  ;;  %v5707_v62 = vpop.f32.mrb[187].mxu0 }
 0x537   : > { %v3874_v5 = vadd.f32 %v5593_v15, %v8016_v63  ;;  %v5596_v29 = vadd.f32 %v5595_v3, %v5594_v12  ;;  %v5708_v28 = vadd.f32 %v5707_v62, %v5706_v19 }
 0x538   : > { %4476 = vmatmul.mubr.bf16.gmra.mrb[36].mxu1 %v8844_v41  ;;  %4637 = vmatmul.mubr.bf16.gmra.mrb[36].mxu0 %v8798_v24 }
 0x539   : > { %v8185_v32 = vadd.f32 %v5705_v56, %v3874_v5  ;;  %v3877_v7 = vadd.f32 %v5596_v29, %v8845_v9  ;;  %4483 = vmatprep.mubr.bf16.mxu1 %v8846_v18  ;;  %4644 = vmatprep.mubr.bf16.mxu0 %v8800_v46  ;;  %v8848_v56 = vld [vmem:[#allocation83_spill] sm:$0xff] }
 0x53b   : > { %v8190_v55 = vadd.f32 %v5708_v28, %v3877_v7  ;;  %v5725_v20 = vpop.f32.mrb[188].mxu1  ;;  %v5837_v0 = vpop.f32.mrb[188].mxu0 }
 0x53c   : > { %v5726_v47 = vpop.f32.mrb[189].mxu1  ;;  %v5838_v63 = vpop.f32.mrb[189].mxu0 }
 0x53d   : > { %v5727_v21 = vadd.f32 %v5726_v47, %v5725_v20  ;;  %v5839_v50 = vadd.f32 %v5838_v63, %v5837_v0  ;;  %v5728_v17 = vpop.f32.mrb[190].mxu1  ;;  %v5840_v60 = vpop.f32.mrb[190].mxu0  ;;  %v8849_v20 = vld [vmem:[#allocation32_spill] sm:$0xff]  ;;  %v8851_v63 = vld [vmem:[#allocation85_spill] sm:$0xff] }
 0x53e   : > { %v5729_v52 = vpop.f32.mrb[191].mxu1  ;;  %v5841_v24 = vpop.f32.mrb[191].mxu0  ;;  %v8850_v47 = vld [vmem:[#allocation84_spill] sm:$0xff] }
 0x53f   : > { %v4076_v39 = vadd.f32 %v5727_v21, %v8025_v31  ;;  %v5730_v40 = vadd.f32 %v5729_v52, %v5728_v17  ;;  %v5842_v33 = vadd.f32 %v5841_v24, %v5840_v60 }
 0x540   : > { %4484 = vmatmul.mubr.bf16.gmra.mrb[40].mxu1 %v8847_v2  ;;  %4645 = vmatmul.mubr.bf16.gmra.mrb[40].mxu0 %v8801_v37  ;;  %v8852_v2 = vld [vmem:[#allocation59_spill] sm:$0xff] }
 0x541   : > { %v8195_v46 = vadd.f32 %v5839_v50, %v4076_v39  ;;  %v4079_v15 = vadd.f32 %v5730_v40, %v8030_v45  ;;  %4491 = vmatprep.mubr.bf16.mxu1 %v8848_v56  ;;  %4652 = vmatprep.mubr.bf16.mxu0 %v8802_v51 }
 0x543   : > { %v8200_v12 = vadd.f32 %v5842_v33, %v4079_v15  ;;  %v5731_v19 = vpop.f32.mrb[192].mxu1  ;;  %v5843_v3 = vpop.f32.mrb[192].mxu0 }
 0x544   : > { %v5732_v62 = vpop.f32.mrb[193].mxu1  ;;  %v5844_v31 = vpop.f32.mrb[193].mxu0 }
 0x545   : > { %v5733_v5 = vadd.f32 %v5732_v62, %v5731_v19  ;;  %v5845_v29 = vadd.f32 %v5844_v31, %v5843_v3  ;;  %v5734_v28 = vpop.f32.mrb[194].mxu1  ;;  %v5846_v41 = vpop.f32.mrb[194].mxu0  ;;  %v8853_v19 = vld [vmem:[#allocation86_spill] sm:$0xff]  ;;  %v8854_v31 = vld [vmem:[#allocation27_spill] sm:$0xff] }
 0x546   : > { %v5735_v9 = vpop.f32.mrb[195].mxu1  ;;  %v5847_v37 = vpop.f32.mrb[195].mxu0 }
 0x547   : > { %v4084_v7 = vadd.f32 %v5733_v5, %v8035_v6  ;;  %v5736_v18 = vadd.f32 %v5735_v9, %v5734_v28  ;;  %v5848_v45 = vadd.f32 %v5847_v37, %v5846_v41 }
 0x548   : > { %4492 = vmatmul.mubr.bf16.gmra.mrb[44].mxu1 %v8849_v20  ;;  %4653 = vmatmul.mubr.bf16.gmra.mrb[44].mxu0 %v8803_v57 }
 0x549   : > { %v8205_v51 = vadd.f32 %v5845_v29, %v4084_v7  ;;  %v4087_v0 = vadd.f32 %v5736_v18, %v8040_v58  ;;  %4499 = vmatprep.mubr.bf16.mxu1 %v8850_v47  ;;  %4660 = vmatprep.mubr.bf16.mxu0 %v8851_v63 }
 0x54b   : > { %v8210_v21 = vadd.f32 %v5848_v45, %v4087_v0  ;;  %v5737_v50 = vpop.f32.mrb[196].mxu1  ;;  %v5849_v17 = vpop.f32.mrb[196].mxu0  ;;  %v8855_v0 = vld [vmem:[#allocation61_spill] sm:$0xff] }
 0x54c   : > { %v5738_v60 = vpop.f32.mrb[197].mxu1  ;;  %v5850_v6 = vpop.f32.mrb[197].mxu0 }
 0x54d   : > { %v5739_v52 = vadd.f32 %v5738_v60, %v5737_v50  ;;  %v5851_v24 = vadd.f32 %v5850_v6, %v5849_v17  ;;  %v5740_v39 = vpop.f32.mrb[198].mxu1  ;;  %v5852_v40 = vpop.f32.mrb[198].mxu0  ;;  %v8856_v50 = vld [vmem:[#allocation34_spill] sm:$0xff]  ;;  %v8857_v60 = vld [vmem:[#allocation39_spill] sm:$0xff]  ;;  %v8858_v6 = vld [vmem:[#allocation40_spill] sm:$0xff] }
 0x54e   : > { %v5741_v33 = vpop.f32.mrb[199].mxu1  ;;  %v5853_v57 = vpop.f32.mrb[199].mxu0 }
 0x54f   : > { %v4092_v15 = vadd.f32 %v5739_v52, %v8852_v2  ;;  %v5742_v56 = vadd.f32 %v5741_v33, %v5740_v39  ;;  %v5854_v58 = vadd.f32 %v5853_v57, %v5852_v40 }
 0x550   : > { %4500 = vmatmul.mubr.bf16.gmra.mrb[48].mxu1 %v8853_v19  ;;  %4661 = vmatmul.mubr.bf16.gmra.mrb[48].mxu0 %v8807_v1 }
 0x551   : > { %v8215_v3 = vadd.f32 %v5851_v24, %v4092_v15  ;;  %v4095_v62 = vadd.f32 %v5742_v56, %v8050_v44  ;;  %4507 = vmatprep.mubr.bf16.mxu1 %v8854_v31  ;;  %4668 = vmatprep.mubr.bf16.mxu0 %v8058_v27 }
 0x553   : > { %v8220_v5 = vadd.f32 %v5854_v58, %v4095_v62  ;;  %v5743_v29 = vpop.f32.mrb[200].mxu1  ;;  %v5855_v28 = vpop.f32.mrb[200].mxu0 }
 0x554   : > { %v5744_v41 = vpop.f32.mrb[201].mxu1  ;;  %v5856_v9 = vpop.f32.mrb[201].mxu0 }
 0x555   : > { %v5745_v37 = vadd.f32 %v5744_v41, %v5743_v29  ;;  %v5857_v7 = vadd.f32 %v5856_v9, %v5855_v28  ;;  %v5746_v18 = vpop.f32.mrb[202].mxu1  ;;  %v5858_v45 = vpop.f32.mrb[202].mxu0 }
 0x556   : > { %v5747_v20 = vpop.f32.mrb[203].mxu1  ;;  %v5859_v1 = vpop.f32.mrb[203].mxu0 }
 0x557   : > { %v4100_v47 = vadd.f32 %v5745_v37, %v8855_v0  ;;  %v5748_v63 = vadd.f32 %v5747_v20, %v5746_v18  ;;  %v5860_v44 = vadd.f32 %v5859_v1, %v5858_v45 }
 0x558   : > { %4508 = vmatmul.mubr.bf16.gmra.mrb[52].mxu1 %v8856_v50  ;;  %4669 = vmatmul.mubr.bf16.gmra.mrb[52].mxu0 %v8070_v13 }
 0x559   : > { %v8225_v27 = vadd.f32 %v5857_v7, %v4100_v47  ;;  %v4103_v17 = vadd.f32 %v5748_v63, %v8067_v35  ;;  %4515 = vmatprep.mubr.bf16.mxu1 %v8857_v60  ;;  %4676 = vmatprep.mubr.bf16.mxu0 %v8858_v6 }
 0x55b   : > { %v8230_v52 = vadd.f32 %v5860_v44, %v4103_v17  ;;  %v5749_v24 = vpop.f32.mrb[204].mxu1  ;;  %v5861_v39 = vpop.f32.mrb[204].mxu0 }
 0x55c   : > { %v5750_v40 = vpop.f32.mrb[205].mxu1  ;;  %v5862_v33 = vpop.f32.mrb[205].mxu0 }
 0x55d   : > { %v5751_v57 = vadd.f32 %v5750_v40, %v5749_v24  ;;  %v5863_v2 = vadd.f32 %v5862_v33, %v5861_v39  ;;  %v5752_v15 = vpop.f32.mrb[206].mxu1  ;;  %v5864_v56 = vpop.f32.mrb[206].mxu0 }
 0x55e   : > { %v5753_v58 = vpop.f32.mrb[207].mxu1  ;;  %v5865_v13 = vpop.f32.mrb[207].mxu0 }
 0x55f   : > { %v4108_v19 = vadd.f32 %v5751_v57, %v8075_v30  ;;  %v5754_v62 = vadd.f32 %v5753_v58, %v5752_v15  ;;  %v5866_v35 = vadd.f32 %v5865_v13, %v5864_v56 }
 0x560   : > { %4516 = vmatmul.mubr.bf16.gmra.mrb[56].mxu1 %v8857_v60  ;;  %4677 = vmatmul.mubr.bf16.gmra.mrb[56].mxu0 %v8858_v6 }
 0x561   : > { %v8235_v31 = vadd.f32 %v5863_v2, %v4108_v19  ;;  %v4111_v29 = vadd.f32 %v5754_v62, %v8080_v49 }
 0x563   : > { %v8238_v28 = vadd.f32 %v5866_v35, %v4111_v29  ;;  %v5755_v41 = vpop.f32.mrb[208].mxu1  ;;  %v5867_v9 = vpop.f32.mrb[208].mxu0 }
 0x564   : > { %v5756_v37 = vpop.f32.mrb[209].mxu1  ;;  %v5868_v7 = vpop.f32.mrb[209].mxu0 }
 0x565   : > { %v5757_v18 = vadd.f32 %v5756_v37, %v5755_v41  ;;  %v5869_v45 = vadd.f32 %v5868_v7, %v5867_v9  ;;  %v5758_v20 = vpop.f32.mrb[210].mxu1  ;;  %v5870_v30 = vpop.f32.mrb[210].mxu0 }
 0x566   : > { %v5759_v1 = vpop.f32.mrb[211].mxu1  ;;  %v5871_v0 = vpop.f32.mrb[211].mxu0 }
 0x567   : > { %v4116_v47 = vadd.f32 %v5757_v18, %v8085_v16  ;;  %v5760_v63 = vadd.f32 %v5759_v1, %v5758_v20  ;;  %v5872_v44 = vadd.f32 %v5871_v0, %v5870_v30 }
 0x569   : > { %v8241_v50 = vadd.f32 %v5869_v45, %v4116_v47  ;;  %v4119_v49 = vadd.f32 %v5760_v63, %v8090_v22 }
 0x56b   : > { %v8244_v17 = vadd.f32 %v5872_v44, %v4119_v49  ;;  %v5761_v60 = vpop.f32.mrb[212].mxu1  ;;  %v5873_v6 = vpop.f32.mrb[212].mxu0 }
 0x56c   : > { %v5762_v24 = vpop.f32.mrb[213].mxu1  ;;  %v5874_v39 = vpop.f32.mrb[213].mxu0 }
 0x56d   : > { %v5763_v40 = vadd.f32 %v5762_v24, %v5761_v60  ;;  %v5875_v33 = vadd.f32 %v5874_v39, %v5873_v6  ;;  %v5764_v57 = vpop.f32.mrb[214].mxu1  ;;  %v5876_v2 = vpop.f32.mrb[214].mxu0 }
 0x56e   : > { %v5765_v15 = vpop.f32.mrb[215].mxu1  ;;  %v5877_v56 = vpop.f32.mrb[215].mxu0 }
 0x56f   : > { %v4124_v16 = vadd.f32 %v5763_v40, %v8095_v26  ;;  %v5766_v58 = vadd.f32 %v5765_v15, %v5764_v57  ;;  %v5878_v13 = vadd.f32 %v5877_v56, %v5876_v2 }
 0x571   : > { %v8247_v19 = vadd.f32 %v5875_v33, %v4124_v16  ;;  %v4127_v22 = vadd.f32 %v5766_v58, %v8100_v34 }
 0x573   : > { %v8250_v62 = vadd.f32 %v5878_v13, %v4127_v22  ;;  %v5767_v35 = vpop.f32.mrb[216].mxu1  ;;  %v5879_v29 = vpop.f32.mrb[216].mxu0 }
 0x574   : > { %v5768_v41 = vpop.f32.mrb[217].mxu1  ;;  %v5880_v9 = vpop.f32.mrb[217].mxu0 }
 0x575   : > { %v5769_v37 = vadd.f32 %v5768_v41, %v5767_v35  ;;  %v5881_v7 = vadd.f32 %v5880_v9, %v5879_v29  ;;  %v5770_v18 = vpop.f32.mrb[218].mxu1  ;;  %v5882_v45 = vpop.f32.mrb[218].mxu0 }
 0x576   : > { %v5771_v20 = vpop.f32.mrb[219].mxu1  ;;  %v5883_v30 = vpop.f32.mrb[219].mxu0 }
 0x577   : > { %v4132_v26 = vadd.f32 %v5769_v37, %v8105_v43  ;;  %v5772_v1 = vadd.f32 %v5771_v20, %v5770_v18  ;;  %v5884_v0 = vadd.f32 %v5883_v30, %v5882_v45 }
 0x579   : > { %v8253_v47 = vadd.f32 %v5881_v7, %v4132_v26  ;;  %v4135_v34 = vadd.f32 %v5772_v1, %v8110_v53 }
 0x57b   : > { %v8256_v63 = vadd.f32 %v5884_v0, %v4135_v34  ;;  %v5773_v44 = vpop.f32.mrb[220].mxu1  ;;  %v5885_v49 = vpop.f32.mrb[220].mxu0 }
 0x57c   : > { %v5774_v60 = vpop.f32.mrb[221].mxu1  ;;  %v5886_v6 = vpop.f32.mrb[221].mxu0 }
 0x57d   : > { %v5775_v24 = vadd.f32 %v5774_v60, %v5773_v44  ;;  %v5887_v39 = vadd.f32 %v5886_v6, %v5885_v49  ;;  %v5776_v40 = vpop.f32.mrb[222].mxu1  ;;  %v5888_v33 = vpop.f32.mrb[222].mxu0 }
 0x57e   : > { %v5777_v57 = vpop.f32.mrb[223].mxu1  ;;  %v5889_v2 = vpop.f32.mrb[223].mxu0 }
 0x57f   : > { %v4140_v43 = vadd.f32 %v5775_v24, %v8115_v14  ;;  %v5778_v15 = vadd.f32 %v5777_v57, %v5776_v40  ;;  %v5890_v56 = vadd.f32 %v5889_v2, %v5888_v33 }
 0x581   : > { %v8259_v16 = vadd.f32 %v5887_v39, %v4140_v43  ;;  %v4143_v53 = vadd.f32 %v5778_v15, %v8120_v8 }
 0x583   : > { %v8262_v58 = vadd.f32 %v5890_v56, %v4143_v53  ;;  %v5779_v13 = vpop.f32.mrb[224].mxu1  ;;  %v5891_v22 = vpop.f32.mrb[224].mxu0 }
 0x584   : > { %v5780_v35 = vpop.f32.mrb[225].mxu1  ;;  %v5892_v29 = vpop.f32.mrb[225].mxu0 }
 0x585   : > { %v5781_v41 = vadd.f32 %v5780_v35, %v5779_v13  ;;  %v5893_v9 = vadd.f32 %v5892_v29, %v5891_v22  ;;  %v5782_v37 = vpop.f32.mrb[226].mxu1  ;;  %v5894_v7 = vpop.f32.mrb[226].mxu0 }
 0x586   : > { %v5783_v18 = vpop.f32.mrb[227].mxu1  ;;  %v5895_v45 = vpop.f32.mrb[227].mxu0 }
 0x587   : > { %v4148_v14 = vadd.f32 %v5781_v41, %v8125_v54  ;;  %v5784_v20 = vadd.f32 %v5783_v18, %v5782_v37  ;;  %v5896_v30 = vadd.f32 %v5895_v45, %v5894_v7 }
 0x589   : > { %v8265_v26 = vadd.f32 %v5893_v9, %v4148_v14  ;;  %v4151_v8 = vadd.f32 %v5784_v20, %v8130_v48 }
 0x58b   : > { %v8268_v1 = vadd.f32 %v5896_v30, %v4151_v8  ;;  %v5785_v0 = vpop.f32.mrb[228].mxu1  ;;  %v5897_v34 = vpop.f32.mrb[228].mxu0 }
 0x58c   : > { %v5786_v44 = vpop.f32.mrb[229].mxu1  ;;  %v5898_v49 = vpop.f32.mrb[229].mxu0 }
 0x58d   : > { %v5787_v60 = vadd.f32 %v5786_v44, %v5785_v0  ;;  %v5899_v6 = vadd.f32 %v5898_v49, %v5897_v34  ;;  %v5788_v24 = vpop.f32.mrb[230].mxu1  ;;  %v5900_v39 = vpop.f32.mrb[230].mxu0 }
 0x58e   : > { %v5789_v40 = vpop.f32.mrb[231].mxu1  ;;  %v5901_v33 = vpop.f32.mrb[231].mxu0 }
 0x58f   : > { %v4156_v54 = vadd.f32 %v5787_v60, %v8135_v23  ;;  %v5790_v57 = vadd.f32 %v5789_v40, %v5788_v24  ;;  %v5902_v2 = vadd.f32 %v5901_v33, %v5900_v39 }
 0x591   : > { %v8271_v43 = vadd.f32 %v5899_v6, %v4156_v54  ;;  %v4159_v48 = vadd.f32 %v5790_v57, %v8140_v36 }
 0x593   : > { %v8274_v15 = vadd.f32 %v5902_v2, %v4159_v48  ;;  %v5791_v56 = vpop.f32.mrb[232].mxu1  ;;  %v5903_v53 = vpop.f32.mrb[232].mxu0 }
 0x594   : > { %v5792_v13 = vpop.f32.mrb[233].mxu1  ;;  %v5904_v22 = vpop.f32.mrb[233].mxu0 }
 0x595   : > { %v5793_v35 = vadd.f32 %v5792_v13, %v5791_v56  ;;  %v5905_v29 = vadd.f32 %v5904_v22, %v5903_v53  ;;  %v5794_v41 = vpop.f32.mrb[234].mxu1  ;;  %v5906_v9 = vpop.f32.mrb[234].mxu0 }
 0x596   : > { %v5795_v37 = vpop.f32.mrb[235].mxu1  ;;  %v5907_v7 = vpop.f32.mrb[235].mxu0 }
 0x597   : > { %v4164_v23 = vadd.f32 %v5793_v35, %v8145_v59  ;;  %v5796_v18 = vadd.f32 %v5795_v37, %v5794_v41  ;;  %v5908_v45 = vadd.f32 %v5907_v7, %v5906_v9 }
 0x599   : > { %v8277_v14 = vadd.f32 %v5905_v29, %v4164_v23  ;;  %v4167_v36 = vadd.f32 %v5796_v18, %v8150_v38 }
 0x59b   : > { %v8280_v20 = vadd.f32 %v5908_v45, %v4167_v36  ;;  %v5797_v30 = vpop.f32.mrb[236].mxu1  ;;  %v5909_v8 = vpop.f32.mrb[236].mxu0 }
 0x59c   : > { %v5798_v0 = vpop.f32.mrb[237].mxu1  ;;  %v5910_v34 = vpop.f32.mrb[237].mxu0 }
 0x59d   : > { %v5799_v44 = vadd.f32 %v5798_v0, %v5797_v30  ;;  %v5911_v49 = vadd.f32 %v5910_v34, %v5909_v8  ;;  %v5800_v60 = vpop.f32.mrb[238].mxu1  ;;  %v5912_v6 = vpop.f32.mrb[238].mxu0 }
 0x59e   : > { %v5801_v24 = vpop.f32.mrb[239].mxu1  ;;  %v5913_v39 = vpop.f32.mrb[239].mxu0 }
 0x59f   : > { %v4172_v59 = vadd.f32 %v5799_v44, %v8155_v25  ;;  %v5802_v40 = vadd.f32 %v5801_v24, %v5800_v60  ;;  %v5914_v33 = vadd.f32 %v5913_v39, %v5912_v6 }
 0x5a1   : > { %v8283_v54 = vadd.f32 %v5911_v49, %v4172_v59  ;;  %v4175_v38 = vadd.f32 %v5802_v40, %v8160_v42 }
 0x5a3   : > { %v8286_v57 = vadd.f32 %v5914_v33, %v4175_v38  ;;  %v5803_v2 = vpop.f32.mrb[240].mxu1  ;;  %v5915_v48 = vpop.f32.mrb[240].mxu0 }
 0x5a4   : > { %v5804_v56 = vpop.f32.mrb[241].mxu1  ;;  %v5916_v53 = vpop.f32.mrb[241].mxu0 }
 0x5a5   : > { %v5805_v13 = vadd.f32 %v5804_v56, %v5803_v2  ;;  %v5917_v22 = vadd.f32 %v5916_v53, %v5915_v48  ;;  %v5806_v35 = vpop.f32.mrb[242].mxu1  ;;  %v5918_v29 = vpop.f32.mrb[242].mxu0 }
 0x5a6   : > { %v5807_v41 = vpop.f32.mrb[243].mxu1  ;;  %v5919_v9 = vpop.f32.mrb[243].mxu0 }
 0x5a7   : > { %v4180_v25 = vadd.f32 %v5805_v13, %v8165_v10  ;;  %v5808_v37 = vadd.f32 %v5807_v41, %v5806_v35  ;;  %v5920_v7 = vadd.f32 %v5919_v9, %v5918_v29 }
 0x5a9   : > { %v8289_v23 = vadd.f32 %v5917_v22, %v4180_v25  ;;  %v4183_v42 = vadd.f32 %v5808_v37, %v8170_v11 }
 0x5ab   : > { %v8292_v18 = vadd.f32 %v5920_v7, %v4183_v42  ;;  %v5809_v45 = vpop.f32.mrb[244].mxu1  ;;  %v5921_v36 = vpop.f32.mrb[244].mxu0 }
 0x5ac   : > { %v5810_v30 = vpop.f32.mrb[245].mxu1  ;;  %v5922_v8 = vpop.f32.mrb[245].mxu0 }
 0x5ad   : > { %v5811_v0 = vadd.f32 %v5810_v30, %v5809_v45  ;;  %v5923_v34 = vadd.f32 %v5922_v8, %v5921_v36  ;;  %v5812_v44 = vpop.f32.mrb[246].mxu1  ;;  %v5924_v49 = vpop.f32.mrb[246].mxu0 }
 0x5ae   : > { %v5813_v60 = vpop.f32.mrb[247].mxu1  ;;  %v5925_v6 = vpop.f32.mrb[247].mxu0 }
 0x5af   : > { %v4188_v10 = vadd.f32 %v5811_v0, %v8175_v61  ;;  %v5814_v24 = vadd.f32 %v5813_v60, %v5812_v44  ;;  %v5926_v39 = vadd.f32 %v5925_v6, %v5924_v49 }
 0x5b1   : > { %v8295_v59 = vadd.f32 %v5923_v34, %v4188_v10  ;;  %v4191_v11 = vadd.f32 %v5814_v24, %v8180_v4 }
 0x5b3   : > { %v8298_v40 = vadd.f32 %v5926_v39, %v4191_v11  ;;  %v5815_v33 = vpop.f32.mrb[248].mxu1  ;;  %v5927_v38 = vpop.f32.mrb[248].mxu0 }
 0x5b4   : > { %v5816_v2 = vpop.f32.mrb[249].mxu1  ;;  %v5928_v48 = vpop.f32.mrb[249].mxu0 }
 0x5b5   : > { %v5817_v56 = vadd.f32 %v5816_v2, %v5815_v33  ;;  %v5929_v53 = vadd.f32 %v5928_v48, %v5927_v38  ;;  %v5818_v13 = vpop.f32.mrb[250].mxu1  ;;  %v5930_v22 = vpop.f32.mrb[250].mxu0 }
 0x5b6   : > { %v5819_v35 = vpop.f32.mrb[251].mxu1  ;;  %v5931_v29 = vpop.f32.mrb[251].mxu0 }
 0x5b7   : > { %v4196_v61 = vadd.f32 %v5817_v56, %v8185_v32  ;;  %v5820_v41 = vadd.f32 %v5819_v35, %v5818_v13  ;;  %v5932_v9 = vadd.f32 %v5931_v29, %v5930_v22 }
 0x5b9   : > { %v8301_v25 = vadd.f32 %v5929_v53, %v4196_v61  ;;  %v4199_v4 = vadd.f32 %v5820_v41, %v8190_v55 }
 0x5bb   : > { %v8304_v37 = vadd.f32 %v5932_v9, %v4199_v4  ;;  %v5949_v7 = vpop.f32.mrb[252].mxu1  ;;  %v6061_v42 = vpop.f32.mrb[252].mxu0 }
 0x5bc   : > { %v5950_v45 = vpop.f32.mrb[253].mxu1  ;;  %v6062_v36 = vpop.f32.mrb[253].mxu0 }
 0x5bd   : > { %v5951_v30 = vadd.f32 %v5950_v45, %v5949_v7  ;;  %v6063_v8 = vadd.f32 %v6062_v36, %v6061_v42  ;;  %v5952_v0 = vpop.f32.mrb[254].mxu1  ;;  %v6064_v34 = vpop.f32.mrb[254].mxu0 }
 0x5be   : > { %v5953_v44 = vpop.f32.mrb[255].mxu1  ;;  %v6065_v32 = vpop.f32.mrb[255].mxu0 }
 0x5bf   : > { %v4398_v49 = vadd.f32 %v5951_v30, %v8195_v46  ;;  %v5954_v60 = vadd.f32 %v5953_v44, %v5952_v0  ;;  %v6066_v6 = vadd.f32 %v6065_v32, %v6064_v34 }
 0x5c1   : > { %v4559_v55 = vadd.f32 %v6063_v8, %v4398_v49  ;;  %v4401_v10 = vadd.f32 %v5954_v60, %v8200_v12 }
 0x5c3   : > { %v4685_v24 = vmax.f32 %v4559_v55, 0.0  ;;  %v4562_v39 = vadd.f32 %v6066_v6, %v4401_v10  ;;  %v5955_v11 = vpop.f32.mrb[0].mxu1  ;;  %v6067_v33 = vpop.f32.mrb[0].mxu0 }
 0x5c4   : > { %v5956_v38 = vpop.f32.mrb[1].mxu1  ;;  %v6068_v2 = vpop.f32.mrb[1].mxu0 }
 0x5c5   : > { %4717 = vst [vmem:[%s8311_s22] sm:$0xff] %v4685_v24  ;;  %v4686_v48 = vmax.f32 %v4562_v39, 0.0  ;;  %v5957_v46 = vadd.f32 %v5956_v38, %v5955_v11  ;;  %v6069_v56 = vadd.f32 %v6068_v2, %v6067_v33  ;;  %v5958_v53 = vpop.f32.mrb[2].mxu1  ;;  %v6070_v13 = vpop.f32.mrb[2].mxu0 }
 0x5c6   : > { %v5959_v22 = vpop.f32.mrb[3].mxu1  ;;  %v6071_v35 = vpop.f32.mrb[3].mxu0 }
 0x5c7   : > { %4718 = vst [vmem:[%s8311_s22 + $0x8] sm:$0xff] %v4686_v48  ;;  %v4406_v12 = vadd.f32 %v5957_v46, %v8205_v51  ;;  %v5960_v29 = vadd.f32 %v5959_v22, %v5958_v53  ;;  %v6072_v61 = vadd.f32 %v6071_v35, %v6070_v13 }
 0x5c9   : > { %v4567_v41 = vadd.f32 %v6069_v56, %v4406_v12  ;;  %v4409_v9 = vadd.f32 %v5960_v29, %v8210_v21 }
 0x5cb   : > { %v4687_v4 = vmax.f32 %v4567_v41, 0.0  ;;  %v4570_v7 = vadd.f32 %v6072_v61, %v4409_v9  ;;  %v5961_v42 = vpop.f32.mrb[4].mxu1  ;;  %v6073_v45 = vpop.f32.mrb[4].mxu0 }
 0x5cc   : > { %v5962_v36 = vpop.f32.mrb[5].mxu1  ;;  %v6074_v30 = vpop.f32.mrb[5].mxu0 }
 0x5cd   : > { %4719 = vst [vmem:[%s8311_s22 + $0x10] sm:$0xff] %v4687_v4  ;;  %v4688_v8 = vmax.f32 %v4570_v7, 0.0  ;;  %v5963_v0 = vadd.f32 %v5962_v36, %v5961_v42  ;;  %v6075_v34 = vadd.f32 %v6074_v30, %v6073_v45  ;;  %v5964_v44 = vpop.f32.mrb[6].mxu1  ;;  %v6076_v32 = vpop.f32.mrb[6].mxu0 }
 0x5ce   : > { %v5965_v51 = vpop.f32.mrb[7].mxu1  ;;  %v6077_v49 = vpop.f32.mrb[7].mxu0 }
 0x5cf   : > { %4720 = vst [vmem:[%s8311_s22 + $0x18] sm:$0xff] %v4688_v8  ;;  %v4414_v60 = vadd.f32 %v5963_v0, %v8215_v3  ;;  %v5966_v6 = vadd.f32 %v5965_v51, %v5964_v44  ;;  %v6078_v21 = vadd.f32 %v6077_v49, %v6076_v32 }
 0x5d1   : > { %v4575_v55 = vadd.f32 %v6075_v34, %v4414_v60  ;;  %v4417_v10 = vadd.f32 %v5966_v6, %v8220_v5 }
 0x5d3   : > { %v4689_v24 = vmax.f32 %v4575_v55, 0.0  ;;  %v4578_v39 = vadd.f32 %v6078_v21, %v4417_v10  ;;  %v5967_v11 = vpop.f32.mrb[8].mxu1  ;;  %v6079_v33 = vpop.f32.mrb[8].mxu0 }
 0x5d4   : > { %v5968_v38 = vpop.f32.mrb[9].mxu1  ;;  %v6080_v2 = vpop.f32.mrb[9].mxu0 }
 0x5d5   : > { %4721 = vst [vmem:[%s8311_s22 + $0x20] sm:$0xff] %v4689_v24  ;;  %v4690_v48 = vmax.f32 %v4578_v39, 0.0  ;;  %v5969_v46 = vadd.f32 %v5968_v38, %v5967_v11  ;;  %v6081_v56 = vadd.f32 %v6080_v2, %v6079_v33  ;;  %v5970_v53 = vpop.f32.mrb[10].mxu1  ;;  %v6082_v13 = vpop.f32.mrb[10].mxu0 }
 0x5d6   : > { %v5971_v3 = vpop.f32.mrb[11].mxu1  ;;  %v6083_v22 = vpop.f32.mrb[11].mxu0 }
 0x5d7   : > { %4722 = vst [vmem:[%s8311_s22 + $0x28] sm:$0xff] %v4690_v48  ;;  %v4422_v35 = vadd.f32 %v5969_v46, %v8225_v27  ;;  %v5972_v12 = vadd.f32 %v5971_v3, %v5970_v53  ;;  %v6084_v5 = vadd.f32 %v6083_v22, %v6082_v13 }
 0x5d9   : > { %v4583_v29 = vadd.f32 %v6081_v56, %v4422_v35  ;;  %v4425_v61 = vadd.f32 %v5972_v12, %v8230_v52 }
 0x5db   : > { %v4691_v41 = vmax.f32 %v4583_v29, 0.0  ;;  %v4586_v9 = vadd.f32 %v6084_v5, %v4425_v61  ;;  %v5973_v4 = vpop.f32.mrb[12].mxu1  ;;  %v6085_v7 = vpop.f32.mrb[12].mxu0 }
 0x5dc   : > { %v5974_v42 = vpop.f32.mrb[13].mxu1  ;;  %v6086_v45 = vpop.f32.mrb[13].mxu0 }
 0x5dd   : > { %4723 = vst [vmem:[%s8311_s22 + $0x30] sm:$0xff] %v4691_v41  ;;  %v4692_v36 = vmax.f32 %v4586_v9, 0.0  ;;  %v5975_v30 = vadd.f32 %v5974_v42, %v5973_v4  ;;  %v6087_v8 = vadd.f32 %v6086_v45, %v6085_v7  ;;  %v5976_v0 = vpop.f32.mrb[14].mxu1  ;;  %v6088_v34 = vpop.f32.mrb[14].mxu0 }
 0x5de   : > { %v5977_v27 = vpop.f32.mrb[15].mxu1  ;;  %v6089_v44 = vpop.f32.mrb[15].mxu0 }
 0x5df   : > { %4724 = vst [vmem:[%s8311_s22 + $0x38] sm:$0xff] %v4692_v36  ;;  %v4430_v32 = vadd.f32 %v5975_v30, %v8235_v31  ;;  %v5978_v51 = vadd.f32 %v5977_v27, %v5976_v0  ;;  %v6090_v52 = vadd.f32 %v6089_v44, %v6088_v34 }
 0x5e1   : > { %v4591_v49 = vadd.f32 %v6087_v8, %v4430_v32  ;;  %v4433_v60 = vadd.f32 %v5978_v51, %v8238_v28 }
 0x5e3   : > { %v4693_v6 = vmax.f32 %v4591_v49, 0.0  ;;  %v4594_v21 = vadd.f32 %v6090_v52, %v4433_v60  ;;  %v5979_v55 = vpop.f32.mrb[16].mxu1  ;;  %v6091_v10 = vpop.f32.mrb[16].mxu0 }
 0x5e4   : > { %v5980_v24 = vpop.f32.mrb[17].mxu1  ;;  %v6092_v39 = vpop.f32.mrb[17].mxu0 }
 0x5e5   : > { %4725 = vst [vmem:[%s8311_s22 + $0x40] sm:$0xff] %v4693_v6  ;;  %v4694_v11 = vmax.f32 %v4594_v21, 0.0  ;;  %v5981_v33 = vadd.f32 %v5980_v24, %v5979_v55  ;;  %v6093_v38 = vadd.f32 %v6092_v39, %v6091_v10  ;;  %v5982_v2 = vpop.f32.mrb[18].mxu1  ;;  %v6094_v48 = vpop.f32.mrb[18].mxu0 }
 0x5e6   : > { %v5983_v31 = vpop.f32.mrb[19].mxu1  ;;  %v6095_v46 = vpop.f32.mrb[19].mxu0 }
 0x5e7   : > { %4726 = vst [vmem:[%s8311_s22 + $0x48] sm:$0xff] %v4694_v11  ;;  %v4438_v56 = vadd.f32 %v5981_v33, %v8241_v50  ;;  %v5984_v53 = vadd.f32 %v5983_v31, %v5982_v2  ;;  %v6096_v28 = vadd.f32 %v6095_v46, %v6094_v48 }
 0x5e9   : > { %v4599_v13 = vadd.f32 %v6093_v38, %v4438_v56  ;;  %v4441_v3 = vadd.f32 %v5984_v53, %v8244_v17 }
 0x5eb   : > { %v4695_v22 = vmax.f32 %v4599_v13, 0.0  ;;  %v4602_v35 = vadd.f32 %v6096_v28, %v4441_v3  ;;  %v5985_v12 = vpop.f32.mrb[20].mxu1  ;;  %v6097_v5 = vpop.f32.mrb[20].mxu0 }
 0x5ec   : > { %v5986_v29 = vpop.f32.mrb[21].mxu1  ;;  %v6098_v61 = vpop.f32.mrb[21].mxu0 }
 0x5ed   : > { %4727 = vst [vmem:[%s8311_s22 + $0x50] sm:$0xff] %v4695_v22  ;;  %v4696_v41 = vmax.f32 %v4602_v35, 0.0  ;;  %v5987_v9 = vadd.f32 %v5986_v29, %v5985_v12  ;;  %v6099_v4 = vadd.f32 %v6098_v61, %v6097_v5  ;;  %v5988_v7 = vpop.f32.mrb[22].mxu1  ;;  %v6100_v42 = vpop.f32.mrb[22].mxu0 }
 0x5ee   : > { %v5989_v50 = vpop.f32.mrb[23].mxu1  ;;  %v6101_v45 = vpop.f32.mrb[23].mxu0 }
 0x5ef   : > { %4728 = vst [vmem:[%s8311_s22 + $0x58] sm:$0xff] %v4696_v41  ;;  %v4446_v36 = vadd.f32 %v5987_v9, %v8247_v19  ;;  %v5990_v30 = vadd.f32 %v5989_v50, %v5988_v7  ;;  %v6102_v17 = vadd.f32 %v6101_v45, %v6100_v42 }
 0x5f1   : > { %v4607_v8 = vadd.f32 %v6099_v4, %v4446_v36  ;;  %v4449_v0 = vadd.f32 %v5990_v30, %v8250_v62 }
 0x5f3   : > { %v4697_v34 = vmax.f32 %v4607_v8, 0.0  ;;  %v4610_v27 = vadd.f32 %v6102_v17, %v4449_v0  ;;  %v5991_v44 = vpop.f32.mrb[24].mxu1  ;;  %v6103_v32 = vpop.f32.mrb[24].mxu0 }
 0x5f4   : > { %v5992_v51 = vpop.f32.mrb[25].mxu1  ;;  %v6104_v52 = vpop.f32.mrb[25].mxu0 }
 0x5f5   : > { %4729 = vst [vmem:[%s8311_s22 + $0x60] sm:$0xff] %v4697_v34  ;;  %v4698_v49 = vmax.f32 %v4610_v27, 0.0  ;;  %v5993_v60 = vadd.f32 %v5992_v51, %v5991_v44  ;;  %v6105_v6 = vadd.f32 %v6104_v52, %v6103_v32  ;;  %v5994_v21 = vpop.f32.mrb[26].mxu1  ;;  %v6106_v55 = vpop.f32.mrb[26].mxu0 }
 0x5f6   : > { %v5995_v19 = vpop.f32.mrb[27].mxu1  ;;  %v6107_v10 = vpop.f32.mrb[27].mxu0 }
 0x5f7   : > { %4730 = vst [vmem:[%s8311_s22 + $0x68] sm:$0xff] %v4698_v49  ;;  %v4454_v24 = vadd.f32 %v5993_v60, %v8253_v47  ;;  %v5996_v39 = vadd.f32 %v5995_v19, %v5994_v21  ;;  %v6108_v62 = vadd.f32 %v6107_v10, %v6106_v55 }
 0x5f9   : > { %v4615_v11 = vadd.f32 %v6105_v6, %v4454_v24  ;;  %v4457_v33 = vadd.f32 %v5996_v39, %v8256_v63 }
 0x5fb   : > { %v4699_v38 = vmax.f32 %v4615_v11, 0.0  ;;  %v4618_v2 = vadd.f32 %v6108_v62, %v4457_v33  ;;  %v5997_v48 = vpop.f32.mrb[28].mxu1  ;;  %v6109_v31 = vpop.f32.mrb[28].mxu0 }
 0x5fc   : > { %v5998_v46 = vpop.f32.mrb[29].mxu1  ;;  %v6110_v56 = vpop.f32.mrb[29].mxu0 }
 0x5fd   : > { %4731 = vst [vmem:[%s8311_s22 + $0x70] sm:$0xff] %v4699_v38  ;;  %v4700_v53 = vmax.f32 %v4618_v2, 0.0  ;;  %v5999_v28 = vadd.f32 %v5998_v46, %v5997_v48  ;;  %v6111_v13 = vadd.f32 %v6110_v56, %v6109_v31  ;;  %v6000_v3 = vpop.f32.mrb[30].mxu1  ;;  %v6112_v22 = vpop.f32.mrb[30].mxu0 }
 0x5fe   : > { %v6001_v47 = vpop.f32.mrb[31].mxu1  ;;  %v6113_v35 = vpop.f32.mrb[31].mxu0 }
 0x5ff   : > { %4732 = vst [vmem:[%s8311_s22 + $0x78] sm:$0xff] %v4700_v53  ;;  %v4462_v12 = vadd.f32 %v5999_v28, %v8259_v16  ;;  %v6002_v5 = vadd.f32 %v6001_v47, %v6000_v3  ;;  %v6114_v63 = vadd.f32 %v6113_v35, %v6112_v22 }
 0x601   : > { %v4623_v29 = vadd.f32 %v6111_v13, %v4462_v12  ;;  %v4465_v61 = vadd.f32 %v6002_v5, %v8262_v58 }
 0x603   : > { %v4701_v41 = vmax.f32 %v4623_v29, 0.0  ;;  %v4626_v9 = vadd.f32 %v6114_v63, %v4465_v61  ;;  %v6003_v4 = vpop.f32.mrb[32].mxu1  ;;  %v6115_v7 = vpop.f32.mrb[32].mxu0 }
 0x604   : > { %v6004_v42 = vpop.f32.mrb[33].mxu1  ;;  %v6116_v50 = vpop.f32.mrb[33].mxu0 }
 0x605   : > { %4733 = vst [vmem:[%s8311_s22 + $0x80] sm:$0xff] %v4701_v41  ;;  %v4702_v45 = vmax.f32 %v4626_v9, 0.0  ;;  %v6005_v36 = vadd.f32 %v6004_v42, %v6003_v4  ;;  %v6117_v30 = vadd.f32 %v6116_v50, %v6115_v7  ;;  %v6006_v17 = vpop.f32.mrb[34].mxu1  ;;  %v6118_v8 = vpop.f32.mrb[34].mxu0 }
 0x606   : > { %v6007_v16 = vpop.f32.mrb[35].mxu1  ;;  %v6119_v0 = vpop.f32.mrb[35].mxu0 }
 0x607   : > { %4734 = vst [vmem:[%s8311_s22 + $0x88] sm:$0xff] %v4702_v45  ;;  %v4470_v34 = vadd.f32 %v6005_v36, %v8265_v26  ;;  %v6008_v27 = vadd.f32 %v6007_v16, %v6006_v17  ;;  %v6120_v58 = vadd.f32 %v6119_v0, %v6118_v8 }
 0x609   : > { %v4631_v44 = vadd.f32 %v6117_v30, %v4470_v34  ;;  %v4473_v32 = vadd.f32 %v6008_v27, %v8268_v1 }
 0x60b   : > { %v4703_v51 = vmax.f32 %v4631_v44, 0.0  ;;  %v4634_v52 = vadd.f32 %v6120_v58, %v4473_v32  ;;  %v6009_v49 = vpop.f32.mrb[36].mxu1  ;;  %v6121_v60 = vpop.f32.mrb[36].mxu0 }
 0x60c   : > { %v6010_v6 = vpop.f32.mrb[37].mxu1  ;;  %v6122_v21 = vpop.f32.mrb[37].mxu0 }
 0x60d   : > { %4735 = vst [vmem:[%s8311_s22 + $0x90] sm:$0xff] %v4703_v51  ;;  %v4704_v55 = vmax.f32 %v4634_v52, 0.0  ;;  %v6011_v19 = vadd.f32 %v6010_v6, %v6009_v49  ;;  %v6123_v10 = vadd.f32 %v6122_v21, %v6121_v60  ;;  %v6012_v24 = vpop.f32.mrb[38].mxu1  ;;  %v6124_v39 = vpop.f32.mrb[38].mxu0 }
 0x60e   : > { %v6013_v26 = vpop.f32.mrb[39].mxu1  ;;  %v6125_v62 = vpop.f32.mrb[39].mxu0 }
 0x60f   : > { %4736 = vst [vmem:[%s8311_s22 + $0x98] sm:$0xff] %v4704_v55  ;;  %v4478_v11 = vadd.f32 %v6011_v19, %v8271_v43  ;;  %v6014_v33 = vadd.f32 %v6013_v26, %v6012_v24  ;;  %v6126_v1 = vadd.f32 %v6125_v62, %v6124_v39 }
 0x611   : > { %v4639_v38 = vadd.f32 %v6123_v10, %v4478_v11  ;;  %v4481_v2 = vadd.f32 %v6014_v33, %v8274_v15 }
 0x613   : > { %v4705_v48 = vmax.f32 %v4639_v38, 0.0  ;;  %v4642_v31 = vadd.f32 %v6126_v1, %v4481_v2  ;;  %v6015_v46 = vpop.f32.mrb[40].mxu1  ;;  %v6127_v56 = vpop.f32.mrb[40].mxu0 }
 0x614   : > { %v6016_v53 = vpop.f32.mrb[41].mxu1  ;;  %v6128_v28 = vpop.f32.mrb[41].mxu0 }
 0x615   : > { %4737 = vst [vmem:[%s8311_s22 + $0xa0] sm:$0xff] %v4705_v48  ;;  %v4706_v13 = vmax.f32 %v4642_v31, 0.0  ;;  %v6017_v3 = vadd.f32 %v6016_v53, %v6015_v46  ;;  %v6129_v22 = vadd.f32 %v6128_v28, %v6127_v56  ;;  %v6018_v47 = vpop.f32.mrb[42].mxu1  ;;  %v6130_v35 = vpop.f32.mrb[42].mxu0 }
 0x616   : > { %v6019_v43 = vpop.f32.mrb[43].mxu1  ;;  %v6131_v12 = vpop.f32.mrb[43].mxu0 }
 0x617   : > { %4738 = vst [vmem:[%s8311_s22 + $0xa8] sm:$0xff] %v4706_v13  ;;  %v4486_v5 = vadd.f32 %v6017_v3, %v8277_v14  ;;  %v6020_v63 = vadd.f32 %v6019_v43, %v6018_v47  ;;  %v6132_v15 = vadd.f32 %v6131_v12, %v6130_v35 }
 0x619   : > { %v4647_v29 = vadd.f32 %v6129_v22, %v4486_v5  ;;  %v4489_v61 = vadd.f32 %v6020_v63, %v8280_v20 }
 0x61b   : > { %v4707_v41 = vmax.f32 %v4647_v29, 0.0  ;;  %v4650_v9 = vadd.f32 %v6132_v15, %v4489_v61  ;;  %v6021_v4 = vpop.f32.mrb[44].mxu1  ;;  %v6133_v7 = vpop.f32.mrb[44].mxu0 }
 0x61c   : > { %v6022_v42 = vpop.f32.mrb[45].mxu1  ;;  %v6134_v50 = vpop.f32.mrb[45].mxu0 }
 0x61d   : > { %4739 = vst [vmem:[%s8311_s22 + $0xb0] sm:$0xff] %v4707_v41  ;;  %v4708_v45 = vmax.f32 %v4650_v9, 0.0  ;;  %v6023_v36 = vadd.f32 %v6022_v42, %v6021_v4  ;;  %v6135_v30 = vadd.f32 %v6134_v50, %v6133_v7  ;;  %v6024_v17 = vpop.f32.mrb[46].mxu1  ;;  %v6136_v8 = vpop.f32.mrb[46].mxu0 }
 0x61e   : > { %v6025_v14 = vpop.f32.mrb[47].mxu1  ;;  %v6137_v16 = vpop.f32.mrb[47].mxu0 }
 0x61f   : > { %4740 = vst [vmem:[%s8311_s22 + $0xb8] sm:$0xff] %v4708_v45  ;;  %v4494_v0 = vadd.f32 %v6023_v36, %v8283_v54  ;;  %v6026_v34 = vadd.f32 %v6025_v14, %v6024_v17  ;;  %v6138_v20 = vadd.f32 %v6137_v16, %v6136_v8 }
 0x621   : > { %v4655_v27 = vadd.f32 %v6135_v30, %v4494_v0  ;;  %v4497_v58 = vadd.f32 %v6026_v34, %v8286_v57 }
 0x623   : > { %v4709_v44 = vmax.f32 %v4655_v27, 0.0  ;;  %v4658_v32 = vadd.f32 %v6138_v20, %v4497_v58  ;;  %v6027_v51 = vpop.f32.mrb[48].mxu1  ;;  %v6139_v52 = vpop.f32.mrb[48].mxu0 }
 0x624   : > { %v6028_v49 = vpop.f32.mrb[49].mxu1  ;;  %v6140_v60 = vpop.f32.mrb[49].mxu0 }
 0x625   : > { %4741 = vst [vmem:[%s8311_s22 + $0xc0] sm:$0xff] %v4709_v44  ;;  %v4710_v6 = vmax.f32 %v4658_v32, 0.0  ;;  %v6029_v21 = vadd.f32 %v6028_v49, %v6027_v51  ;;  %v6141_v55 = vadd.f32 %v6140_v60, %v6139_v52  ;;  %v6030_v19 = vpop.f32.mrb[50].mxu1  ;;  %v6142_v10 = vpop.f32.mrb[50].mxu0 }
 0x626   : > { %v6031_v54 = vpop.f32.mrb[51].mxu1  ;;  %v6143_v24 = vpop.f32.mrb[51].mxu0 }
 0x627   : > { %4742 = vst [vmem:[%s8311_s22 + $0xc8] sm:$0xff] %v4710_v6  ;;  %v4502_v39 = vadd.f32 %v6029_v21, %v8289_v23  ;;  %v6032_v26 = vadd.f32 %v6031_v54, %v6030_v19  ;;  %v6144_v57 = vadd.f32 %v6143_v24, %v6142_v10 }
 0x629   : > { %v4663_v62 = vadd.f32 %v6141_v55, %v4502_v39  ;;  %v4505_v11 = vadd.f32 %v6032_v26, %v8292_v18 }
 0x62b   : > { %v4711_v33 = vmax.f32 %v4663_v62, 0.0  ;;  %v4666_v1 = vadd.f32 %v6144_v57, %v4505_v11  ;;  %v6033_v38 = vpop.f32.mrb[52].mxu1  ;;  %v6145_v2 = vpop.f32.mrb[52].mxu0 }
 0x62c   : > { %v6034_v48 = vpop.f32.mrb[53].mxu1  ;;  %v6146_v31 = vpop.f32.mrb[53].mxu0 }
 0x62d   : > { %4743 = vst [vmem:[%s8311_s22 + $0xd0] sm:$0xff] %v4711_v33  ;;  %v4712_v46 = vmax.f32 %v4666_v1, 0.0  ;;  %v6035_v56 = vadd.f32 %v6034_v48, %v6033_v38  ;;  %v6147_v53 = vadd.f32 %v6146_v31, %v6145_v2  ;;  %v6036_v28 = vpop.f32.mrb[54].mxu1  ;;  %v6148_v13 = vpop.f32.mrb[54].mxu0 }
 0x62e   : > { %v6037_v23 = vpop.f32.mrb[55].mxu1  ;;  %v6149_v3 = vpop.f32.mrb[55].mxu0 }
 0x62f   : > { %4744 = vst [vmem:[%s8311_s22 + $0xd8] sm:$0xff] %v4712_v46  ;;  %v4510_v22 = vadd.f32 %v6035_v56, %v8295_v59  ;;  %v6038_v47 = vadd.f32 %v6037_v23, %v6036_v28  ;;  %v6150_v18 = vadd.f32 %v6149_v3, %v6148_v13 }
 0x631   : > { %v4671_v35 = vadd.f32 %v6147_v53, %v4510_v22  ;;  %v4513_v43 = vadd.f32 %v6038_v47, %v8298_v40 }
 0x633   : > { %v4713_v12 = vmax.f32 %v4671_v35, 0.0  ;;  %v4674_v5 = vadd.f32 %v6150_v18, %v4513_v43  ;;  %v6039_v63 = vpop.f32.mrb[56].mxu1  ;;  %v6151_v15 = vpop.f32.mrb[56].mxu0 }
 0x634   : > { %v6040_v29 = vpop.f32.mrb[57].mxu1  ;;  %v6152_v61 = vpop.f32.mrb[57].mxu0 }
 0x635   : > { %4745 = vst [vmem:[%s8311_s22 + $0xe0] sm:$0xff] %v4713_v12  ;;  %v4714_v41 = vmax.f32 %v4674_v5, 0.0  ;;  %v6041_v9 = vadd.f32 %v6040_v29, %v6039_v63  ;;  %v6153_v4 = vadd.f32 %v6152_v61, %v6151_v15  ;;  %v6042_v7 = vpop.f32.mrb[58].mxu1  ;;  %v6154_v59 = vpop.f32.mrb[58].mxu0 }
 0x636   : > { %v6043_v42 = vpop.f32.mrb[59].mxu1  ;;  %v6155_v50 = vpop.f32.mrb[59].mxu0 }
 0x637   : > { %4746 = vst [vmem:[%s8311_s22 + $0xe8] sm:$0xff] %v4714_v41  ;;  %v4518_v40 = vadd.f32 %v6041_v9, %v8301_v25  ;;  %v6044_v45 = vadd.f32 %v6043_v42, %v6042_v7  ;;  %v6156_v36 = vadd.f32 %v6155_v50, %v6154_v59 }
 0x639   : > { %v4679_v30 = vadd.f32 %v6153_v4, %v4518_v40  ;;  %v4521_v17 = vadd.f32 %v6044_v45, %v8304_v37 }
 0x63b   : > { %v4715_v8 = vmax.f32 %v4679_v30, 0.0  ;;  %v4682_v14 = vadd.f32 %v6156_v36, %v4521_v17 }
 0x63d   : > { %4747 = vst [vmem:[%s8311_s22 + $0xf0] sm:$0xff] %v4715_v8  ;;  %v4716_v25 = vmax.f32 %v4682_v14, 0.0 }
 0x63f   : > { %4748 = vst [vmem:[%s8311_s22 + $0xf8] sm:$0xff] %v4716_v25 }
 0x640   : > { %6546 = shalt.err (!%p6543_p7)
}
 0x641   : > { %s6547_s18 = scalar_lea.hbm %s8378_s17, 4096  ;;  %s6551_s22 = scalar_lea.hbm %s8435_s8, 8192 }
 0x642   : > { %p6548_p8 = scmp.ne.s32.totalorder %s8378_s17, %s6547_s18  ;;  %p6552_p1 = scmp.lt.u32.totalorder %s8378_s17, %s8435_s8 }
 0x643   : > { %p6553_p0 = scmp.lt.u32.totalorder %s6551_s22, %s6547_s18  ;;  %p6555_p6 = scmp.lt.u32.totalorder %s6547_s18, %s8378_s17 }
 0x644   : > { %p6549_p11 = pnand %p6548_p8, %p8859_p9 }
 0x645   : > { %p6554_p5 = por %p6553_p0, %p6552_p1 }
 0x646   : > { %p6550_p13 = pneg %p6549_p11 }
 0x647   : > { %p6556_p10 = por %p6555_p6, %p6554_p5 }
 0x649   : > { %p6557_p12 = pnand %p6556_p10, %p6550_p13 }
 0x64b   : > { %6560 = shalt.err (!%p6557_p12)
}
 0x64c   : > { %s6607_s20 = smov 128   ;;  %s6608_s9 = smov 8  }
 0x64d   : > { %6241 = dma.vmem_to_hbm [thread:$0]  (%p8859_p9), %s8380_s24, 4096, %s8378_s17, %s8386_s19, %s6607_s20, %s6607_s20, %s6608_s9  }
 0x64e PF: > { %p6253_p2 = scmp.ge.s32.totalorder %s6599_s30, 2  ;;  %s4778_s10 = sand.u32 1, %s6587_s27  }
 0x64f   : > { %p8860_p3 = scmp.ne.s32.totalorder %s8589_s16, 0  ;;  %s4779_s12 = scalar_lea.sflag [#allocation4], %s4778_s10 }
 0x651   : > { %p6248_p4 = pnand %p6253_p2, %p8860_p3 }
 0x653   : > { %6582 = dma.done.wait (!%p6248_p4), %s4779_s12, 4096  }
 0x654   : > { %6584 = vsyncadd (!%p6248_p4), %s4779_s12, 4294963200  ;;  %p19_p7 = scmp.ge.s32.totalorder %s6679_s11, 4   ;;  %s8861_s27 = smov %s6591_s28 }
 0x655   : > { %s8862_s28 = smov %s6595_s29  ;;  %s8863_s29 = smov %s6690_s14 }
 0x656   : > { %s8864_s30 = smov %s6679_s11  ;;  %21 = sbr.rel (!%p19_p7) target bundleno = 4 (0x4), region = 92 }
 0x65d   :  { %4784 = vsyncpa [#allocation3], 1 }
 0x65e   :  { %4786 = vsyncpa [#allocation3 + $0x1], 1 }
 0x65f   :  { %4787 = vsyncpa [#allocation4], 1 }
 0x660   :  { %4789 = vsyncpa [#allocation4 + $0x1], 1 }

</bundles_post_ra>
